<compile_context>
chip_gen: v7x
topology: tpu7x:2x2x1
jax: 0.10.0
libtpu: 0.0.40
codegen_flags: <defaults>
</compile_context>

<pallas_src>
import jax
import jax.numpy as jnp
from jax.experimental import pallas as pl
from jax.experimental.pallas import tpu as pltpu


def _score_kernel(x_ref, fw_ref, cw_ref, bias_ref, out_ref):
    """Grid = (sample blocks, channel chunks); channel chunks are the reduction.

    x_ref   : (B, Ct, HW) VMEM  activation chunk
    fw_ref  : (HW, 1)     VMEM  fc weight column (grid-invariant)
    cw_ref  : (Ct, 1)     VMEM  1x1-conv weight chunk
    bias_ref: (1,)        SMEM  folded bias  cb * sum(fw) + fb
    out_ref : (B, 1)      VMEM  per-sample scores (resident accumulator)
    """
    c_step = pl.program_id(1)
    n_c = pl.num_programs(1)
    b, ct, hw = x_ref.shape

    # One batched MXU matvec over the whole chunk: (B*Ct, HW) @ (HW, 1).
    # The reshape is layout-free (Ct is a multiple of 8, HW is the minor dim).
    t = jnp.dot(x_ref[...].reshape(b * ct, hw), fw_ref[...],
                preferred_element_type=jnp.float32)               # (B*Ct, 1)
    # Tiny cw-weighted reduction over this channel chunk.
    partial = jnp.sum(t.reshape(b, ct, 1) * cw_ref[...], axis=1)  # (B, 1)

    @pl.when(c_step == 0)
    def _():
        out_ref[...] = partial

    @pl.when(c_step != 0)
    def _():
        out_ref[...] = out_ref[...] + partial

    @pl.when(c_step == n_c - 1)
    def _():
        y = out_ref[...] + bias_ref[0]
        a = jnp.abs(y)
        # sigmoid(log(a)) == a / (1 + a) for a >= 0 (and -> 0 at a == 0).
        out_ref[...] = a / (1.0 + a)


def _round_up(x, m):
    return ((x + m - 1) // m) * m


def _vmem_capacity_bytes():
    try:
        return int(pltpu.get_tpu_info().vmem_capacity_bytes)
    except Exception:
        return 64 * 1024 * 1024  # conservative fallback (v7x per-core VMEM)


def _pick_block_sizes(vn, c, hw, itemsize, x_budget_bytes):
    """Pick (B, Ct).

    B  (samples per parallel step): VN itself or a multiple of 8 dividing VN,
       so the (B, 1) output block is always sublane-legal.
    Ct (channels per reduction step): multiple of 8 dividing C, targeting
       ~2 MiB DMA chunks with >= 2 steps so the input pipeline double-buffers.
    """
    b_cands = [b for b in range(8, vn, 8) if vn % b == 0] + [vn]
    ct_cands = [t for t in range(8, c + 1, 8) if c % t == 0] or [c]

    def step_bytes(b, t):
        return b * t * hw * itemsize

    best_key, best = None, None
    for b in b_cands:
        fits = [t for t in ct_cands if 2 * step_bytes(b, t) <= x_budget_bytes]
        if not fits:
            continue
        pref = [t for t in fits if c // t >= 2 and step_bytes(b, t) <= (2 << 20)]
        t = max(pref) if pref else min(fits)
        gm = vn // b
        # Prefer >= 2 parallel steps (v7x has 2 TensorCores), an even number of
        # them, then the largest sample block (fewest grid steps).
        key = (gm >= 2, gm >= 2 and gm % 2 == 0, b)
        if best_key is None or key > best_key:
            best_key, best = key, (b, t)
    if best is None:
        return min(b_cands), min(ct_cands)
    return best


def group_schema_forward(raw_view, conv_w, conv_b, fc_w, fc_b):
    """raw_view: (V, N, C, H, W). Returns (N, V) softmax-normalized view scores."""
    V, N, C, H, W = raw_view.shape
    HW = H * W
    VN = V * N

    x = raw_view.reshape(VN, C, HW)  # free view: no pad, no copy
    if x.dtype not in (jnp.float32, jnp.bfloat16):
        x = x.astype(jnp.float32)
    itemsize = jnp.dtype(x.dtype).itemsize

    fw = fc_w.reshape(HW).astype(jnp.float32)
    fw_col = fw.astype(x.dtype).reshape(HW, 1)            # (HW, 1)
    cw_col = conv_w.reshape(C, 1).astype(jnp.float32)     # (C, 1)
    # Fold the conv bias through the fc layer: y = sum cw*fw*x + cb*sum(fw) + fb
    bias = (conv_b.reshape(()) * jnp.sum(fw)
            + fc_b.reshape(())).reshape(1).astype(jnp.float32)

    vmem_cap = _vmem_capacity_bytes()
    vmem_cap_budget = min(56 * 1024 * 1024, int(0.85 * vmem_cap))
    x_budget = vmem_cap_budget // 2            # for the double-buffered x blocks
    B, Ct = _pick_block_sizes(VN, C, HW, itemsize, x_budget)
    GM, GC = VN // B, C // Ct

    # Padded VMEM footprints of the (double-buffered) blocks, plus headroom.
    x_block = B * Ct * _round_up(HW, 128) * itemsize
    fw_block = _round_up(HW, 8) * 128 * itemsize
    cw_block = _round_up(Ct, 8) * 128 * 4
    out_block = _round_up(B, 8) * 128 * 4
    needed = 2 * (x_block + fw_block + cw_block + out_block)
    vmem_limit = min(vmem_cap_budget,
                     max(needed + 8 * 1024 * 1024, 33 * 1024 * 1024))

    cost = pl.CostEstimate(
        flops=int(2 * VN * C * HW + 2 * VN * C),
        transcendentals=0,
        bytes_accessed=int(VN * C * HW * itemsize + HW * itemsize + C * 4 + VN * 4),
    )

    scores = pl.pallas_call(
        _score_kernel,
        out_shape=jax.ShapeDtypeStruct((VN, 1), jnp.float32),
        grid=(GM, GC),
        in_specs=[
            pl.BlockSpec((B, Ct, HW), lambda i, c: (i, c, 0)),
            pl.BlockSpec((HW, 1), lambda i, c: (0, 0)),
            pl.BlockSpec((Ct, 1), lambda i, c: (c, 0)),
            pl.BlockSpec(memory_space=pltpu.MemorySpace.SMEM),
        ],
        out_specs=pl.BlockSpec((B, 1), lambda i, c: (i, 0)),
        compiler_params=pltpu.CompilerParams(
            dimension_semantics=("parallel", "arbitrary"),
            vmem_limit_bytes=int(vmem_limit),
        ),
        cost_estimate=cost,
    )(x, fw_col, cw_col, bias)

    # torch: stack over views (dim 0) -> transpose(0, 1) -> squeeze(-1)  ==> (N, V)
    view_scores = scores.reshape(V, N).T
    # The (N, V) softmax is tiny; apply it in the wrapper (no extra launch).
    return jax.nn.softmax(view_scores, axis=1)


def _reference(raw_view, conv_w, conv_b, fc_w, fc_b):
    """Pure-JAX reference matching the PyTorch forward."""
    V, N, C, H, W = raw_view.shape
    HW = H * W
    x = raw_view.reshape(V * N, C, HW)
    conv = jnp.tensordot(x, conv_w.reshape(C), axes=([1], [0])) + conv_b[0]   # (VN, HW)
    y = jnp.sum(conv * fc_w.reshape(1, HW), axis=1, keepdims=True) + fc_b[0]  # (VN, 1)
    y = jax.nn.sigmoid(jnp.log(jnp.abs(y)))
    view_scores = y.reshape(V, N).T                                           # (N, V)
    return jax.nn.softmax(view_scores, axis=1)


if __name__ == "__main__":
    # Small but module-consistent shapes: conv in_channels=192, fc in_features=52*52.
    V, N, C, H, W = 2, 2, 192, 52, 52

    key = jax.random.PRNGKey(0)
    k1, k2, k3, k4, k5 = jax.random.split(key, 5)

    raw_view = jax.random.normal(k1, (V, N, C, H, W), dtype=jnp.float32)

    # Deterministic, PyTorch-default-style init (uniform in +/- 1/sqrt(fan_in)).
    conv_bound = 1.0 / (C ** 0.5)
    fc_bound = 1.0 / ((H * W) ** 0.5)
    conv_w = jax.random.uniform(k2, (1, C, 1, 1), minval=-conv_bound,
                                maxval=conv_bound, dtype=jnp.float32)
    conv_b = jax.random.uniform(k3, (1,), minval=-conv_bound,
                                maxval=conv_bound, dtype=jnp.float32)
    fc_w = jax.random.uniform(k4, (1, H * W), minval=-fc_bound,
                              maxval=fc_bound, dtype=jnp.float32)
    fc_b = jax.random.uniform(k5, (1,), minval=-fc_bound,
                              maxval=fc_bound, dtype=jnp.float32)

    out = group_schema_forward(raw_view, conv_w, conv_b, fc_w, fc_b)
    out = jax.block_until_ready(out)

    ref = _reference(raw_view, conv_w, conv_b, fc_w, fc_b)
    assert out.shape == (N, V), out.shape
    assert jnp.allclose(out, ref, atol=1e-3, rtol=1e-3), (out, ref)

    print("KERNEL_OK")
</pallas_src>

<mosaic_0001>
module attributes {stable_mosaic.version = 11 : i64} {
  func.func @_score_kernel(%arg0: i32, %arg1: i32, %arg2: memref<4x48x2704xf32, #tpu.memory_space<vmem>>, %arg3: memref<2704x1xf32, #tpu.memory_space<vmem>>, %arg4: memref<48x1xf32, #tpu.memory_space<vmem>>, %arg5: memref<1xf32, #tpu.memory_space<smem>>, %arg6: memref<4x1xf32, #tpu.memory_space<vmem>>) attributes {dimension_semantics = [#tpu.dimension_semantics<parallel>, #tpu.dimension_semantics<arbitrary>], iteration_bounds = array<i64: 1, 4>, scalar_prefetch = 0 : i64, scratch_operands = 0 : i64, tpu.core_type = #tpu.core_type<tc>, window_params = [{transform_indices = @transform_0, window_bounds = array<i64: 4, 48, 2704>}, {pipeline_mode = #tpu.pipeline_mode<synchronous>, transform_indices = @transform_1, window_bounds = array<i64: 2704, 1>}, {transform_indices = @transform_2, window_bounds = array<i64: 48, 1>}, {transform_indices = @transform_3, window_bounds = array<i64: 1>}, {transform_indices = @transform_4, window_bounds = array<i64: 4, 1>}]} {
    %c0 = arith.constant 0 : index
    %c0_0 = arith.constant 0 : index
    %c0_1 = arith.constant 0 : index
    %0 = vector.load %arg2[%c0, %c0_0, %c0_1] : memref<4x48x2704xf32, #tpu.memory_space<vmem>>, vector<4x48x2704xf32>
    %1 = vector.shape_cast %0 : vector<4x48x2704xf32> to vector<192x2704xf32>
    %c0_2 = arith.constant 0 : index
    %c0_3 = arith.constant 0 : index
    %2 = vector.load %arg3[%c0_2, %c0_3] : memref<2704x1xf32, #tpu.memory_space<vmem>>, vector<2704x1xf32>
    %cst = arith.constant dense<0.000000e+00> : vector<192x1xf32>
    %3 = tpu.matmul %1, %2, %cst {dimension_numbers = #tpu.dot_dimension_numbers<[1], [0], [0], [1], [0, 0, 1, 1], [], []>} : vector<192x2704xf32>, vector<2704x1xf32>, vector<192x1xf32> -> vector<192x1xf32>
    %4 = vector.shape_cast %3 : vector<192x1xf32> to vector<4x48x1xf32>
    %c0_4 = arith.constant 0 : index
    %c0_5 = arith.constant 0 : index
    %5 = vector.load %arg4[%c0_4, %c0_5] : memref<48x1xf32, #tpu.memory_space<vmem>>, vector<48x1xf32>
    %6 = vector.shape_cast %5 : vector<48x1xf32> to vector<1x48x1xf32>
    %7 = vector.broadcast %6 : vector<1x48x1xf32> to vector<4x48x1xf32>
    %8 = arith.mulf %4, %7 : vector<4x48x1xf32>
    %cst_6 = arith.constant dense<0.000000e+00> : vector<4x1xf32>
    %9 = vector.multi_reduction <add>, %8, %cst_6 [1] : vector<4x48x1xf32> to vector<4x1xf32>
    %c0_i32 = arith.constant 0 : i32
    %10 = arith.cmpi eq, %arg1, %c0_i32 : i32
    %11 = arith.extui %10 : i1 to i32
    %c0_i32_7 = arith.constant 0 : i32
    %12 = arith.cmpi ne, %11, %c0_i32_7 : i32
    scf.if %12 {
      %c0_11 = arith.constant 0 : index
      %c0_12 = arith.constant 0 : index
      %19 = vector.load %arg6[%c0_11, %c0_12] : memref<4x1xf32, #tpu.memory_space<vmem>>, vector<4x1xf32>
      tpu.vector_store %arg6[%c0_11, %c0_12], %9 {strides = array<i32>} : memref<4x1xf32, #tpu.memory_space<vmem>>, vector<4x1xf32>,
    } else {
    }
    %c0_i32_8 = arith.constant 0 : i32
    %13 = arith.cmpi ne, %arg1, %c0_i32_8 : i32
    %14 = arith.extui %13 : i1 to i32
    %c0_i32_9 = arith.constant 0 : i32
    %15 = arith.cmpi ne, %14, %c0_i32_9 : i32
    scf.if %15 {
      %c0_11 = arith.constant 0 : index
      %c0_12 = arith.constant 0 : index
      %19 = vector.load %arg6[%c0_11, %c0_12] : memref<4x1xf32, #tpu.memory_space<vmem>>, vector<4x1xf32>
      %20 = arith.addf %19, %9 : vector<4x1xf32>
      %c0_13 = arith.constant 0 : index
      %c0_14 = arith.constant 0 : index
      %21 = vector.load %arg6[%c0_13, %c0_14] : memref<4x1xf32, #tpu.memory_space<vmem>>, vector<4x1xf32>
      tpu.vector_store %arg6[%c0_13, %c0_14], %20 {strides = array<i32>} : memref<4x1xf32, #tpu.memory_space<vmem>>, vector<4x1xf32>,
    } else {
    }
    %c3_i32 = arith.constant 3 : i32
    %16 = arith.cmpi eq, %arg1, %c3_i32 : i32
    %17 = arith.extui %16 : i1 to i32
    %c0_i32_10 = arith.constant 0 : i32
    %18 = arith.cmpi ne, %17, %c0_i32_10 : i32
    scf.if %18 {
      %c0_11 = arith.constant 0 : index
      %c0_12 = arith.constant 0 : index
      %19 = vector.load %arg6[%c0_11, %c0_12] : memref<4x1xf32, #tpu.memory_space<vmem>>, vector<4x1xf32>
      %c0_13 = arith.constant 0 : index
      %20 = memref.load %arg5[%c0_13] : memref<1xf32, #tpu.memory_space<smem>>
      %21 = vector.broadcast %20 : f32 to vector<4x1xf32>
      %22 = arith.addf %19, %21 : vector<4x1xf32>
      %23 = math.absf %22 : vector<4x1xf32>
      %cst_14 = arith.constant 1.000000e+00 : f32
      %24 = vector.broadcast %cst_14 : f32 to vector<4x1xf32>
      %25 = arith.addf %24, %23 : vector<4x1xf32>
      %26 = arith.divf %23, %25 : vector<4x1xf32>
      %c0_15 = arith.constant 0 : index
      %c0_16 = arith.constant 0 : index
      %27 = vector.load %arg6[%c0_15, %c0_16] : memref<4x1xf32, #tpu.memory_space<vmem>>, vector<4x1xf32>
      tpu.vector_store %arg6[%c0_15, %c0_16], %26 {strides = array<i32>} : memref<4x1xf32, #tpu.memory_space<vmem>>, vector<4x1xf32>,
    } else {
    }
    return
  }
  func.func @transform_0(%arg0: i32, %arg1: i32) -> (i32, i32, i32) {
    %c0_i32 = arith.constant 0 : i32
    %c0_i32_0 = arith.constant 0 : i32
    return %arg0, %arg1, %c0_i32 : i32, i32, i32
  }
  func.func @transform_1(%arg0: i32, %arg1: i32) -> (i32, i32) {
    %c0_i32 = arith.constant 0 : i32
    %c0_i32_0 = arith.constant 0 : i32
    %c0_i32_1 = arith.constant 0 : i32
    return %c0_i32, %c0_i32_0 : i32, i32
  }
  func.func @transform_2(%arg0: i32, %arg1: i32) -> (i32, i32) {
    %c0_i32 = arith.constant 0 : i32
    %c0_i32_0 = arith.constant 0 : i32
    return %arg1, %c0_i32 : i32, i32
  }
  func.func @transform_3(%arg0: i32, %arg1: i32) -> i32 {
    %c0_i32 = arith.constant 0 : i32
    %c0_i32_0 = arith.constant 0 : i32
    return %c0_i32 : i32
  }
  func.func @transform_4(%arg0: i32, %arg1: i32) -> (i32, i32) {
    %c0_i32 = arith.constant 0 : i32
    %c0_i32_0 = arith.constant 0 : i32
    return %arg0, %c0_i32 : i32, i32
  }
}

</mosaic_0001>

<bundles_post_ra>
// kernel: tpu_custom_call.1
= control target key start
LH: loop header
LB: loop body
LE: loop exit
PB: predicated region body
PF: predicated region fallthrough
CT: control target
= control target key end

     0   :  { %s6760_s0 = inlined_call_operand.hbm [shape: f32[4,192,2704], index: 0, kind: input, shape index: {}]   ;;  %s6761_s1 = inlined_call_operand.vmem [shape: f32[2704,1], index: 1, kind: input, shape index: {}]   ;;  %s6762_s2 = inlined_call_operand.vmem [shape: f32[192,1], index: 2, kind: input, shape index: {}]   ;;  %s6763_s3 = inlined_call_operand.<no memory space> [shape: f32[1], index: 3, kind: input, shape index: {}]   ;;  %s6764_s4 = inlined_call_operand.vmem [shape: f32[4,1], index: 4, kind: output, shape index: {}]  }
   0x1   :  { %9 = sst [smem:[#allocation2]] %s6763_s3 }
   0x2   :  { %10 = vsyncpa [#allocation4], 0 }
   0x3   :  { %12 = vsyncpa [#allocation4 + $0x1], 0  ;;  %s4658_s17 = smov 0   ;;  %s4660_s18 = smov 0  }
   0x4   :  { %s4662_s19 = smov 0   ;;  %s4664_s20 = smov 0  }
   0x5   :  { %s4666_s21 = smov 0   ;;  %s4668_s22 = smov 0  }
   0x6 LB: > { %s3492_s3 = sadd.s32 4294967295, %s4621_s22   ;;  %s27_s23 = sadd.s32 1, %s4617_s21  ;;  %s4621_s22 = sphi %s4668_s22, %s18_s22   ;;  %s4617_s21 = sphi %s4666_s21, %s6771_s21   ;;  %s4613_s20 = sphi %s4664_s20, %s6770_s20   ;;  %s4609_s19 = sphi %s4662_s19, %s6769_s19   ;;  %s4605_s18 = sphi %s4660_s18, %s6768_s18   ;;  %s4601_s17 = sphi %s4658_s17, %s6767_s17  }
   0x7   : > { %p28_p0 = scmp.ge.s32.totalorder %s27_s23, 4  ;;  %s39_s24 = sadd.s32 1, %s4609_s19 }
   0x8   : > { %p46_p1 = scmp.ne.s32.totalorder %s4609_s19, %s4605_s18  ;;  %p47_p2 = scmp.eq.s32.totalorder %s4621_s22, 0 }
   0x9   : > { %s6773_s23 = smov (%p28_p0, %s27_s23), 0  ;;  %p52_p4 = scmp.ne.s32.totalorder %s4605_s18, %s4601_s17 }
   0xa   : > { %p4694_p3 = por %p47_p2, %p46_p1  ;;  %s35_s26 = ssub.s32 %s4617_s21, %s6773_s23 }
   0xb   : > { %p53_p5 = scmp.eq.s32.totalorder %s3492_s3, 0  ;;  %p37_p6 = scmp.eq.s32.totalorder %s35_s26, 0 }
   0xc   : > { %p3494_p8 = scmp.ge.s32.totalorder %s4621_s22, 4 }
   0xd   : > { %p4701_p7 = por %p53_p5, %p52_p4 }
   0xe   : > { %s4706_s28 = scalar_select %p37_p6, %s4609_s19, %s39_s24  }
   0xf   : > { %172 = sbr.rel (%p3494_p8) target bundleno = 36 (0x24), region = 24 }
  0x16   : > { %s176_s29 = sand.u32 1, %s4609_s19   ;;  %s4623_s5 = smov 67584  }
  0x17   : > { %s4501_s30 = smul.u32 4224, %s176_s29  ;;  %4505 = sst [smem:[#allocation6]] (%p4694_p3), %s4623_s5 }
  0x18   : > { %s4513_s6 = smul.u32 16896, %s4617_s21  ;;  %s4624_s11 = smov 16896  }
  0x19   : > { %s4504_s7 = scalar_select %p4694_p3, [#allocation0], [#allocation7] }
  0x1a   : > { %s180_s8 = scalar_lea.vmem [#allocation3], %s4501_s30  ;;  %4506 = sst [smem:[#allocation6 + $0x1]] (%p4694_p3), %s4624_s11 }
  0x1b   : > { %s203_s9 = sshll.u32 %s180_s8, 4  ;;  %s195_s10 = sld [smem:[%s4504_s7]]   ;;  %s204_s9 = int_to_ptr.vmem [resolvable:$true] %s203_s9 }
  0x1c   : > { %s4625_s12 = smov 6   ;;  %s190_s15 = scalar_lea.hbm %s6760_s0, %s4513_s6 }
  0x1d   : > { %4507 = sst [smem:[#allocation6 + $0x2]] (%p4694_p3), %s4625_s12  ;;  %s4626_s16 = smov 2816  }
  0x1e   : > { %4508 = sst [smem:[#allocation6 + $0x3]] (%p4694_p3), %s4626_s16  ;;  %s4627_s17 = smov 176  }
  0x1f   : > { %4509 = sst [smem:[#allocation6 + $0x4]] (%p4694_p3), %s4626_s16  ;;  %s177_s26 = scalar_lea.sflag [#allocation4], %s176_s29 }
  0x20   : > { %4510 = sst [smem:[#allocation6 + $0x5]] (%p4694_p3), %s4627_s17  ;;  %s4628_s30 = smov [#allocation5]  }
  0x21   : > { %s3496_s3 = sshll.u32 %s195_s10, 26 }
  0x22   : > { %s3497_s24 = sadd.s32 134217728, %s3496_s3 }
  0x23   : > { %4511 = dma.general (%p4694_p3), %s190_s15, 67584, %s204_s9, %s177_s26, %s4628_s30, [#allocation6], %s3497_s24, 0  }
  0x24 PF: > { %p3498_p9 = scmp.ge.s32.totalorder %s4621_s22, 1  ;;  %p233_p10 = scmp.lt.s32.totalorder %s4621_s22, 5 }
  0x26   : > { %p234_p11 = pnand %p3498_p9, %p233_p10 }
  0x27   : > { %s239_s5 = sand.u32 (!%p234_p11), 1, %s4605_s18  }
  0x28   : > { %237 = sbr.rel (%p234_p11) target bundleno = 911 (0x38f), region = 36  ;;  %s240_s7 = scalar_lea.sflag (!%p234_p11), [#allocation4], %s239_s5 }
  0x29   : > { %s4503_s6 = smul.u32 (!%p234_p11), 4224, %s239_s5 }
  0x2b   : > { %s4733_s8 = scalar_lea.vmem (!%p234_p11), [#allocation3], %s4503_s6 }
  0x2f   : > { %4596 = dma.done.wait (%p4701_p7), %s240_s7, 67584  }
  0x30   : > { %4598 = vsyncadd (%p4701_p7), %s240_s7, 4294899712  ;;  %v4629_v0 = vmov 0.0|0.0   ;;  %v812_v1 = vld [vmem:[%s6761_s1] sm:$0xff]  ;;  %v813_v2 = vld [vmem:[%s6761_s1 + $0x8] sm:$0xff]  ;;  %vm1150_vm0 = vcmask 130048   ;;  %vm3288_vm1 = vcmask 7168  }
  0x31   : > { %3530 = vmatprep.subr.bf16.mxu1 %v4629_v0  ;;  %3770 = vmatprep.subr.bf16.mxu0 %v4629_v0  ;;  %v972_v3 = vld [vmem:[%s6761_s1 + $0x500] sm:$0xff]  ;;  %v3531_v4 = vpack.c.bf16 %v813_v2, %v812_v1  ;;  %v973_v5 = vld [vmem:[%s6761_s1 + $0x508] sm:$0xff]  ;;  %v814_v6 = vld [vmem:[%s6761_s1 + $0x10] sm:$0xff]  ;;  %p3524_p13 = scmp.ne.s32.totalorder %s4613_s20, 0 }
  0x32   : > { %v815_v7 = vld [vmem:[%s6761_s1 + $0x18] sm:$0xff]  ;;  %v3771_v8 = vpack.c.bf16 %v973_v5, %v972_v3  ;;  %v974_v9 = vld [vmem:[%s6761_s1 + $0x510] sm:$0xff]  ;;  %v816_v13 = vld [vmem:[%s6761_s1 + $0x20] sm:$0xff]  ;;  %vm3365_vm2 = vcmask (!%p3524_p13), 1041409   ;;  %vm3367_vm3 = vcmask (!%p3524_p13), 1042434   ;;  %vm3369_vm4 = vcmask (!%p3524_p13), 1043459  }
  0x33   : > { %v975_v10 = vld [vmem:[%s6761_s1 + $0x518] sm:$0xff]  ;;  %3532 = vmatpush1.bf16.msra.mxu1 %v3531_v4  ;;  %v3534_v11 = vpack.c.bf16 %v815_v7, %v814_v6  ;;  %v817_v14 = vld [vmem:[%s6761_s1 + $0x28] sm:$0xff]  ;;  %v976_v15 = vld [vmem:[%s6761_s1 + $0x520] sm:$0xff]  ;;  %vm3372_vm5 = vcmask (!%p3524_p13), 3072  }
  0x34   : > { %3772 = vmatpush1.bf16.msra.mxu0 %v3771_v8  ;;  %3533 = vmatprep.subr.bf16.mxu1 %v4629_v0  ;;  %v3774_v12 = vpack.c.bf16 %v975_v10, %v974_v9  ;;  %v977_v16 = vld [vmem:[%s6761_s1 + $0x528] sm:$0xff]  ;;  %v3537_v17 = vpack.c.bf16 %v817_v14, %v816_v13  ;;  %v818_v19 = vld [vmem:[%s6761_s1 + $0x30] sm:$0xff]  ;;  %v819_v20 = vld [vmem:[%s6761_s1 + $0x38] sm:$0xff] }
  0x35   : > { %3773 = vmatprep.subr.bf16.mxu0 %v4629_v0  ;;  %v3777_v18 = vpack.c.bf16 %v977_v16, %v976_v15  ;;  %v978_v21 = vld [vmem:[%s6761_s1 + $0x530] sm:$0xff]  ;;  %v979_v22 = vld [vmem:[%s6761_s1 + $0x538] sm:$0xff]  ;;  %v3540_v23 = vpack.c.bf16 %v819_v20, %v818_v19  ;;  %v820_v25 = vld [vmem:[%s6761_s1 + $0x40] sm:$0xff] }
  0x36   : > { %v3780_v24 = vpack.c.bf16 %v979_v22, %v978_v21  ;;  %v821_v26 = vld [vmem:[%s6761_s1 + $0x48] sm:$0xff]  ;;  %v980_v27 = vld [vmem:[%s6761_s1 + $0x540] sm:$0xff]  ;;  %v822_v31 = vld [vmem:[%s6761_s1 + $0x50] sm:$0xff] }
  0x37   : > { %3535 = vmatpush1.bf16.msra.mxu1 %v3534_v11  ;;  %v981_v28 = vld [vmem:[%s6761_s1 + $0x548] sm:$0xff]  ;;  %v3543_v29 = vpack.c.bf16 %v821_v26, %v820_v25  ;;  %v823_v32 = vld [vmem:[%s6761_s1 + $0x58] sm:$0xff]  ;;  %v982_v33 = vld [vmem:[%s6761_s1 + $0x550] sm:$0xff] }
  0x38   : > { %3775 = vmatpush1.bf16.msra.mxu0 %v3774_v12  ;;  %3536 = vmatprep.subr.bf16.mxu1 %v4629_v0  ;;  %v3783_v30 = vpack.c.bf16 %v981_v28, %v980_v27  ;;  %v983_v34 = vld [vmem:[%s6761_s1 + $0x558] sm:$0xff]  ;;  %v3546_v35 = vpack.c.bf16 %v823_v32, %v822_v31  ;;  %v824_v37 = vld [vmem:[%s6761_s1 + $0x60] sm:$0xff]  ;;  %v825_v38 = vld [vmem:[%s6761_s1 + $0x68] sm:$0xff] }
  0x39   : > { %3776 = vmatprep.subr.bf16.mxu0 %v4629_v0  ;;  %v3786_v36 = vpack.c.bf16 %v983_v34, %v982_v33  ;;  %v984_v39 = vld [vmem:[%s6761_s1 + $0x560] sm:$0xff]  ;;  %v985_v40 = vld [vmem:[%s6761_s1 + $0x568] sm:$0xff]  ;;  %v295_v42 = vld [vmem:[%s4733_s8 + $0x58] sm:$0xff]  ;;  %v3549_v43 = vpack.c.bf16 %v825_v38, %v824_v37 }
  0x3a   : > { %v285_v41 = vld [vmem:[%s4733_s8 + $0x8] sm:$0xff]  ;;  %2212 = vmatprep.mubr.f32.mxu0 %v295_v42  ;;  %v3789_v44 = vpack.c.bf16 %v985_v40, %v984_v39  ;;  %v826_v45 = vld [vmem:[%s6761_s1 + $0x70] sm:$0xff]  ;;  %v827_v46 = vld [vmem:[%s6761_s1 + $0x78] sm:$0xff] }
  0x3b   : > { %3538 = vmatpush1.bf16.msra.mxu1 %v3537_v17  ;;  %1287 = vmatprep.mubr.f32.mxu1 %v285_v41  ;;  %v986_v47 = vld [vmem:[%s6761_s1 + $0x570] sm:$0xff]  ;;  %v987_v48 = vld [vmem:[%s6761_s1 + $0x578] sm:$0xff]  ;;  %v3552_v49 = vpack.c.bf16 %v827_v46, %v826_v45  ;;  %v828_v51 = vld [vmem:[%s6761_s1 + $0x80] sm:$0xff] }
  0x3c   : > { %3778 = vmatpush1.bf16.msra.mxu0 %v3777_v18  ;;  %3539 = vmatprep.subr.bf16.mxu1 %v4629_v0  ;;  %v3792_v50 = vpack.c.bf16 %v987_v48, %v986_v47  ;;  %v829_v52 = vld [vmem:[%s6761_s1 + $0x88] sm:$0xff]  ;;  %v988_v53 = vld [vmem:[%s6761_s1 + $0x580] sm:$0xff]  ;;  %v830_v57 = vld [vmem:[%s6761_s1 + $0x90] sm:$0xff] }
  0x3d   : > { %3779 = vmatprep.subr.bf16.mxu0 %v4629_v0  ;;  %v989_v54 = vld [vmem:[%s6761_s1 + $0x588] sm:$0xff]  ;;  %v3555_v55 = vpack.c.bf16 %v829_v52, %v828_v51  ;;  %v831_v58 = vld [vmem:[%s6761_s1 + $0x98] sm:$0xff]  ;;  %v990_v59 = vld [vmem:[%s6761_s1 + $0x590] sm:$0xff] }
  0x3e   : > { %v3795_v56 = vpack.c.bf16 %v989_v54, %v988_v53  ;;  %v991_v60 = vld [vmem:[%s6761_s1 + $0x598] sm:$0xff]  ;;  %v3558_v61 = vpack.c.bf16 %v831_v58, %v830_v57  ;;  %v832_v63 = vld [vmem:[%s6761_s1 + $0xa0] sm:$0xff]  ;;  %v833_v1 = vld [vmem:[%s6761_s1 + $0xa8] sm:$0xff] }
  0x3f   : > { %3541 = vmatpush1.bf16.msra.mxu1 %v3540_v23  ;;  %v3798_v62 = vpack.c.bf16 %v991_v60, %v990_v59  ;;  %v992_v2 = vld [vmem:[%s6761_s1 + $0x5a0] sm:$0xff]  ;;  %v993_v3 = vld [vmem:[%s6761_s1 + $0x5a8] sm:$0xff]  ;;  %v3561_v4 = vpack.c.bf16 %v833_v1, %v832_v63  ;;  %v834_v6 = vld [vmem:[%s6761_s1 + $0xb0] sm:$0xff] }
  0x40   : > { %3781 = vmatpush1.bf16.msra.mxu0 %v3780_v24  ;;  %3542 = vmatprep.subr.bf16.mxu1 %v4629_v0  ;;  %v3801_v5 = vpack.c.bf16 %v993_v3, %v992_v2  ;;  %v835_v7 = vld [vmem:[%s6761_s1 + $0xb8] sm:$0xff]  ;;  %v994_v8 = vld [vmem:[%s6761_s1 + $0x5b0] sm:$0xff]  ;;  %v836_v12 = vld [vmem:[%s6761_s1 + $0xc0] sm:$0xff] }
  0x41   : > { %3782 = vmatprep.subr.bf16.mxu0 %v4629_v0  ;;  %v995_v9 = vld [vmem:[%s6761_s1 + $0x5b8] sm:$0xff]  ;;  %v3564_v10 = vpack.c.bf16 %v835_v7, %v834_v6  ;;  %v837_v13 = vld [vmem:[%s6761_s1 + $0xc8] sm:$0xff]  ;;  %v996_v14 = vld [vmem:[%s6761_s1 + $0x5c0] sm:$0xff] }
  0x42   : > { %v3804_v11 = vpack.c.bf16 %v995_v9, %v994_v8  ;;  %v997_v15 = vld [vmem:[%s6761_s1 + $0x5c8] sm:$0xff]  ;;  %v3567_v16 = vpack.c.bf16 %v837_v13, %v836_v12  ;;  %v838_v18 = vld [vmem:[%s6761_s1 + $0xd0] sm:$0xff]  ;;  %v839_v19 = vld [vmem:[%s6761_s1 + $0xd8] sm:$0xff] }
  0x43   : > { %3544 = vmatpush1.bf16.msra.mxu1 %v3543_v29  ;;  %v3807_v17 = vpack.c.bf16 %v997_v15, %v996_v14  ;;  %v998_v20 = vld [vmem:[%s6761_s1 + $0x5d0] sm:$0xff]  ;;  %v999_v21 = vld [vmem:[%s6761_s1 + $0x5d8] sm:$0xff]  ;;  %v3570_v22 = vpack.c.bf16 %v839_v19, %v838_v18  ;;  %v840_v24 = vld [vmem:[%s6761_s1 + $0xe0] sm:$0xff] }
  0x44   : > { %3784 = vmatpush1.bf16.msra.mxu0 %v3783_v30  ;;  %3545 = vmatprep.subr.bf16.mxu1 %v4629_v0  ;;  %v3810_v23 = vpack.c.bf16 %v999_v21, %v998_v20  ;;  %v841_v25 = vld [vmem:[%s6761_s1 + $0xe8] sm:$0xff]  ;;  %v1000_v26 = vld [vmem:[%s6761_s1 + $0x5e0] sm:$0xff]  ;;  %v842_v30 = vld [vmem:[%s6761_s1 + $0xf0] sm:$0xff] }
  0x45   : > { %3785 = vmatprep.subr.bf16.mxu0 %v4629_v0  ;;  %v1001_v27 = vld [vmem:[%s6761_s1 + $0x5e8] sm:$0xff]  ;;  %v3573_v28 = vpack.c.bf16 %v841_v25, %v840_v24  ;;  %v843_v31 = vld [vmem:[%s6761_s1 + $0xf8] sm:$0xff]  ;;  %v1002_v32 = vld [vmem:[%s6761_s1 + $0x5f0] sm:$0xff] }
  0x46   : > { %v3813_v29 = vpack.c.bf16 %v1001_v27, %v1000_v26  ;;  %v1003_v33 = vld [vmem:[%s6761_s1 + $0x5f8] sm:$0xff]  ;;  %v3576_v34 = vpack.c.bf16 %v843_v31, %v842_v30  ;;  %v845_v37 = vld [vmem:[%s6761_s1 + $0x108] sm:$0xff]  ;;  %v1004_v38 = vld [vmem:[%s6761_s1 + $0x600] sm:$0xff] }
  0x47   : > { %3547 = vmatpush1.bf16.msra.mxu1 %v3546_v35  ;;  %v3816_v35 = vpack.c.bf16 %v1003_v33, %v1002_v32  ;;  %v1005_v39 = vld [vmem:[%s6761_s1 + $0x608] sm:$0xff]  ;;  %v284_v40 = vld [vmem:[%s4733_s8] sm:$0xff]  ;;  %v294_v42 = vld [vmem:[%s4733_s8 + $0x50] sm:$0xff] }
  0x48   : > { %3787 = vmatpush1.bf16.msra.mxu0 %v3786_v36  ;;  %3548 = vmatprep.subr.bf16.mxu1 %v4629_v0  ;;  %v844_v36 = vld [vmem:[%s6761_s1 + $0x100] sm:$0xff]  ;;  %v3819_v45 = vpack.c.bf16 %v1005_v39, %v1004_v38  ;;  %v846_v46 = vld [vmem:[%s6761_s1 + $0x110] sm:$0xff]  ;;  %v847_v47 = vld [vmem:[%s6761_s1 + $0x118] sm:$0xff] }
  0x49   : > { %3788 = vmatprep.subr.bf16.mxu0 %v4629_v0  ;;  %v3579_v41 = vpack.c.bf16 %v845_v37, %v844_v36  ;;  %v1006_v48 = vld [vmem:[%s6761_s1 + $0x610] sm:$0xff]  ;;  %v316_v51 = vld [vmem:[%s4733_s8 + $0x100] sm:$0xff]  ;;  %v329_v52 = vld [vmem:[%s4733_s8 + $0x168] sm:$0xff]  ;;  %v3582_v53 = vpack.c.bf16 %v847_v47, %v846_v46 }
  0x4a   : > { %v339_v54 = vld [vmem:[%s4733_s8 + $0x1b8] sm:$0xff]  ;;  %v849_v57 = vld [vmem:[%s6761_s1 + $0x128] sm:$0xff]  ;;  %v1008_v58 = vld [vmem:[%s6761_s1 + $0x620] sm:$0xff] }
  0x4b   : > { %3550 = vmatpush1.bf16.msra.mxu1 %v3549_v43  ;;  %v307_v43 = vld [vmem:[%s4733_s8 + $0xb8] sm:$0xff]  ;;  %v1009_v59 = vld [vmem:[%s6761_s1 + $0x628] sm:$0xff]  ;;  %v328_v60 = vld [vmem:[%s4733_s8 + $0x160] sm:$0xff] }
  0x4c   : > { %3790 = vmatpush1.bf16.msra.mxu0 %v3789_v44  ;;  %3551 = vmatprep.subr.bf16.mxu1 %v4629_v0  ;;  %v317_v44 = vld [vmem:[%s4733_s8 + $0x108] sm:$0xff]  ;;  %v3825_v2 = vpack.c.bf16 %v1009_v59, %v1008_v58  ;;  %v850_v3 = vld [vmem:[%s6761_s1 + $0x130] sm:$0xff]  ;;  %v1011_v6 = vld [vmem:[%s6761_s1 + $0x638] sm:$0xff] }
  0x4d   : > { %3791 = vmatprep.subr.bf16.mxu0 %v4629_v0  ;;  %v361_v1 = vld [vmem:[%s4733_s8 + $0x268] sm:$0xff]  ;;  %v350_v7 = vld [vmem:[%s4733_s8 + $0x210] sm:$0xff]  ;;  %v360_v8 = vld [vmem:[%s4733_s8 + $0x260] sm:$0xff] }
  0x4e   : > { %v373_v9 = vld [vmem:[%s4733_s8 + $0x2c8] sm:$0xff]  ;;  %v852_v13 = vld [vmem:[%s6761_s1 + $0x140] sm:$0xff]  ;;  %v382_v18 = vld [vmem:[%s4733_s8 + $0x310] sm:$0xff] }
  0x4f   : > { %3553 = vmatpush1.bf16.msra.mxu1 %v3552_v49  ;;  %v1007_v49 = vld [vmem:[%s6761_s1 + $0x618] sm:$0xff]  ;;  %v853_v14 = vld [vmem:[%s6761_s1 + $0x148] sm:$0xff]  ;;  %v1012_v15 = vld [vmem:[%s6761_s1 + $0x640] sm:$0xff] }
  0x50   : > { %3793 = vmatpush1.bf16.msra.mxu0 %v3792_v50  ;;  %3554 = vmatprep.subr.bf16.mxu1 %v4629_v0  ;;  %v306_v50 = vld [vmem:[%s4733_s8 + $0xb0] sm:$0xff]  ;;  %v395_v19 = vld [vmem:[%s4733_s8 + $0x378] sm:$0xff]  ;;  %v3591_v20 = vpack.c.bf16 %v853_v14, %v852_v13  ;;  %v405_v21 = vld [vmem:[%s4733_s8 + $0x3c8] sm:$0xff] }
  0x51   : > { %3794 = vmatprep.subr.bf16.mxu0 %v4629_v0  ;;  %v855_v24 = vld [vmem:[%s6761_s1 + $0x158] sm:$0xff]  ;;  %v1014_v25 = vld [vmem:[%s6761_s1 + $0x650] sm:$0xff]  ;;  %v856_v33 = vld [vmem:[%s6761_s1 + $0x160] sm:$0xff] }
  0x52   : > { %v1015_v26 = vld [vmem:[%s6761_s1 + $0x658] sm:$0xff]  ;;  %v394_v27 = vld [vmem:[%s4733_s8 + $0x370] sm:$0xff]  ;;  %v1017_v36 = vld [vmem:[%s6761_s1 + $0x668] sm:$0xff] }
  0x53   : > { %3556 = vmatpush1.bf16.msra.mxu1 %v3555_v55  ;;  %v3822_v55 = vpack.c.bf16 %v1007_v49, %v1006_v48  ;;  %v427_v31 = vld [vmem:[%s4733_s8 + $0x478] sm:$0xff]  ;;  %v3834_v32 = vpack.c.bf16 %v1015_v26, %v1014_v25  ;;  %v416_v37 = vld [vmem:[%s4733_s8 + $0x420] sm:$0xff]  ;;  %v426_v38 = vld [vmem:[%s4733_s8 + $0x470] sm:$0xff] }
  0x54   : > { %3796 = vmatpush1.bf16.msra.mxu0 %v3795_v56  ;;  %3557 = vmatprep.subr.bf16.mxu1 %v4629_v0  ;;  %v848_v56 = vld [vmem:[%s6761_s1 + $0x120] sm:$0xff]  ;;  %v439_v39 = vld [vmem:[%s4733_s8 + $0x4d8] sm:$0xff]  ;;  %v438_v47 = vld [vmem:[%s4733_s8 + $0x4d0] sm:$0xff] }
  0x55   : > { %3797 = vmatprep.subr.bf16.mxu0 %v4629_v0  ;;  %v3585_v63 = vpack.c.bf16 %v849_v57, %v848_v56  ;;  %v1019_v46 = vld [vmem:[%s6761_s1 + $0x678] sm:$0xff]  ;;  %v448_v48 = vld [vmem:[%s4733_s8 + $0x520] sm:$0xff]  ;;  %v461_v49 = vld [vmem:[%s4733_s8 + $0x588] sm:$0xff] }
  0x56   : > { %v1021_v56 = vld [vmem:[%s6761_s1 + $0x688] sm:$0xff]  ;;  %v460_v57 = vld [vmem:[%s4733_s8 + $0x580] sm:$0xff]  ;;  %v470_v58 = vld [vmem:[%s4733_s8 + $0x5d0] sm:$0xff] }
  0x57   : > { %3559 = vmatpush1.bf16.msra.mxu1 %v3558_v61  ;;  %v338_v61 = vld [vmem:[%s4733_s8 + $0x1b0] sm:$0xff]  ;;  %v483_v59 = vld [vmem:[%s4733_s8 + $0x638] sm:$0xff]  ;;  %v1025_v13 = vld [vmem:[%s6761_s1 + $0x6a8] sm:$0xff] }
  0x58   : > { %3799 = vmatpush1.bf16.msra.mxu0 %v3798_v62  ;;  %3560 = vmatprep.subr.bf16.mxu1 %v4629_v0  ;;  %v351_v62 = vld [vmem:[%s4733_s8 + $0x218] sm:$0xff]  ;;  %v504_v14 = vld [vmem:[%s4733_s8 + $0x6e0] sm:$0xff]  ;;  %v549_v26 = vld [vmem:[%s4733_s8 + $0x848] sm:$0xff] }
  0x59   : > { %3800 = vmatprep.subr.bf16.mxu0 %v4629_v0  ;;  %v536_v25 = vld [vmem:[%s4733_s8 + $0x7e0] sm:$0xff] }
  0x5b   : > { %3562 = vmatpush1.bf16.msra.mxu1 %v3561_v4  ;;  %v851_v4 = vld [vmem:[%s6761_s1 + $0x138] sm:$0xff] }
  0x5c   : > { %3802 = vmatpush1.bf16.msra.mxu0 %v3801_v5  ;;  %3563 = vmatprep.subr.bf16.mxu1 %v4629_v0  ;;  %v1010_v5 = vld [vmem:[%s6761_s1 + $0x630] sm:$0xff] }
  0x5d   : > { %3803 = vmatprep.subr.bf16.mxu0 %v4629_v0  ;;  %v3828_v12 = vpack.c.bf16 %v1011_v6, %v1010_v5  ;;  %v492_v5 = vld [vmem:[%s4733_s8 + $0x680] sm:$0xff]  ;;  %v505_v6 = vld [vmem:[%s4733_s8 + $0x6e8] sm:$0xff] }
  0x5f   : > { %3565 = vmatpush1.bf16.msra.mxu1 %v3564_v10  ;;  %v3588_v10 = vpack.c.bf16 %v851_v4, %v850_v3  ;;  %v1023_v3 = vld [vmem:[%s6761_s1 + $0x698] sm:$0xff]  ;;  %v482_v4 = vld [vmem:[%s4733_s8 + $0x630] sm:$0xff] }
  0x60   : > { %3805 = vmatpush1.bf16.msra.mxu0 %v3804_v11  ;;  %3566 = vmatprep.subr.bf16.mxu1 %v4629_v0  ;;  %v383_v11 = vld [vmem:[%s4733_s8 + $0x318] sm:$0xff] }
  0x61   : > { %3806 = vmatprep.subr.bf16.mxu0 %v4629_v0 }
  0x63   : > { %3568 = vmatpush1.bf16.msra.mxu1 %v3567_v16  ;;  %v1013_v16 = vld [vmem:[%s6761_s1 + $0x648] sm:$0xff] }
  0x64   : > { %3808 = vmatpush1.bf16.msra.mxu0 %v3807_v17  ;;  %3569 = vmatprep.subr.bf16.mxu1 %v4629_v0  ;;  %v372_v17 = vld [vmem:[%s4733_s8 + $0x2c0] sm:$0xff] }
  0x65   : > { %3809 = vmatprep.subr.bf16.mxu0 %v4629_v0 }
  0x67   : > { %3571 = vmatpush1.bf16.msra.mxu1 %v3570_v22  ;;  %v3831_v22 = vpack.c.bf16 %v1013_v16, %v1012_v15  ;;  %v514_v15 = vld [vmem:[%s4733_s8 + $0x730] sm:$0xff]  ;;  %v527_v16 = vld [vmem:[%s4733_s8 + $0x798] sm:$0xff] }
  0x68   : > { %3811 = vmatpush1.bf16.msra.mxu0 %v3810_v23  ;;  %3572 = vmatprep.subr.bf16.mxu1 %v4629_v0  ;;  %v854_v23 = vld [vmem:[%s6761_s1 + $0x150] sm:$0xff] }
  0x69   : > { %3812 = vmatprep.subr.bf16.mxu0 %v4629_v0  ;;  %v3594_v30 = vpack.c.bf16 %v855_v24, %v854_v23  ;;  %v1027_v23 = vld [vmem:[%s6761_s1 + $0x6b8] sm:$0xff]  ;;  %v526_v24 = vld [vmem:[%s4733_s8 + $0x790] sm:$0xff] }
  0x6b   : > { %3574 = vmatpush1.bf16.msra.mxu1 %v3573_v28  ;;  %v404_v28 = vld [vmem:[%s4733_s8 + $0x3c0] sm:$0xff] }
  0x6c   : > { %3814 = vmatpush1.bf16.msra.mxu0 %v3813_v29  ;;  %3575 = vmatprep.subr.bf16.mxu1 %v4629_v0  ;;  %v417_v29 = vld [vmem:[%s4733_s8 + $0x428] sm:$0xff] }
  0x6d   : > { %3815 = vmatprep.subr.bf16.mxu0 %v4629_v0 }
  0x6f   : > { %3577 = vmatpush1.bf16.msra.mxu1 %v3576_v34  ;;  %v857_v34 = vld [vmem:[%s6761_s1 + $0x168] sm:$0xff] }
  0x70   : > { %3817 = vmatpush1.bf16.msra.mxu0 %v3816_v35  ;;  %3578 = vmatprep.subr.bf16.mxu1 %v4629_v0  ;;  %v1016_v35 = vld [vmem:[%s6761_s1 + $0x660] sm:$0xff] }
  0x71   : > { %3818 = vmatprep.subr.bf16.mxu0 %v4629_v0 }
  0x72   : > { %1288 = vmatmul.mubr.f32.vlgmr.msra.gmra.mrb[0].mxu1 %v284_v40  ;;  %v3597_v40 = vpack.c.bf16 %v857_v34, %v856_v33  ;;  %v1029_v33 = vld [vmem:[%s6761_s1 + $0x6c8] sm:$0xff]  ;;  %v548_v34 = vld [vmem:[%s4733_s8 + $0x840] sm:$0xff] }
  0x73   : > { %2213 = vmatmul.mubr.f32.vlgmr.msra.gmra.mrb[0].mxu0 %v294_v42  ;;  %3580 = vmatpush1.bf16.msra.mxu1 %v3579_v41  ;;  %v449_v41 = vld [vmem:[%s4733_s8 + $0x528] sm:$0xff]  ;;  %v3837_v42 = vpack.c.bf16 %v1017_v36, %v1016_v35  ;;  %v558_v35 = vld [vmem:[%s4733_s8 + $0x890] sm:$0xff]  ;;  %v571_v36 = vld [vmem:[%s4733_s8 + $0x8f8] sm:$0xff] }
  0x74   : > { %1292 = vmatprep.mubr.f32.mxu1 %v307_v43  ;;  %2217 = vmatprep.mubr.f32.mxu0 %v317_v44  ;;  %v858_v43 = vld [vmem:[%s6761_s1 + $0x170] sm:$0xff]  ;;  %v859_v44 = vld [vmem:[%s6761_s1 + $0x178] sm:$0xff] }
  0x75   : > { %3820 = vmatpush1.bf16.msra.mxu0 %v3819_v45  ;;  %3581 = vmatprep.subr.bf16.mxu1 %v4629_v0  ;;  %v1018_v45 = vld [vmem:[%s6761_s1 + $0x670] sm:$0xff] }
  0x76   : > { %1293 = vmatmul.mubr.f32.gmra.mrb[2].mxu1 %v306_v50  ;;  %3821 = vmatprep.subr.bf16.mxu0 %v4629_v0  ;;  %v3600_v50 = vpack.c.bf16 %v859_v44, %v858_v43  ;;  %v1031_v43 = vld [vmem:[%s6761_s1 + $0x6d8] sm:$0xff]  ;;  %v570_v44 = vld [vmem:[%s4733_s8 + $0x8f0] sm:$0xff] }
  0x77   : > { %2218 = vmatmul.mubr.f32.gmra.mrb[2].mxu0 %v316_v51  ;;  %1297 = vmatprep.mubr.f32.mxu1 %v329_v52  ;;  %v471_v51 = vld [vmem:[%s4733_s8 + $0x5d8] sm:$0xff]  ;;  %v3840_v52 = vpack.c.bf16 %v1019_v46, %v1018_v45  ;;  %v580_v45 = vld [vmem:[%s4733_s8 + $0x940] sm:$0xff]  ;;  %v593_v46 = vld [vmem:[%s4733_s8 + $0x9a8] sm:$0xff] }
  0x78   : > { %3583 = vmatpush1.bf16.msra.mxu1 %v3582_v53  ;;  %2222 = vmatprep.mubr.f32.mxu0 %v339_v54  ;;  %v860_v53 = vld [vmem:[%s6761_s1 + $0x180] sm:$0xff]  ;;  %v861_v54 = vld [vmem:[%s6761_s1 + $0x188] sm:$0xff] }
  0x79   : > { %3823 = vmatpush1.bf16.msra.mxu0 %v3822_v55  ;;  %3584 = vmatprep.subr.bf16.mxu1 %v4629_v0  ;;  %v1020_v55 = vld [vmem:[%s6761_s1 + $0x680] sm:$0xff] }
  0x7a   : > { %1298 = vmatmul.mubr.f32.gmra.mrb[4].mxu1 %v328_v60  ;;  %3824 = vmatprep.subr.bf16.mxu0 %v4629_v0  ;;  %v3603_v60 = vpack.c.bf16 %v861_v54, %v860_v53  ;;  %v1033_v53 = vld [vmem:[%s6761_s1 + $0x6e8] sm:$0xff]  ;;  %v592_v54 = vld [vmem:[%s4733_s8 + $0x9a0] sm:$0xff] }
  0x7b   : > { %2223 = vmatmul.mubr.f32.gmra.mrb[4].mxu0 %v338_v61  ;;  %1302 = vmatprep.mubr.f32.mxu1 %v351_v62  ;;  %v493_v61 = vld [vmem:[%s4733_s8 + $0x688] sm:$0xff]  ;;  %v3843_v62 = vpack.c.bf16 %v1021_v56, %v1020_v55  ;;  %v602_v55 = vld [vmem:[%s4733_s8 + $0x9f0] sm:$0xff]  ;;  %v615_v56 = vld [vmem:[%s4733_s8 + $0xa58] sm:$0xff] }
  0x7c   : > { %2227 = vmatprep.mubr.f32.mxu0 %v361_v1  ;;  %3586 = vmatpush1.bf16.msra.mxu1 %v3585_v63  ;;  %v862_v63 = vld [vmem:[%s6761_s1 + $0x190] sm:$0xff]  ;;  %v863_v1 = vld [vmem:[%s6761_s1 + $0x198] sm:$0xff] }
  0x7d   : > { %3826 = vmatpush1.bf16.msra.mxu0 %v3825_v2  ;;  %3587 = vmatprep.subr.bf16.mxu1 %v4629_v0  ;;  %v1022_v2 = vld [vmem:[%s6761_s1 + $0x690] sm:$0xff] }
  0x7e   : > { %1303 = vmatmul.mubr.f32.gmra.mrb[6].mxu1 %v350_v7  ;;  %3827 = vmatprep.subr.bf16.mxu0 %v4629_v0  ;;  %v3606_v7 = vpack.c.bf16 %v863_v1, %v862_v63  ;;  %v1035_v63 = vld [vmem:[%s6761_s1 + $0x6f8] sm:$0xff]  ;;  %v614_v1 = vld [vmem:[%s4733_s8 + $0xa50] sm:$0xff] }
  0x7f   : > { %2228 = vmatmul.mubr.f32.gmra.mrb[6].mxu0 %v360_v8  ;;  %1307 = vmatprep.mubr.f32.mxu1 %v373_v9  ;;  %v515_v8 = vld [vmem:[%s4733_s8 + $0x738] sm:$0xff]  ;;  %v3846_v9 = vpack.c.bf16 %v1023_v3, %v1022_v2  ;;  %v624_v2 = vld [vmem:[%s4733_s8 + $0xaa0] sm:$0xff]  ;;  %v637_v3 = vld [vmem:[%s4733_s8 + $0xb08] sm:$0xff] }
  0x80   : > { %2232 = vmatprep.mubr.f32.mxu0 %v383_v11  ;;  %3589 = vmatpush1.bf16.msra.mxu1 %v3588_v10  ;;  %v864_v10 = vld [vmem:[%s6761_s1 + $0x1a0] sm:$0xff]  ;;  %v865_v11 = vld [vmem:[%s6761_s1 + $0x1a8] sm:$0xff] }
  0x81   : > { %3829 = vmatpush1.bf16.msra.mxu0 %v3828_v12  ;;  %3590 = vmatprep.subr.bf16.mxu1 %v4629_v0  ;;  %v1024_v12 = vld [vmem:[%s6761_s1 + $0x6a0] sm:$0xff] }
  0x82   : > { %1308 = vmatmul.mubr.f32.gmra.mrb[8].mxu1 %v372_v17  ;;  %3830 = vmatprep.subr.bf16.mxu0 %v4629_v0  ;;  %v3609_v17 = vpack.c.bf16 %v865_v11, %v864_v10  ;;  %v669_v10 = vld [vmem:[%s4733_s8 + $0xc08] sm:$0xff]  ;;  %v658_v11 = vld [vmem:[%s4733_s8 + $0xbb0] sm:$0xff] }
  0x83   : > { %2233 = vmatmul.mubr.f32.gmra.mrb[8].mxu0 %v382_v18  ;;  %1312 = vmatprep.mubr.f32.mxu1 %v395_v19  ;;  %v537_v18 = vld [vmem:[%s4733_s8 + $0x7e8] sm:$0xff]  ;;  %v3849_v19 = vpack.c.bf16 %v1025_v13, %v1024_v12  ;;  %v668_v12 = vld [vmem:[%s4733_s8 + $0xc00] sm:$0xff] }
  0x84   : > { %2237 = vmatprep.mubr.f32.mxu0 %v405_v21  ;;  %3592 = vmatpush1.bf16.msra.mxu1 %v3591_v20  ;;  %v866_v20 = vld [vmem:[%s6761_s1 + $0x1b0] sm:$0xff]  ;;  %v867_v21 = vld [vmem:[%s6761_s1 + $0x1b8] sm:$0xff]  ;;  %v681_v13 = vld [vmem:[%s4733_s8 + $0xc68] sm:$0xff] }
  0x85   : > { %3832 = vmatpush1.bf16.msra.mxu0 %v3831_v22  ;;  %3593 = vmatprep.subr.bf16.mxu1 %v4629_v0  ;;  %v1026_v22 = vld [vmem:[%s6761_s1 + $0x6b0] sm:$0xff] }
  0x86   : > { %1313 = vmatmul.mubr.f32.gmra.mrb[10].mxu1 %v394_v27  ;;  %3833 = vmatprep.subr.bf16.mxu0 %v4629_v0  ;;  %v3612_v27 = vpack.c.bf16 %v867_v21, %v866_v20  ;;  %v712_v20 = vld [vmem:[%s4733_s8 + $0xd60] sm:$0xff]  ;;  %v725_v21 = vld [vmem:[%s4733_s8 + $0xdc8] sm:$0xff] }
  0x87   : > { %2238 = vmatmul.mubr.f32.gmra.mrb[10].mxu0 %v404_v28  ;;  %1317 = vmatprep.mubr.f32.mxu1 %v417_v29  ;;  %v559_v28 = vld [vmem:[%s4733_s8 + $0x898] sm:$0xff]  ;;  %v3852_v29 = vpack.c.bf16 %v1027_v23, %v1026_v22  ;;  %v724_v23 = vld [vmem:[%s4733_s8 + $0xdc0] sm:$0xff] }
  0x88   : > { %2242 = vmatprep.mubr.f32.mxu0 %v427_v31  ;;  %3595 = vmatpush1.bf16.msra.mxu1 %v3594_v30  ;;  %v868_v30 = vld [vmem:[%s6761_s1 + $0x1c0] sm:$0xff]  ;;  %v869_v31 = vld [vmem:[%s6761_s1 + $0x1c8] sm:$0xff]  ;;  %v735_v22 = vld [vmem:[%s4733_s8 + $0xe18] sm:$0xff] }
  0x89   : > { %3835 = vmatpush1.bf16.msra.mxu0 %v3834_v32  ;;  %3596 = vmatprep.subr.bf16.mxu1 %v4629_v0  ;;  %v1028_v32 = vld [vmem:[%s6761_s1 + $0x6c0] sm:$0xff] }
  0x8a   : > { %1318 = vmatmul.mubr.f32.gmra.mrb[12].mxu1 %v416_v37  ;;  %3836 = vmatprep.subr.bf16.mxu0 %v4629_v0  ;;  %v3615_v37 = vpack.c.bf16 %v869_v31, %v868_v30  ;;  %v779_v30 = vld [vmem:[%s4733_s8 + $0xf78] sm:$0xff]  ;;  %v768_v31 = vld [vmem:[%s4733_s8 + $0xf20] sm:$0xff] }
  0x8b   : > { %2243 = vmatmul.mubr.f32.gmra.mrb[12].mxu0 %v426_v38  ;;  %1322 = vmatprep.mubr.f32.mxu1 %v439_v39  ;;  %v581_v38 = vld [vmem:[%s4733_s8 + $0x948] sm:$0xff]  ;;  %v3855_v39 = vpack.c.bf16 %v1029_v33, %v1028_v32  ;;  %v778_v32 = vld [vmem:[%s4733_s8 + $0xf70] sm:$0xff]  ;;  %v791_v33 = vld [vmem:[%s4733_s8 + $0xfd8] sm:$0xff] }
  0x8c   : > { %2247 = vmatprep.mubr.f32.mxu0 %v449_v41  ;;  %3598 = vmatpush1.bf16.msra.mxu1 %v3597_v40  ;;  %v870_v40 = vld [vmem:[%s6761_s1 + $0x1d0] sm:$0xff]  ;;  %v871_v41 = vld [vmem:[%s6761_s1 + $0x1d8] sm:$0xff] }
  0x8d   : > { %3838 = vmatpush1.bf16.msra.mxu0 %v3837_v42  ;;  %3599 = vmatprep.subr.bf16.mxu1 %v4629_v0  ;;  %v1030_v42 = vld [vmem:[%s6761_s1 + $0x6d0] sm:$0xff] }
  0x8e   : > { %1323 = vmatmul.mubr.f32.gmra.mrb[14].mxu1 %v438_v47  ;;  %3839 = vmatprep.subr.bf16.mxu0 %v4629_v0  ;;  %v3618_v47 = vpack.c.bf16 %v871_v41, %v870_v40  ;;  %v297_v40 = vld [vmem:[%s4733_s8 + $0x68] sm:$0xff]  ;;  %v1036_v41 = vld [vmem:[%s6761_s1 + $0x700] sm:$0xff] }
  0x8f   : > { %2248 = vmatmul.mubr.f32.gmra.mrb[14].mxu0 %v448_v48  ;;  %1327 = vmatprep.mubr.f32.mxu1 %v461_v49  ;;  %v603_v48 = vld [vmem:[%s4733_s8 + $0x9f8] sm:$0xff]  ;;  %v3858_v49 = vpack.c.bf16 %v1031_v43, %v1030_v42  ;;  %v1037_v42 = vld [vmem:[%s6761_s1 + $0x708] sm:$0xff]  ;;  %v286_v43 = vld [vmem:[%s4733_s8 + $0x10] sm:$0xff] }
  0x90   : > { %2252 = vmatprep.mubr.f32.mxu0 %v471_v51  ;;  %3601 = vmatpush1.bf16.msra.mxu1 %v3600_v50  ;;  %v872_v50 = vld [vmem:[%s6761_s1 + $0x1e0] sm:$0xff]  ;;  %v873_v51 = vld [vmem:[%s6761_s1 + $0x1e8] sm:$0xff] }
  0x91   : > { %3841 = vmatpush1.bf16.msra.mxu0 %v3840_v52  ;;  %3602 = vmatprep.subr.bf16.mxu1 %v4629_v0  ;;  %v1032_v52 = vld [vmem:[%s6761_s1 + $0x6e0] sm:$0xff] }
  0x92   : > { %1328 = vmatmul.mubr.f32.gmra.mrb[16].mxu1 %v460_v57  ;;  %3842 = vmatprep.subr.bf16.mxu0 %v4629_v0  ;;  %v3621_v57 = vpack.c.bf16 %v873_v51, %v872_v50  ;;  %v879_v50 = vld [vmem:[%s6761_s1 + $0x218] sm:$0xff]  ;;  %v1038_v51 = vld [vmem:[%s6761_s1 + $0x710] sm:$0xff] }
  0x93   : > { %2253 = vmatmul.mubr.f32.gmra.mrb[16].mxu0 %v470_v58  ;;  %1332 = vmatprep.mubr.f32.mxu1 %v483_v59  ;;  %v625_v58 = vld [vmem:[%s4733_s8 + $0xaa8] sm:$0xff]  ;;  %v3861_v59 = vpack.c.bf16 %v1033_v53, %v1032_v52  ;;  %v1039_v52 = vld [vmem:[%s6761_s1 + $0x718] sm:$0xff]  ;;  %v308_v53 = vld [vmem:[%s4733_s8 + $0xc0] sm:$0xff] }
  0x94   : > { %2257 = vmatprep.mubr.f32.mxu0 %v493_v61  ;;  %3604 = vmatpush1.bf16.msra.mxu1 %v3603_v60  ;;  %v874_v60 = vld [vmem:[%s6761_s1 + $0x1f0] sm:$0xff]  ;;  %v875_v61 = vld [vmem:[%s6761_s1 + $0x1f8] sm:$0xff] }
  0x95   : > { %3844 = vmatpush1.bf16.msra.mxu0 %v3843_v62  ;;  %3605 = vmatprep.subr.bf16.mxu1 %v4629_v0  ;;  %v1034_v62 = vld [vmem:[%s6761_s1 + $0x6f0] sm:$0xff] }
  0x96   : > { %1333 = vmatmul.mubr.f32.gmra.mrb[18].mxu1 %v482_v4  ;;  %3845 = vmatprep.subr.bf16.mxu0 %v4629_v0  ;;  %v3624_v4 = vpack.c.bf16 %v875_v61, %v874_v60  ;;  %v881_v60 = vld [vmem:[%s6761_s1 + $0x228] sm:$0xff]  ;;  %v1040_v61 = vld [vmem:[%s6761_s1 + $0x720] sm:$0xff] }
  0x97   : > { %2258 = vmatmul.mubr.f32.gmra.mrb[18].mxu0 %v492_v5  ;;  %1337 = vmatprep.mubr.f32.mxu1 %v505_v6  ;;  %v647_v5 = vld [vmem:[%s4733_s8 + $0xb58] sm:$0xff]  ;;  %v3864_v6 = vpack.c.bf16 %v1035_v63, %v1034_v62  ;;  %v1041_v62 = vld [vmem:[%s6761_s1 + $0x728] sm:$0xff]  ;;  %v330_v63 = vld [vmem:[%s4733_s8 + $0x170] sm:$0xff] }
  0x98   : > { %2262 = vmatprep.mubr.f32.mxu0 %v515_v8  ;;  %3607 = vmatpush1.bf16.msra.mxu1 %v3606_v7  ;;  %v636_v7 = vld [vmem:[%s4733_s8 + $0xb00] sm:$0xff]  ;;  %v646_v8 = vld [vmem:[%s4733_s8 + $0xb50] sm:$0xff] }
  0x99   : > { %3847 = vmatpush1.bf16.msra.mxu0 %v3846_v9  ;;  %3608 = vmatprep.subr.bf16.mxu1 %v4629_v0  ;;  %v659_v9 = vld [vmem:[%s4733_s8 + $0xbb8] sm:$0xff] }
  0x9a   : > { %1338 = vmatmul.mubr.f32.gmra.mrb[20].mxu1 %v504_v14  ;;  %3848 = vmatprep.subr.bf16.mxu0 %v4629_v0  ;;  %v691_v14 = vld [vmem:[%s4733_s8 + $0xcb8] sm:$0xff] }
  0x9b   : > { %2263 = vmatmul.mubr.f32.gmra.mrb[20].mxu0 %v514_v15  ;;  %1342 = vmatprep.mubr.f32.mxu1 %v527_v16  ;;  %v680_v15 = vld [vmem:[%s4733_s8 + $0xc60] sm:$0xff]  ;;  %v690_v16 = vld [vmem:[%s4733_s8 + $0xcb0] sm:$0xff] }
  0x9c   : > { %2267 = vmatprep.mubr.f32.mxu0 %v537_v18  ;;  %3610 = vmatpush1.bf16.msra.mxu1 %v3609_v17  ;;  %v703_v17 = vld [vmem:[%s4733_s8 + $0xd18] sm:$0xff]  ;;  %v713_v18 = vld [vmem:[%s4733_s8 + $0xd68] sm:$0xff] }
  0x9d   : > { %3850 = vmatpush1.bf16.msra.mxu0 %v3849_v19  ;;  %3611 = vmatprep.subr.bf16.mxu1 %v4629_v0  ;;  %v702_v19 = vld [vmem:[%s4733_s8 + $0xd10] sm:$0xff] }
  0x9e   : > { %1343 = vmatmul.mubr.f32.gmra.mrb[22].mxu1 %v526_v24  ;;  %3851 = vmatprep.subr.bf16.mxu0 %v4629_v0  ;;  %v734_v24 = vld [vmem:[%s4733_s8 + $0xe10] sm:$0xff] }
  0x9f   : > { %2268 = vmatmul.mubr.f32.gmra.mrb[22].mxu0 %v536_v25  ;;  %1347 = vmatprep.mubr.f32.mxu1 %v549_v26  ;;  %v747_v25 = vld [vmem:[%s4733_s8 + $0xe78] sm:$0xff]  ;;  %v757_v26 = vld [vmem:[%s4733_s8 + $0xec8] sm:$0xff] }
  0xa0   : > { %2272 = vmatprep.mubr.f32.mxu0 %v559_v28  ;;  %3613 = vmatpush1.bf16.msra.mxu1 %v3612_v27  ;;  %v746_v27 = vld [vmem:[%s4733_s8 + $0xe70] sm:$0xff]  ;;  %v756_v28 = vld [vmem:[%s4733_s8 + $0xec0] sm:$0xff] }
  0xa1   : > { %3853 = vmatpush1.bf16.msra.mxu0 %v3852_v29  ;;  %3614 = vmatprep.subr.bf16.mxu1 %v4629_v0  ;;  %v769_v29 = vld [vmem:[%s4733_s8 + $0xf28] sm:$0xff] }
  0xa2   : > { %1348 = vmatmul.mubr.f32.gmra.mrb[24].mxu1 %v548_v34  ;;  %3854 = vmatprep.subr.bf16.mxu0 %v4629_v0  ;;  %v801_v34 = vld [vmem:[%s4733_s8 + $0x1028] sm:$0xff] }
  0xa3   : > { %2273 = vmatmul.mubr.f32.gmra.mrb[24].mxu0 %v558_v35  ;;  %1352 = vmatprep.mubr.f32.mxu1 %v571_v36  ;;  %v790_v35 = vld [vmem:[%s4733_s8 + $0xfd0] sm:$0xff]  ;;  %v800_v36 = vld [vmem:[%s4733_s8 + $0x1020] sm:$0xff] }
  0xa4   : > { %2277 = vmatprep.mubr.f32.mxu0 %v581_v38  ;;  %3616 = vmatpush1.bf16.msra.mxu1 %v3615_v37  ;;  %v287_v37 = vld [vmem:[%s4733_s8 + $0x18] sm:$0xff]  ;;  %v876_v38 = vld [vmem:[%s6761_s1 + $0x200] sm:$0xff] }
  0xa5   : > { %3856 = vmatpush1.bf16.msra.mxu0 %v3855_v39  ;;  %3617 = vmatprep.subr.bf16.mxu1 %v4629_v0  ;;  %v877_v39 = vld [vmem:[%s6761_s1 + $0x208] sm:$0xff] }
  0xa6   : > { %1353 = vmatmul.mubr.f32.gmra.mrb[26].mxu1 %v570_v44  ;;  %3857 = vmatprep.subr.bf16.mxu0 %v4629_v0  ;;  %v3627_v44 = vpack.c.bf16 %v877_v39, %v876_v38  ;;  %v1048_v38 = vld [vmem:[%s6761_s1 + $0x760] sm:$0xff]  ;;  %v1049_v39 = vld [vmem:[%s6761_s1 + $0x768] sm:$0xff] }
  0xa7   : > { %2278 = vmatmul.mubr.f32.gmra.mrb[26].mxu0 %v580_v45  ;;  %1357 = vmatprep.mubr.f32.mxu1 %v593_v46  ;;  %v296_v45 = vld [vmem:[%s4733_s8 + $0x60] sm:$0xff]  ;;  %v309_v46 = vld [vmem:[%s4733_s8 + $0xc8] sm:$0xff] }
  0xa8   : > { %2282 = vmatprep.mubr.f32.mxu0 %v603_v48  ;;  %3619 = vmatpush1.bf16.msra.mxu1 %v3618_v47  ;;  %v319_v47 = vld [vmem:[%s4733_s8 + $0x118] sm:$0xff]  ;;  %v3867_v48 = vpack.c.bf16 %v1037_v42, %v1036_v41  ;;  %v428_v41 = vld [vmem:[%s4733_s8 + $0x480] sm:$0xff]  ;;  %v441_v42 = vld [vmem:[%s4733_s8 + $0x4e8] sm:$0xff] }
  0xa9   : > { %3859 = vmatpush1.bf16.msra.mxu0 %v3858_v49  ;;  %3620 = vmatprep.subr.bf16.mxu1 %v4629_v0  ;;  %v878_v49 = vld [vmem:[%s6761_s1 + $0x210] sm:$0xff] }
  0xaa   : > { %1358 = vmatmul.mubr.f32.gmra.mrb[28].mxu1 %v592_v54  ;;  %3860 = vmatprep.subr.bf16.mxu0 %v4629_v0  ;;  %v318_v54 = vld [vmem:[%s4733_s8 + $0x110] sm:$0xff] }
  0xab   : > { %2283 = vmatmul.mubr.f32.gmra.mrb[28].mxu0 %v602_v55  ;;  %1362 = vmatprep.mubr.f32.mxu1 %v615_v56  ;;  %v331_v55 = vld [vmem:[%s4733_s8 + $0x178] sm:$0xff]  ;;  %v3630_v56 = vpack.c.bf16 %v879_v50, %v878_v49  ;;  %v440_v50 = vld [vmem:[%s4733_s8 + $0x4e0] sm:$0xff] }
  0xac   : > { %2287 = vmatprep.mubr.f32.mxu0 %v625_v58  ;;  %3622 = vmatpush1.bf16.msra.mxu1 %v3621_v57  ;;  %v341_v57 = vld [vmem:[%s4733_s8 + $0x1c8] sm:$0xff]  ;;  %v3870_v58 = vpack.c.bf16 %v1039_v52, %v1038_v51  ;;  %v1051_v49 = vld [vmem:[%s6761_s1 + $0x778] sm:$0xff]  ;;  %v450_v51 = vld [vmem:[%s4733_s8 + $0x530] sm:$0xff] }
  0xad   : > { %3862 = vmatpush1.bf16.msra.mxu0 %v3861_v59  ;;  %3623 = vmatprep.subr.bf16.mxu1 %v4629_v0  ;;  %v880_v59 = vld [vmem:[%s6761_s1 + $0x220] sm:$0xff]  ;;  %v463_v52 = vld [vmem:[%s4733_s8 + $0x598] sm:$0xff] }
  0xae   : > { %1363 = vmatmul.mubr.f32.gmra.mrb[30].mxu1 %v614_v1  ;;  %3863 = vmatprep.subr.bf16.mxu0 %v4629_v0  ;;  %v340_v1 = vld [vmem:[%s4733_s8 + $0x1c0] sm:$0xff] }
  0xaf   : > { %2288 = vmatmul.mubr.f32.gmra.mrb[30].mxu0 %v624_v2  ;;  %1367 = vmatprep.mubr.f32.mxu1 %v637_v3  ;;  %v353_v2 = vld [vmem:[%s4733_s8 + $0x228] sm:$0xff]  ;;  %v3633_v3 = vpack.c.bf16 %v881_v60, %v880_v59  ;;  %v462_v60 = vld [vmem:[%s4733_s8 + $0x590] sm:$0xff] }
  0xb0   : > { %2292 = vmatprep.mubr.f32.mxu0 %v647_v5  ;;  %3625 = vmatpush1.bf16.msra.mxu1 %v3624_v4  ;;  %v363_v4 = vld [vmem:[%s4733_s8 + $0x278] sm:$0xff]  ;;  %v3873_v5 = vpack.c.bf16 %v1041_v62, %v1040_v61  ;;  %v1053_v59 = vld [vmem:[%s6761_s1 + $0x788] sm:$0xff]  ;;  %v472_v61 = vld [vmem:[%s4733_s8 + $0x5e0] sm:$0xff] }
  0xb1   : > { %3865 = vmatpush1.bf16.msra.mxu0 %v3864_v6  ;;  %3626 = vmatprep.subr.bf16.mxu1 %v4629_v0  ;;  %v882_v6 = vld [vmem:[%s6761_s1 + $0x230] sm:$0xff]  ;;  %v485_v62 = vld [vmem:[%s4733_s8 + $0x648] sm:$0xff] }
  0xb2   : > { %1368 = vmatmul.mubr.f32.gmra.mrb[32].mxu1 %v636_v7  ;;  %3866 = vmatprep.subr.bf16.mxu0 %v4629_v0  ;;  %v883_v7 = vld [vmem:[%s6761_s1 + $0x238] sm:$0xff] }
  0xb3   : > { %2293 = vmatmul.mubr.f32.gmra.mrb[32].mxu0 %v646_v8  ;;  %1372 = vmatprep.mubr.f32.mxu1 %v659_v9  ;;  %v1042_v8 = vld [vmem:[%s6761_s1 + $0x730] sm:$0xff]  ;;  %v1043_v9 = vld [vmem:[%s6761_s1 + $0x738] sm:$0xff] }
  0xb4   : > { %2297 = vmatprep.mubr.f32.mxu0 %v669_v10  ;;  %v352_v10 = vld [vmem:[%s4733_s8 + $0x220] sm:$0xff] }
  0xb6   : > { %1373 = vmatmul.mubr.f32.gmra.mrb[34].mxu1 %v658_v11  ;;  %v362_v11 = vld [vmem:[%s4733_s8 + $0x270] sm:$0xff] }
  0xb7   : > { %2298 = vmatmul.mubr.f32.gmra.mrb[34].mxu0 %v668_v12  ;;  %1377 = vmatprep.mubr.f32.mxu1 %v681_v13  ;;  %v375_v12 = vld [vmem:[%s4733_s8 + $0x2d8] sm:$0xff]  ;;  %v3636_v13 = vpack.c.bf16 %v883_v7, %v882_v6  ;;  %v484_v7 = vld [vmem:[%s4733_s8 + $0x640] sm:$0xff] }
  0xb8   : > { %2302 = vmatprep.mubr.f32.mxu0 %v691_v14  ;;  %v385_v14 = vld [vmem:[%s4733_s8 + $0x328] sm:$0xff]  ;;  %v1055_v6 = vld [vmem:[%s6761_s1 + $0x798] sm:$0xff] }
  0xba   : > { %1378 = vmatmul.mubr.f32.gmra.mrb[36].mxu1 %v680_v15  ;;  %v3876_v15 = vpack.c.bf16 %v1043_v9, %v1042_v8  ;;  %v494_v8 = vld [vmem:[%s4733_s8 + $0x690] sm:$0xff]  ;;  %v507_v9 = vld [vmem:[%s4733_s8 + $0x6f8] sm:$0xff] }
  0xbb   : > { %2303 = vmatmul.mubr.f32.gmra.mrb[36].mxu0 %v690_v16  ;;  %1382 = vmatprep.mubr.f32.mxu1 %v703_v17  ;;  %v884_v16 = vld [vmem:[%s6761_s1 + $0x240] sm:$0xff]  ;;  %v885_v17 = vld [vmem:[%s6761_s1 + $0x248] sm:$0xff] }
  0xbc   : > { %2307 = vmatprep.mubr.f32.mxu0 %v713_v18  ;;  %v1044_v18 = vld [vmem:[%s6761_s1 + $0x740] sm:$0xff] }
  0xbe   : > { %1383 = vmatmul.mubr.f32.gmra.mrb[38].mxu1 %v702_v19  ;;  %v1045_v19 = vld [vmem:[%s6761_s1 + $0x748] sm:$0xff] }
  0xbf   : > { %2308 = vmatmul.mubr.f32.gmra.mrb[38].mxu0 %v712_v20  ;;  %1387 = vmatprep.mubr.f32.mxu1 %v725_v21  ;;  %v374_v20 = vld [vmem:[%s4733_s8 + $0x2d0] sm:$0xff]  ;;  %v384_v21 = vld [vmem:[%s4733_s8 + $0x320] sm:$0xff] }
  0xc0   : > { %2312 = vmatprep.mubr.f32.mxu0 %v735_v22  ;;  %v397_v22 = vld [vmem:[%s4733_s8 + $0x388] sm:$0xff] }
  0xc2   : > { %1388 = vmatmul.mubr.f32.gmra.mrb[40].mxu1 %v724_v23  ;;  %v3639_v23 = vpack.c.bf16 %v885_v17, %v884_v16  ;;  %v1057_v16 = vld [vmem:[%s6761_s1 + $0x7a8] sm:$0xff]  ;;  %v506_v17 = vld [vmem:[%s4733_s8 + $0x6f0] sm:$0xff] }
  0xc3   : > { %2313 = vmatmul.mubr.f32.gmra.mrb[40].mxu0 %v734_v24  ;;  %1392 = vmatprep.mubr.f32.mxu1 %v747_v25  ;;  %v407_v24 = vld [vmem:[%s4733_s8 + $0x3d8] sm:$0xff]  ;;  %v3879_v25 = vpack.c.bf16 %v1045_v19, %v1044_v18  ;;  %v516_v18 = vld [vmem:[%s4733_s8 + $0x740] sm:$0xff]  ;;  %v529_v19 = vld [vmem:[%s4733_s8 + $0x7a8] sm:$0xff] }
  0xc4   : > { %2317 = vmatprep.mubr.f32.mxu0 %v757_v26  ;;  %v886_v26 = vld [vmem:[%s6761_s1 + $0x250] sm:$0xff] }
  0xc6   : > { %1393 = vmatmul.mubr.f32.gmra.mrb[42].mxu1 %v746_v27  ;;  %v887_v27 = vld [vmem:[%s6761_s1 + $0x258] sm:$0xff] }
  0xc7   : > { %2318 = vmatmul.mubr.f32.gmra.mrb[42].mxu0 %v756_v28  ;;  %1397 = vmatprep.mubr.f32.mxu1 %v769_v29  ;;  %v1046_v28 = vld [vmem:[%s6761_s1 + $0x750] sm:$0xff]  ;;  %v1047_v29 = vld [vmem:[%s6761_s1 + $0x758] sm:$0xff] }
  0xc8   : > { %2322 = vmatprep.mubr.f32.mxu0 %v779_v30  ;;  %v396_v30 = vld [vmem:[%s4733_s8 + $0x380] sm:$0xff] }
  0xca   : > { %1398 = vmatmul.mubr.f32.gmra.mrb[44].mxu1 %v768_v31  ;;  %v406_v31 = vld [vmem:[%s4733_s8 + $0x3d0] sm:$0xff] }
  0xcb   : > { %2323 = vmatmul.mubr.f32.gmra.mrb[44].mxu0 %v778_v32  ;;  %1402 = vmatprep.mubr.f32.mxu1 %v791_v33  ;;  %v419_v32 = vld [vmem:[%s4733_s8 + $0x438] sm:$0xff]  ;;  %v3642_v33 = vpack.c.bf16 %v887_v27, %v886_v26  ;;  %v528_v27 = vld [vmem:[%s4733_s8 + $0x7a0] sm:$0xff] }
  0xcc   : > { %2327 = vmatprep.mubr.f32.mxu0 %v801_v34  ;;  %v429_v34 = vld [vmem:[%s4733_s8 + $0x488] sm:$0xff]  ;;  %v1059_v26 = vld [vmem:[%s6761_s1 + $0x7b8] sm:$0xff] }
  0xce   : > { %1403 = vmatmul.mubr.f32.gmra.mrb[46].mxu1 %v790_v35  ;;  %v3882_v35 = vpack.c.bf16 %v1047_v29, %v1046_v28  ;;  %v538_v28 = vld [vmem:[%s4733_s8 + $0x7f0] sm:$0xff]  ;;  %v551_v29 = vld [vmem:[%s4733_s8 + $0x858] sm:$0xff] }
  0xcf   : > { %2328 = vmatmul.mubr.f32.gmra.mrb[46].mxu0 %v800_v36  ;;  %1472 = vmatprep.mubr.f32.mxu1 %v287_v37  ;;  %v888_v36 = vld [vmem:[%s6761_s1 + $0x260] sm:$0xff]  ;;  %v889_v37 = vld [vmem:[%s6761_s1 + $0x268] sm:$0xff] }
  0xd0   : > { %2397 = vmatprep.mubr.f32.mxu0 %v297_v40  ;;  %v418_v40 = vld [vmem:[%s4733_s8 + $0x430] sm:$0xff] }
  0xd2   : > { %1473 = vmatmul.mubr.f32.vlgmr.msra.gmra.mrb[0].mxu1 %v286_v43  ;;  %v3645_v43 = vpack.c.bf16 %v889_v37, %v888_v36  ;;  %v1061_v36 = vld [vmem:[%s6761_s1 + $0x7c8] sm:$0xff]  ;;  %v550_v37 = vld [vmem:[%s4733_s8 + $0x850] sm:$0xff] }
  0xd3   : > { %2398 = vmatmul.mubr.f32.vlgmr.msra.gmra.mrb[0].mxu0 %v296_v45  ;;  %3628 = vmatpush1.bf16.msra.mxu1 %v3627_v44  ;;  %v451_v44 = vld [vmem:[%s4733_s8 + $0x538] sm:$0xff]  ;;  %v3885_v45 = vpack.c.bf16 %v1049_v39, %v1048_v38  ;;  %v560_v38 = vld [vmem:[%s4733_s8 + $0x8a0] sm:$0xff]  ;;  %v573_v39 = vld [vmem:[%s4733_s8 + $0x908] sm:$0xff] }
  0xd4   : > { %1477 = vmatprep.mubr.f32.mxu1 %v309_v46  ;;  %2402 = vmatprep.mubr.f32.mxu0 %v319_v47  ;;  %v890_v46 = vld [vmem:[%s6761_s1 + $0x270] sm:$0xff]  ;;  %v891_v47 = vld [vmem:[%s6761_s1 + $0x278] sm:$0xff] }
  0xd5   : > { %3868 = vmatpush1.bf16.msra.mxu0 %v3867_v48  ;;  %3629 = vmatprep.subr.bf16.mxu1 %v4629_v0  ;;  %v1050_v48 = vld [vmem:[%s6761_s1 + $0x770] sm:$0xff] }
  0xd6   : > { %1478 = vmatmul.mubr.f32.gmra.mrb[2].mxu1 %v308_v53  ;;  %3869 = vmatprep.subr.bf16.mxu0 %v4629_v0  ;;  %v3648_v53 = vpack.c.bf16 %v891_v47, %v890_v46  ;;  %v1063_v46 = vld [vmem:[%s6761_s1 + $0x7d8] sm:$0xff]  ;;  %v572_v47 = vld [vmem:[%s4733_s8 + $0x900] sm:$0xff] }
  0xd7   : > { %2403 = vmatmul.mubr.f32.gmra.mrb[2].mxu0 %v318_v54  ;;  %1482 = vmatprep.mubr.f32.mxu1 %v331_v55  ;;  %v473_v54 = vld [vmem:[%s4733_s8 + $0x5e8] sm:$0xff]  ;;  %v3888_v55 = vpack.c.bf16 %v1051_v49, %v1050_v48  ;;  %v582_v48 = vld [vmem:[%s4733_s8 + $0x950] sm:$0xff]  ;;  %v595_v49 = vld [vmem:[%s4733_s8 + $0x9b8] sm:$0xff] }
  0xd8   : > { %3631 = vmatpush1.bf16.msra.mxu1 %v3630_v56  ;;  %2407 = vmatprep.mubr.f32.mxu0 %v341_v57  ;;  %v892_v56 = vld [vmem:[%s6761_s1 + $0x280] sm:$0xff]  ;;  %v893_v57 = vld [vmem:[%s6761_s1 + $0x288] sm:$0xff] }
  0xd9   : > { %3871 = vmatpush1.bf16.msra.mxu0 %v3870_v58  ;;  %3632 = vmatprep.subr.bf16.mxu1 %v4629_v0  ;;  %v1052_v58 = vld [vmem:[%s6761_s1 + $0x780] sm:$0xff] }
  0xda   : > { %1483 = vmatmul.mubr.f32.gmra.mrb[4].mxu1 %v330_v63  ;;  %3872 = vmatprep.subr.bf16.mxu0 %v4629_v0  ;;  %v3651_v63 = vpack.c.bf16 %v893_v57, %v892_v56  ;;  %v1065_v56 = vld [vmem:[%s6761_s1 + $0x7e8] sm:$0xff]  ;;  %v594_v57 = vld [vmem:[%s4733_s8 + $0x9b0] sm:$0xff] }
  0xdb   : > { %2408 = vmatmul.mubr.f32.gmra.mrb[4].mxu0 %v340_v1  ;;  %1487 = vmatprep.mubr.f32.mxu1 %v353_v2  ;;  %v495_v1 = vld [vmem:[%s4733_s8 + $0x698] sm:$0xff]  ;;  %v3891_v2 = vpack.c.bf16 %v1053_v59, %v1052_v58  ;;  %v604_v58 = vld [vmem:[%s4733_s8 + $0xa00] sm:$0xff]  ;;  %v617_v59 = vld [vmem:[%s4733_s8 + $0xa68] sm:$0xff] }
  0xdc   : > { %2412 = vmatprep.mubr.f32.mxu0 %v363_v4  ;;  %3634 = vmatpush1.bf16.msra.mxu1 %v3633_v3  ;;  %v894_v3 = vld [vmem:[%s6761_s1 + $0x290] sm:$0xff]  ;;  %v895_v4 = vld [vmem:[%s6761_s1 + $0x298] sm:$0xff] }
  0xdd   : > { %3874 = vmatpush1.bf16.msra.mxu0 %v3873_v5  ;;  %3635 = vmatprep.subr.bf16.mxu1 %v4629_v0  ;;  %v1054_v5 = vld [vmem:[%s6761_s1 + $0x790] sm:$0xff] }
  0xde   : > { %1488 = vmatmul.mubr.f32.gmra.mrb[6].mxu1 %v352_v10  ;;  %3875 = vmatprep.subr.bf16.mxu0 %v4629_v0  ;;  %v3654_v10 = vpack.c.bf16 %v895_v4, %v894_v3  ;;  %v1067_v3 = vld [vmem:[%s6761_s1 + $0x7f8] sm:$0xff]  ;;  %v616_v4 = vld [vmem:[%s4733_s8 + $0xa60] sm:$0xff] }
  0xdf   : > { %2413 = vmatmul.mubr.f32.gmra.mrb[6].mxu0 %v362_v11  ;;  %1492 = vmatprep.mubr.f32.mxu1 %v375_v12  ;;  %v517_v11 = vld [vmem:[%s4733_s8 + $0x748] sm:$0xff]  ;;  %v3894_v12 = vpack.c.bf16 %v1055_v6, %v1054_v5  ;;  %v626_v5 = vld [vmem:[%s4733_s8 + $0xab0] sm:$0xff]  ;;  %v639_v6 = vld [vmem:[%s4733_s8 + $0xb18] sm:$0xff] }
  0xe0   : > { %2417 = vmatprep.mubr.f32.mxu0 %v385_v14  ;;  %3637 = vmatpush1.bf16.msra.mxu1 %v3636_v13  ;;  %v896_v13 = vld [vmem:[%s6761_s1 + $0x2a0] sm:$0xff]  ;;  %v897_v14 = vld [vmem:[%s6761_s1 + $0x2a8] sm:$0xff] }
  0xe1   : > { %3877 = vmatpush1.bf16.msra.mxu0 %v3876_v15  ;;  %3638 = vmatprep.subr.bf16.mxu1 %v4629_v0  ;;  %v1056_v15 = vld [vmem:[%s6761_s1 + $0x7a0] sm:$0xff] }
  0xe2   : > { %1493 = vmatmul.mubr.f32.gmra.mrb[8].mxu1 %v374_v20  ;;  %3878 = vmatprep.subr.bf16.mxu0 %v4629_v0  ;;  %v3657_v20 = vpack.c.bf16 %v897_v14, %v896_v13  ;;  %v671_v13 = vld [vmem:[%s4733_s8 + $0xc18] sm:$0xff]  ;;  %v660_v14 = vld [vmem:[%s4733_s8 + $0xbc0] sm:$0xff] }
  0xe3   : > { %2418 = vmatmul.mubr.f32.gmra.mrb[8].mxu0 %v384_v21  ;;  %1497 = vmatprep.mubr.f32.mxu1 %v397_v22  ;;  %v539_v21 = vld [vmem:[%s4733_s8 + $0x7f8] sm:$0xff]  ;;  %v3897_v22 = vpack.c.bf16 %v1057_v16, %v1056_v15  ;;  %v670_v15 = vld [vmem:[%s4733_s8 + $0xc10] sm:$0xff] }
  0xe4   : > { %2422 = vmatprep.mubr.f32.mxu0 %v407_v24  ;;  %3640 = vmatpush1.bf16.msra.mxu1 %v3639_v23  ;;  %v898_v23 = vld [vmem:[%s6761_s1 + $0x2b0] sm:$0xff]  ;;  %v899_v24 = vld [vmem:[%s6761_s1 + $0x2b8] sm:$0xff] }
  0xe5   : > { %3880 = vmatpush1.bf16.msra.mxu0 %v3879_v25  ;;  %3641 = vmatprep.subr.bf16.mxu1 %v4629_v0  ;;  %v1058_v25 = vld [vmem:[%s6761_s1 + $0x7b0] sm:$0xff]  ;;  %v683_v16 = vld [vmem:[%s4733_s8 + $0xc78] sm:$0xff] }
  0xe6   : > { %1498 = vmatmul.mubr.f32.gmra.mrb[10].mxu1 %v396_v30  ;;  %3881 = vmatprep.subr.bf16.mxu0 %v4629_v0  ;;  %v3660_v30 = vpack.c.bf16 %v899_v24, %v898_v23  ;;  %v714_v23 = vld [vmem:[%s4733_s8 + $0xd70] sm:$0xff]  ;;  %v727_v24 = vld [vmem:[%s4733_s8 + $0xdd8] sm:$0xff] }
  0xe7   : > { %2423 = vmatmul.mubr.f32.gmra.mrb[10].mxu0 %v406_v31  ;;  %1502 = vmatprep.mubr.f32.mxu1 %v419_v32  ;;  %v561_v31 = vld [vmem:[%s4733_s8 + $0x8a8] sm:$0xff]  ;;  %v3900_v32 = vpack.c.bf16 %v1059_v26, %v1058_v25  ;;  %v726_v26 = vld [vmem:[%s4733_s8 + $0xdd0] sm:$0xff] }
  0xe8   : > { %2427 = vmatprep.mubr.f32.mxu0 %v429_v34  ;;  %3643 = vmatpush1.bf16.msra.mxu1 %v3642_v33  ;;  %v900_v33 = vld [vmem:[%s6761_s1 + $0x2c0] sm:$0xff]  ;;  %v901_v34 = vld [vmem:[%s6761_s1 + $0x2c8] sm:$0xff] }
  0xe9   : > { %3883 = vmatpush1.bf16.msra.mxu0 %v3882_v35  ;;  %3644 = vmatprep.subr.bf16.mxu1 %v4629_v0  ;;  %v1060_v35 = vld [vmem:[%s6761_s1 + $0x7c0] sm:$0xff]  ;;  %v737_v25 = vld [vmem:[%s4733_s8 + $0xe28] sm:$0xff] }
  0xea   : > { %1503 = vmatmul.mubr.f32.gmra.mrb[12].mxu1 %v418_v40  ;;  %3884 = vmatprep.subr.bf16.mxu0 %v4629_v0  ;;  %v3663_v40 = vpack.c.bf16 %v901_v34, %v900_v33  ;;  %v781_v33 = vld [vmem:[%s4733_s8 + $0xf88] sm:$0xff]  ;;  %v770_v34 = vld [vmem:[%s4733_s8 + $0xf30] sm:$0xff] }
  0xeb   : > { %2428 = vmatmul.mubr.f32.gmra.mrb[12].mxu0 %v428_v41  ;;  %1507 = vmatprep.mubr.f32.mxu1 %v441_v42  ;;  %v583_v41 = vld [vmem:[%s4733_s8 + $0x958] sm:$0xff]  ;;  %v3903_v42 = vpack.c.bf16 %v1061_v36, %v1060_v35  ;;  %v780_v35 = vld [vmem:[%s4733_s8 + $0xf80] sm:$0xff]  ;;  %v793_v36 = vld [vmem:[%s4733_s8 + $0xfe8] sm:$0xff] }
  0xec   : > { %2432 = vmatprep.mubr.f32.mxu0 %v451_v44  ;;  %3646 = vmatpush1.bf16.msra.mxu1 %v3645_v43  ;;  %v902_v43 = vld [vmem:[%s6761_s1 + $0x2d0] sm:$0xff]  ;;  %v903_v44 = vld [vmem:[%s6761_s1 + $0x2d8] sm:$0xff] }
  0xed   : > { %3886 = vmatpush1.bf16.msra.mxu0 %v3885_v45  ;;  %3647 = vmatprep.subr.bf16.mxu1 %v4629_v0  ;;  %v1062_v45 = vld [vmem:[%s6761_s1 + $0x7d0] sm:$0xff] }
  0xee   : > { %1508 = vmatmul.mubr.f32.gmra.mrb[14].mxu1 %v440_v50  ;;  %3887 = vmatprep.subr.bf16.mxu0 %v4629_v0  ;;  %v3666_v50 = vpack.c.bf16 %v903_v44, %v902_v43  ;;  %v299_v43 = vld [vmem:[%s4733_s8 + $0x78] sm:$0xff]  ;;  %v1068_v44 = vld [vmem:[%s6761_s1 + $0x800] sm:$0xff] }
  0xef   : > { %2433 = vmatmul.mubr.f32.gmra.mrb[14].mxu0 %v450_v51  ;;  %1512 = vmatprep.mubr.f32.mxu1 %v463_v52  ;;  %v605_v51 = vld [vmem:[%s4733_s8 + $0xa08] sm:$0xff]  ;;  %v3906_v52 = vpack.c.bf16 %v1063_v46, %v1062_v45  ;;  %v288_v46 = vld [vmem:[%s4733_s8 + $0x20] sm:$0xff] }
  0xf0   : > { %2437 = vmatprep.mubr.f32.mxu0 %v473_v54  ;;  %3649 = vmatpush1.bf16.msra.mxu1 %v3648_v53  ;;  %v904_v53 = vld [vmem:[%s6761_s1 + $0x2e0] sm:$0xff]  ;;  %v905_v54 = vld [vmem:[%s6761_s1 + $0x2e8] sm:$0xff] }
  0xf1   : > { %3889 = vmatpush1.bf16.msra.mxu0 %v3888_v55  ;;  %3650 = vmatprep.subr.bf16.mxu1 %v4629_v0  ;;  %v1064_v55 = vld [vmem:[%s6761_s1 + $0x7e0] sm:$0xff]  ;;  %v1069_v45 = vld [vmem:[%s6761_s1 + $0x808] sm:$0xff] }
  0xf2   : > { %1513 = vmatmul.mubr.f32.gmra.mrb[16].mxu1 %v462_v60  ;;  %3890 = vmatprep.subr.bf16.mxu0 %v4629_v0  ;;  %v3669_v60 = vpack.c.bf16 %v905_v54, %v904_v53  ;;  %v911_v53 = vld [vmem:[%s6761_s1 + $0x318] sm:$0xff]  ;;  %v1070_v54 = vld [vmem:[%s6761_s1 + $0x810] sm:$0xff] }
  0xf3   : > { %2438 = vmatmul.mubr.f32.gmra.mrb[16].mxu0 %v472_v61  ;;  %1517 = vmatprep.mubr.f32.mxu1 %v485_v62  ;;  %v627_v61 = vld [vmem:[%s4733_s8 + $0xab8] sm:$0xff]  ;;  %v3909_v62 = vpack.c.bf16 %v1065_v56, %v1064_v55  ;;  %v310_v56 = vld [vmem:[%s4733_s8 + $0xd0] sm:$0xff] }
  0xf4   : > { %2442 = vmatprep.mubr.f32.mxu0 %v495_v1  ;;  %3652 = vmatpush1.bf16.msra.mxu1 %v3651_v63  ;;  %v906_v63 = vld [vmem:[%s6761_s1 + $0x2f0] sm:$0xff]  ;;  %v907_v1 = vld [vmem:[%s6761_s1 + $0x2f8] sm:$0xff] }
  0xf5   : > { %3892 = vmatpush1.bf16.msra.mxu0 %v3891_v2  ;;  %3653 = vmatprep.subr.bf16.mxu1 %v4629_v0  ;;  %v1066_v2 = vld [vmem:[%s6761_s1 + $0x7f0] sm:$0xff]  ;;  %v1071_v55 = vld [vmem:[%s6761_s1 + $0x818] sm:$0xff] }
  0xf6   : > { %1518 = vmatmul.mubr.f32.gmra.mrb[18].mxu1 %v484_v7  ;;  %3893 = vmatprep.subr.bf16.mxu0 %v4629_v0  ;;  %v3672_v7 = vpack.c.bf16 %v907_v1, %v906_v63  ;;  %v913_v63 = vld [vmem:[%s6761_s1 + $0x328] sm:$0xff]  ;;  %v1072_v1 = vld [vmem:[%s6761_s1 + $0x820] sm:$0xff] }
  0xf7   : > { %2443 = vmatmul.mubr.f32.gmra.mrb[18].mxu0 %v494_v8  ;;  %1522 = vmatprep.mubr.f32.mxu1 %v507_v9  ;;  %v649_v8 = vld [vmem:[%s4733_s8 + $0xb68] sm:$0xff]  ;;  %v3912_v9 = vpack.c.bf16 %v1067_v3, %v1066_v2  ;;  %v332_v3 = vld [vmem:[%s4733_s8 + $0x180] sm:$0xff] }
  0xf8   : > { %2447 = vmatprep.mubr.f32.mxu0 %v517_v11  ;;  %3655 = vmatpush1.bf16.msra.mxu1 %v3654_v10  ;;  %v638_v10 = vld [vmem:[%s4733_s8 + $0xb10] sm:$0xff]  ;;  %v648_v11 = vld [vmem:[%s4733_s8 + $0xb60] sm:$0xff]  ;;  %v1073_v2 = vld [vmem:[%s6761_s1 + $0x828] sm:$0xff] }
  0xf9   : > { %3895 = vmatpush1.bf16.msra.mxu0 %v3894_v12  ;;  %3656 = vmatprep.subr.bf16.mxu1 %v4629_v0  ;;  %v661_v12 = vld [vmem:[%s4733_s8 + $0xbc8] sm:$0xff] }
  0xfa   : > { %1523 = vmatmul.mubr.f32.gmra.mrb[20].mxu1 %v506_v17  ;;  %3896 = vmatprep.subr.bf16.mxu0 %v4629_v0  ;;  %v693_v17 = vld [vmem:[%s4733_s8 + $0xcc8] sm:$0xff] }
  0xfb   : > { %2448 = vmatmul.mubr.f32.gmra.mrb[20].mxu0 %v516_v18  ;;  %1527 = vmatprep.mubr.f32.mxu1 %v529_v19  ;;  %v682_v18 = vld [vmem:[%s4733_s8 + $0xc70] sm:$0xff]  ;;  %v692_v19 = vld [vmem:[%s4733_s8 + $0xcc0] sm:$0xff] }
  0xfc   : > { %2452 = vmatprep.mubr.f32.mxu0 %v539_v21  ;;  %3658 = vmatpush1.bf16.msra.mxu1 %v3657_v20  ;;  %v705_v20 = vld [vmem:[%s4733_s8 + $0xd28] sm:$0xff]  ;;  %v715_v21 = vld [vmem:[%s4733_s8 + $0xd78] sm:$0xff] }
  0xfd   : > { %3898 = vmatpush1.bf16.msra.mxu0 %v3897_v22  ;;  %3659 = vmatprep.subr.bf16.mxu1 %v4629_v0  ;;  %v704_v22 = vld [vmem:[%s4733_s8 + $0xd20] sm:$0xff] }
  0xfe   : > { %1528 = vmatmul.mubr.f32.gmra.mrb[22].mxu1 %v528_v27  ;;  %3899 = vmatprep.subr.bf16.mxu0 %v4629_v0  ;;  %v736_v27 = vld [vmem:[%s4733_s8 + $0xe20] sm:$0xff] }
  0xff   : > { %2453 = vmatmul.mubr.f32.gmra.mrb[22].mxu0 %v538_v28  ;;  %1532 = vmatprep.mubr.f32.mxu1 %v551_v29  ;;  %v749_v28 = vld [vmem:[%s4733_s8 + $0xe88] sm:$0xff]  ;;  %v759_v29 = vld [vmem:[%s4733_s8 + $0xed8] sm:$0xff] }
 0x100   : > { %2457 = vmatprep.mubr.f32.mxu0 %v561_v31  ;;  %3661 = vmatpush1.bf16.msra.mxu1 %v3660_v30  ;;  %v748_v30 = vld [vmem:[%s4733_s8 + $0xe80] sm:$0xff]  ;;  %v758_v31 = vld [vmem:[%s4733_s8 + $0xed0] sm:$0xff] }
 0x101   : > { %3901 = vmatpush1.bf16.msra.mxu0 %v3900_v32  ;;  %3662 = vmatprep.subr.bf16.mxu1 %v4629_v0  ;;  %v771_v32 = vld [vmem:[%s4733_s8 + $0xf38] sm:$0xff] }
 0x102   : > { %1533 = vmatmul.mubr.f32.gmra.mrb[24].mxu1 %v550_v37  ;;  %3902 = vmatprep.subr.bf16.mxu0 %v4629_v0  ;;  %v803_v37 = vld [vmem:[%s4733_s8 + $0x1038] sm:$0xff] }
 0x103   : > { %2458 = vmatmul.mubr.f32.gmra.mrb[24].mxu0 %v560_v38  ;;  %1537 = vmatprep.mubr.f32.mxu1 %v573_v39  ;;  %v792_v38 = vld [vmem:[%s4733_s8 + $0xfe0] sm:$0xff]  ;;  %v802_v39 = vld [vmem:[%s4733_s8 + $0x1030] sm:$0xff] }
 0x104   : > { %2462 = vmatprep.mubr.f32.mxu0 %v583_v41  ;;  %3664 = vmatpush1.bf16.msra.mxu1 %v3663_v40  ;;  %v289_v40 = vld [vmem:[%s4733_s8 + $0x28] sm:$0xff]  ;;  %v908_v41 = vld [vmem:[%s6761_s1 + $0x300] sm:$0xff] }
 0x105   : > { %3904 = vmatpush1.bf16.msra.mxu0 %v3903_v42  ;;  %3665 = vmatprep.subr.bf16.mxu1 %v4629_v0  ;;  %v909_v42 = vld [vmem:[%s6761_s1 + $0x308] sm:$0xff] }
 0x106   : > { %1538 = vmatmul.mubr.f32.gmra.mrb[26].mxu1 %v572_v47  ;;  %3905 = vmatprep.subr.bf16.mxu0 %v4629_v0  ;;  %v3675_v47 = vpack.c.bf16 %v909_v42, %v908_v41  ;;  %v1080_v41 = vld [vmem:[%s6761_s1 + $0x860] sm:$0xff]  ;;  %v1081_v42 = vld [vmem:[%s6761_s1 + $0x868] sm:$0xff] }
 0x107   : > { %2463 = vmatmul.mubr.f32.gmra.mrb[26].mxu0 %v582_v48  ;;  %1542 = vmatprep.mubr.f32.mxu1 %v595_v49  ;;  %v298_v48 = vld [vmem:[%s4733_s8 + $0x70] sm:$0xff]  ;;  %v311_v49 = vld [vmem:[%s4733_s8 + $0xd8] sm:$0xff] }
 0x108   : > { %2467 = vmatprep.mubr.f32.mxu0 %v605_v51  ;;  %3667 = vmatpush1.bf16.msra.mxu1 %v3666_v50  ;;  %v321_v50 = vld [vmem:[%s4733_s8 + $0x128] sm:$0xff]  ;;  %v3915_v51 = vpack.c.bf16 %v1069_v45, %v1068_v44  ;;  %v430_v44 = vld [vmem:[%s4733_s8 + $0x490] sm:$0xff]  ;;  %v443_v45 = vld [vmem:[%s4733_s8 + $0x4f8] sm:$0xff] }
 0x109   : > { %3907 = vmatpush1.bf16.msra.mxu0 %v3906_v52  ;;  %3668 = vmatprep.subr.bf16.mxu1 %v4629_v0  ;;  %v910_v52 = vld [vmem:[%s6761_s1 + $0x310] sm:$0xff] }
 0x10a   : > { %1543 = vmatmul.mubr.f32.gmra.mrb[28].mxu1 %v594_v57  ;;  %3908 = vmatprep.subr.bf16.mxu0 %v4629_v0  ;;  %v320_v57 = vld [vmem:[%s4733_s8 + $0x120] sm:$0xff] }
 0x10b   : > { %2468 = vmatmul.mubr.f32.gmra.mrb[28].mxu0 %v604_v58  ;;  %1547 = vmatprep.mubr.f32.mxu1 %v617_v59  ;;  %v333_v58 = vld [vmem:[%s4733_s8 + $0x188] sm:$0xff]  ;;  %v3678_v59 = vpack.c.bf16 %v911_v53, %v910_v52  ;;  %v1083_v52 = vld [vmem:[%s6761_s1 + $0x878] sm:$0xff]  ;;  %v442_v53 = vld [vmem:[%s4733_s8 + $0x4f0] sm:$0xff] }
 0x10c   : > { %2472 = vmatprep.mubr.f32.mxu0 %v627_v61  ;;  %3670 = vmatpush1.bf16.msra.mxu1 %v3669_v60  ;;  %v343_v60 = vld [vmem:[%s4733_s8 + $0x1d8] sm:$0xff]  ;;  %v3918_v61 = vpack.c.bf16 %v1071_v55, %v1070_v54  ;;  %v452_v54 = vld [vmem:[%s4733_s8 + $0x540] sm:$0xff]  ;;  %v465_v55 = vld [vmem:[%s4733_s8 + $0x5a8] sm:$0xff] }
 0x10d   : > { %3910 = vmatpush1.bf16.msra.mxu0 %v3909_v62  ;;  %3671 = vmatprep.subr.bf16.mxu1 %v4629_v0  ;;  %v912_v62 = vld [vmem:[%s6761_s1 + $0x320] sm:$0xff] }
 0x10e   : > { %1548 = vmatmul.mubr.f32.gmra.mrb[30].mxu1 %v616_v4  ;;  %3911 = vmatprep.subr.bf16.mxu0 %v4629_v0  ;;  %v342_v4 = vld [vmem:[%s4733_s8 + $0x1d0] sm:$0xff] }
 0x10f   : > { %2473 = vmatmul.mubr.f32.gmra.mrb[30].mxu0 %v626_v5  ;;  %1552 = vmatprep.mubr.f32.mxu1 %v639_v6  ;;  %v355_v5 = vld [vmem:[%s4733_s8 + $0x238] sm:$0xff]  ;;  %v3681_v6 = vpack.c.bf16 %v913_v63, %v912_v62  ;;  %v1085_v62 = vld [vmem:[%s6761_s1 + $0x888] sm:$0xff]  ;;  %v464_v63 = vld [vmem:[%s4733_s8 + $0x5a0] sm:$0xff] }
 0x110   : > { %2477 = vmatprep.mubr.f32.mxu0 %v649_v8  ;;  %3673 = vmatpush1.bf16.msra.mxu1 %v3672_v7  ;;  %v365_v7 = vld [vmem:[%s4733_s8 + $0x288] sm:$0xff]  ;;  %v3921_v8 = vpack.c.bf16 %v1073_v2, %v1072_v1  ;;  %v474_v1 = vld [vmem:[%s4733_s8 + $0x5f0] sm:$0xff]  ;;  %v487_v2 = vld [vmem:[%s4733_s8 + $0x658] sm:$0xff] }
 0x111   : > { %3913 = vmatpush1.bf16.msra.mxu0 %v3912_v9  ;;  %3674 = vmatprep.subr.bf16.mxu1 %v4629_v0  ;;  %v914_v9 = vld [vmem:[%s6761_s1 + $0x330] sm:$0xff] }
 0x112   : > { %1553 = vmatmul.mubr.f32.gmra.mrb[32].mxu1 %v638_v10  ;;  %3914 = vmatprep.subr.bf16.mxu0 %v4629_v0  ;;  %v915_v10 = vld [vmem:[%s6761_s1 + $0x338] sm:$0xff] }
 0x113   : > { %2478 = vmatmul.mubr.f32.gmra.mrb[32].mxu0 %v648_v11  ;;  %1557 = vmatprep.mubr.f32.mxu1 %v661_v12  ;;  %v1074_v11 = vld [vmem:[%s6761_s1 + $0x830] sm:$0xff]  ;;  %v1075_v12 = vld [vmem:[%s6761_s1 + $0x838] sm:$0xff] }
 0x114   : > { %2482 = vmatprep.mubr.f32.mxu0 %v671_v13  ;;  %v354_v13 = vld [vmem:[%s4733_s8 + $0x230] sm:$0xff] }
 0x116   : > { %1558 = vmatmul.mubr.f32.gmra.mrb[34].mxu1 %v660_v14  ;;  %v364_v14 = vld [vmem:[%s4733_s8 + $0x280] sm:$0xff] }
 0x117   : > { %2483 = vmatmul.mubr.f32.gmra.mrb[34].mxu0 %v670_v15  ;;  %1562 = vmatprep.mubr.f32.mxu1 %v683_v16  ;;  %v377_v15 = vld [vmem:[%s4733_s8 + $0x2e8] sm:$0xff]  ;;  %v3684_v16 = vpack.c.bf16 %v915_v10, %v914_v9  ;;  %v1087_v9 = vld [vmem:[%s6761_s1 + $0x898] sm:$0xff]  ;;  %v486_v10 = vld [vmem:[%s4733_s8 + $0x650] sm:$0xff] }
 0x118   : > { %2487 = vmatprep.mubr.f32.mxu0 %v693_v17  ;;  %v387_v17 = vld [vmem:[%s4733_s8 + $0x338] sm:$0xff] }
 0x11a   : > { %1563 = vmatmul.mubr.f32.gmra.mrb[36].mxu1 %v682_v18  ;;  %v3924_v18 = vpack.c.bf16 %v1075_v12, %v1074_v11  ;;  %v496_v11 = vld [vmem:[%s4733_s8 + $0x6a0] sm:$0xff]  ;;  %v509_v12 = vld [vmem:[%s4733_s8 + $0x708] sm:$0xff] }
 0x11b   : > { %2488 = vmatmul.mubr.f32.gmra.mrb[36].mxu0 %v692_v19  ;;  %1567 = vmatprep.mubr.f32.mxu1 %v705_v20  ;;  %v916_v19 = vld [vmem:[%s6761_s1 + $0x340] sm:$0xff]  ;;  %v917_v20 = vld [vmem:[%s6761_s1 + $0x348] sm:$0xff] }
 0x11c   : > { %2492 = vmatprep.mubr.f32.mxu0 %v715_v21  ;;  %v1076_v21 = vld [vmem:[%s6761_s1 + $0x840] sm:$0xff] }
 0x11e   : > { %1568 = vmatmul.mubr.f32.gmra.mrb[38].mxu1 %v704_v22  ;;  %v1077_v22 = vld [vmem:[%s6761_s1 + $0x848] sm:$0xff] }
 0x11f   : > { %2493 = vmatmul.mubr.f32.gmra.mrb[38].mxu0 %v714_v23  ;;  %1572 = vmatprep.mubr.f32.mxu1 %v727_v24  ;;  %v376_v23 = vld [vmem:[%s4733_s8 + $0x2e0] sm:$0xff]  ;;  %v386_v24 = vld [vmem:[%s4733_s8 + $0x330] sm:$0xff] }
 0x120   : > { %2497 = vmatprep.mubr.f32.mxu0 %v737_v25  ;;  %v399_v25 = vld [vmem:[%s4733_s8 + $0x398] sm:$0xff] }
 0x122   : > { %1573 = vmatmul.mubr.f32.gmra.mrb[40].mxu1 %v726_v26  ;;  %v3687_v26 = vpack.c.bf16 %v917_v20, %v916_v19  ;;  %v1089_v19 = vld [vmem:[%s6761_s1 + $0x8a8] sm:$0xff]  ;;  %v508_v20 = vld [vmem:[%s4733_s8 + $0x700] sm:$0xff] }
 0x123   : > { %2498 = vmatmul.mubr.f32.gmra.mrb[40].mxu0 %v736_v27  ;;  %1577 = vmatprep.mubr.f32.mxu1 %v749_v28  ;;  %v409_v27 = vld [vmem:[%s4733_s8 + $0x3e8] sm:$0xff]  ;;  %v3927_v28 = vpack.c.bf16 %v1077_v22, %v1076_v21  ;;  %v518_v21 = vld [vmem:[%s4733_s8 + $0x750] sm:$0xff]  ;;  %v531_v22 = vld [vmem:[%s4733_s8 + $0x7b8] sm:$0xff] }
 0x124   : > { %2502 = vmatprep.mubr.f32.mxu0 %v759_v29  ;;  %v918_v29 = vld [vmem:[%s6761_s1 + $0x350] sm:$0xff] }
 0x126   : > { %1578 = vmatmul.mubr.f32.gmra.mrb[42].mxu1 %v748_v30  ;;  %v919_v30 = vld [vmem:[%s6761_s1 + $0x358] sm:$0xff] }
 0x127   : > { %2503 = vmatmul.mubr.f32.gmra.mrb[42].mxu0 %v758_v31  ;;  %1582 = vmatprep.mubr.f32.mxu1 %v771_v32  ;;  %v1078_v31 = vld [vmem:[%s6761_s1 + $0x850] sm:$0xff]  ;;  %v1079_v32 = vld [vmem:[%s6761_s1 + $0x858] sm:$0xff] }
 0x128   : > { %2507 = vmatprep.mubr.f32.mxu0 %v781_v33  ;;  %v398_v33 = vld [vmem:[%s4733_s8 + $0x390] sm:$0xff] }
 0x12a   : > { %1583 = vmatmul.mubr.f32.gmra.mrb[44].mxu1 %v770_v34  ;;  %v408_v34 = vld [vmem:[%s4733_s8 + $0x3e0] sm:$0xff] }
 0x12b   : > { %2508 = vmatmul.mubr.f32.gmra.mrb[44].mxu0 %v780_v35  ;;  %1587 = vmatprep.mubr.f32.mxu1 %v793_v36  ;;  %v421_v35 = vld [vmem:[%s4733_s8 + $0x448] sm:$0xff]  ;;  %v3690_v36 = vpack.c.bf16 %v919_v30, %v918_v29  ;;  %v1091_v29 = vld [vmem:[%s6761_s1 + $0x8b8] sm:$0xff]  ;;  %v530_v30 = vld [vmem:[%s4733_s8 + $0x7b0] sm:$0xff] }
 0x12c   : > { %2512 = vmatprep.mubr.f32.mxu0 %v803_v37  ;;  %v431_v37 = vld [vmem:[%s4733_s8 + $0x498] sm:$0xff] }
 0x12e   : > { %1588 = vmatmul.mubr.f32.gmra.mrb[46].mxu1 %v792_v38  ;;  %v3930_v38 = vpack.c.bf16 %v1079_v32, %v1078_v31  ;;  %v540_v31 = vld [vmem:[%s4733_s8 + $0x800] sm:$0xff]  ;;  %v553_v32 = vld [vmem:[%s4733_s8 + $0x868] sm:$0xff] }
 0x12f   : > { %2513 = vmatmul.mubr.f32.gmra.mrb[46].mxu0 %v802_v39  ;;  %1657 = vmatprep.mubr.f32.mxu1 %v289_v40  ;;  %v920_v39 = vld [vmem:[%s6761_s1 + $0x360] sm:$0xff]  ;;  %v921_v40 = vld [vmem:[%s6761_s1 + $0x368] sm:$0xff] }
 0x130   : > { %2582 = vmatprep.mubr.f32.mxu0 %v299_v43  ;;  %v420_v43 = vld [vmem:[%s4733_s8 + $0x440] sm:$0xff] }
 0x132   : > { %1658 = vmatmul.mubr.f32.vlgmr.msra.gmra.mrb[0].mxu1 %v288_v46  ;;  %v3693_v46 = vpack.c.bf16 %v921_v40, %v920_v39  ;;  %v1093_v39 = vld [vmem:[%s6761_s1 + $0x8c8] sm:$0xff]  ;;  %v552_v40 = vld [vmem:[%s4733_s8 + $0x860] sm:$0xff] }
 0x133   : > { %2583 = vmatmul.mubr.f32.vlgmr.msra.gmra.mrb[0].mxu0 %v298_v48  ;;  %3676 = vmatpush1.bf16.msra.mxu1 %v3675_v47  ;;  %v453_v47 = vld [vmem:[%s4733_s8 + $0x548] sm:$0xff]  ;;  %v3933_v48 = vpack.c.bf16 %v1081_v42, %v1080_v41  ;;  %v562_v41 = vld [vmem:[%s4733_s8 + $0x8b0] sm:$0xff]  ;;  %v575_v42 = vld [vmem:[%s4733_s8 + $0x918] sm:$0xff] }
 0x134   : > { %1662 = vmatprep.mubr.f32.mxu1 %v311_v49  ;;  %2587 = vmatprep.mubr.f32.mxu0 %v321_v50  ;;  %v922_v49 = vld [vmem:[%s6761_s1 + $0x370] sm:$0xff]  ;;  %v923_v50 = vld [vmem:[%s6761_s1 + $0x378] sm:$0xff] }
 0x135   : > { %3916 = vmatpush1.bf16.msra.mxu0 %v3915_v51  ;;  %3677 = vmatprep.subr.bf16.mxu1 %v4629_v0  ;;  %v1082_v51 = vld [vmem:[%s6761_s1 + $0x870] sm:$0xff] }
 0x136   : > { %1663 = vmatmul.mubr.f32.gmra.mrb[2].mxu1 %v310_v56  ;;  %3917 = vmatprep.subr.bf16.mxu0 %v4629_v0  ;;  %v3696_v56 = vpack.c.bf16 %v923_v50, %v922_v49  ;;  %v1095_v49 = vld [vmem:[%s6761_s1 + $0x8d8] sm:$0xff]  ;;  %v574_v50 = vld [vmem:[%s4733_s8 + $0x910] sm:$0xff] }
 0x137   : > { %2588 = vmatmul.mubr.f32.gmra.mrb[2].mxu0 %v320_v57  ;;  %1667 = vmatprep.mubr.f32.mxu1 %v333_v58  ;;  %v475_v57 = vld [vmem:[%s4733_s8 + $0x5f8] sm:$0xff]  ;;  %v3936_v58 = vpack.c.bf16 %v1083_v52, %v1082_v51  ;;  %v584_v51 = vld [vmem:[%s4733_s8 + $0x960] sm:$0xff]  ;;  %v597_v52 = vld [vmem:[%s4733_s8 + $0x9c8] sm:$0xff] }
 0x138   : > { %3679 = vmatpush1.bf16.msra.mxu1 %v3678_v59  ;;  %2592 = vmatprep.mubr.f32.mxu0 %v343_v60  ;;  %v924_v59 = vld [vmem:[%s6761_s1 + $0x380] sm:$0xff]  ;;  %v925_v60 = vld [vmem:[%s6761_s1 + $0x388] sm:$0xff] }
 0x139   : > { %3919 = vmatpush1.bf16.msra.mxu0 %v3918_v61  ;;  %3680 = vmatprep.subr.bf16.mxu1 %v4629_v0  ;;  %v1084_v61 = vld [vmem:[%s6761_s1 + $0x880] sm:$0xff] }
 0x13a   : > { %1668 = vmatmul.mubr.f32.gmra.mrb[4].mxu1 %v332_v3  ;;  %3920 = vmatprep.subr.bf16.mxu0 %v4629_v0  ;;  %v3699_v3 = vpack.c.bf16 %v925_v60, %v924_v59  ;;  %v1097_v59 = vld [vmem:[%s6761_s1 + $0x8e8] sm:$0xff]  ;;  %v596_v60 = vld [vmem:[%s4733_s8 + $0x9c0] sm:$0xff] }
 0x13b   : > { %2593 = vmatmul.mubr.f32.gmra.mrb[4].mxu0 %v342_v4  ;;  %1672 = vmatprep.mubr.f32.mxu1 %v355_v5  ;;  %v497_v4 = vld [vmem:[%s4733_s8 + $0x6a8] sm:$0xff]  ;;  %v3939_v5 = vpack.c.bf16 %v1085_v62, %v1084_v61  ;;  %v606_v61 = vld [vmem:[%s4733_s8 + $0xa10] sm:$0xff]  ;;  %v619_v62 = vld [vmem:[%s4733_s8 + $0xa78] sm:$0xff] }
 0x13c   : > { %2597 = vmatprep.mubr.f32.mxu0 %v365_v7  ;;  %3682 = vmatpush1.bf16.msra.mxu1 %v3681_v6  ;;  %v926_v6 = vld [vmem:[%s6761_s1 + $0x390] sm:$0xff]  ;;  %v927_v7 = vld [vmem:[%s6761_s1 + $0x398] sm:$0xff] }
 0x13d   : > { %3922 = vmatpush1.bf16.msra.mxu0 %v3921_v8  ;;  %3683 = vmatprep.subr.bf16.mxu1 %v4629_v0  ;;  %v1086_v8 = vld [vmem:[%s6761_s1 + $0x890] sm:$0xff] }
 0x13e   : > { %1673 = vmatmul.mubr.f32.gmra.mrb[6].mxu1 %v354_v13  ;;  %3923 = vmatprep.subr.bf16.mxu0 %v4629_v0  ;;  %v3702_v13 = vpack.c.bf16 %v927_v7, %v926_v6  ;;  %v1099_v6 = vld [vmem:[%s6761_s1 + $0x8f8] sm:$0xff]  ;;  %v618_v7 = vld [vmem:[%s4733_s8 + $0xa70] sm:$0xff] }
 0x13f   : > { %2598 = vmatmul.mubr.f32.gmra.mrb[6].mxu0 %v364_v14  ;;  %1677 = vmatprep.mubr.f32.mxu1 %v377_v15  ;;  %v519_v14 = vld [vmem:[%s4733_s8 + $0x758] sm:$0xff]  ;;  %v3942_v15 = vpack.c.bf16 %v1087_v9, %v1086_v8  ;;  %v628_v8 = vld [vmem:[%s4733_s8 + $0xac0] sm:$0xff]  ;;  %v641_v9 = vld [vmem:[%s4733_s8 + $0xb28] sm:$0xff] }
 0x140   : > { %2602 = vmatprep.mubr.f32.mxu0 %v387_v17  ;;  %3685 = vmatpush1.bf16.msra.mxu1 %v3684_v16  ;;  %v928_v16 = vld [vmem:[%s6761_s1 + $0x3a0] sm:$0xff]  ;;  %v929_v17 = vld [vmem:[%s6761_s1 + $0x3a8] sm:$0xff] }
 0x141   : > { %3925 = vmatpush1.bf16.msra.mxu0 %v3924_v18  ;;  %3686 = vmatprep.subr.bf16.mxu1 %v4629_v0  ;;  %v1088_v18 = vld [vmem:[%s6761_s1 + $0x8a0] sm:$0xff] }
 0x142   : > { %1678 = vmatmul.mubr.f32.gmra.mrb[8].mxu1 %v376_v23  ;;  %3926 = vmatprep.subr.bf16.mxu0 %v4629_v0  ;;  %v3705_v23 = vpack.c.bf16 %v929_v17, %v928_v16  ;;  %v673_v16 = vld [vmem:[%s4733_s8 + $0xc28] sm:$0xff]  ;;  %v662_v17 = vld [vmem:[%s4733_s8 + $0xbd0] sm:$0xff] }
 0x143   : > { %2603 = vmatmul.mubr.f32.gmra.mrb[8].mxu0 %v386_v24  ;;  %1682 = vmatprep.mubr.f32.mxu1 %v399_v25  ;;  %v541_v24 = vld [vmem:[%s4733_s8 + $0x808] sm:$0xff]  ;;  %v3945_v25 = vpack.c.bf16 %v1089_v19, %v1088_v18  ;;  %v672_v18 = vld [vmem:[%s4733_s8 + $0xc20] sm:$0xff] }
 0x144   : > { %2607 = vmatprep.mubr.f32.mxu0 %v409_v27  ;;  %3688 = vmatpush1.bf16.msra.mxu1 %v3687_v26  ;;  %v930_v26 = vld [vmem:[%s6761_s1 + $0x3b0] sm:$0xff]  ;;  %v931_v27 = vld [vmem:[%s6761_s1 + $0x3b8] sm:$0xff]  ;;  %v685_v19 = vld [vmem:[%s4733_s8 + $0xc88] sm:$0xff] }
 0x145   : > { %3928 = vmatpush1.bf16.msra.mxu0 %v3927_v28  ;;  %3689 = vmatprep.subr.bf16.mxu1 %v4629_v0  ;;  %v1090_v28 = vld [vmem:[%s6761_s1 + $0x8b0] sm:$0xff] }
 0x146   : > { %1683 = vmatmul.mubr.f32.gmra.mrb[10].mxu1 %v398_v33  ;;  %3929 = vmatprep.subr.bf16.mxu0 %v4629_v0  ;;  %v3708_v33 = vpack.c.bf16 %v931_v27, %v930_v26  ;;  %v716_v26 = vld [vmem:[%s4733_s8 + $0xd80] sm:$0xff]  ;;  %v729_v27 = vld [vmem:[%s4733_s8 + $0xde8] sm:$0xff] }
 0x147   : > { %2608 = vmatmul.mubr.f32.gmra.mrb[10].mxu0 %v408_v34  ;;  %1687 = vmatprep.mubr.f32.mxu1 %v421_v35  ;;  %v563_v34 = vld [vmem:[%s4733_s8 + $0x8b8] sm:$0xff]  ;;  %v3948_v35 = vpack.c.bf16 %v1091_v29, %v1090_v28  ;;  %v728_v29 = vld [vmem:[%s4733_s8 + $0xde0] sm:$0xff] }
 0x148   : > { %2612 = vmatprep.mubr.f32.mxu0 %v431_v37  ;;  %3691 = vmatpush1.bf16.msra.mxu1 %v3690_v36  ;;  %v932_v36 = vld [vmem:[%s6761_s1 + $0x3c0] sm:$0xff]  ;;  %v933_v37 = vld [vmem:[%s6761_s1 + $0x3c8] sm:$0xff]  ;;  %v739_v28 = vld [vmem:[%s4733_s8 + $0xe38] sm:$0xff] }
 0x149   : > { %3931 = vmatpush1.bf16.msra.mxu0 %v3930_v38  ;;  %3692 = vmatprep.subr.bf16.mxu1 %v4629_v0  ;;  %v1092_v38 = vld [vmem:[%s6761_s1 + $0x8c0] sm:$0xff] }
 0x14a   : > { %1688 = vmatmul.mubr.f32.gmra.mrb[12].mxu1 %v420_v43  ;;  %3932 = vmatprep.subr.bf16.mxu0 %v4629_v0  ;;  %v3711_v43 = vpack.c.bf16 %v933_v37, %v932_v36  ;;  %v783_v36 = vld [vmem:[%s4733_s8 + $0xf98] sm:$0xff]  ;;  %v772_v37 = vld [vmem:[%s4733_s8 + $0xf40] sm:$0xff] }
 0x14b   : > { %2613 = vmatmul.mubr.f32.gmra.mrb[12].mxu0 %v430_v44  ;;  %1692 = vmatprep.mubr.f32.mxu1 %v443_v45  ;;  %v585_v44 = vld [vmem:[%s4733_s8 + $0x968] sm:$0xff]  ;;  %v3951_v45 = vpack.c.bf16 %v1093_v39, %v1092_v38  ;;  %v782_v38 = vld [vmem:[%s4733_s8 + $0xf90] sm:$0xff]  ;;  %v795_v39 = vld [vmem:[%s4733_s8 + $0xff8] sm:$0xff] }
 0x14c   : > { %2617 = vmatprep.mubr.f32.mxu0 %v453_v47  ;;  %3694 = vmatpush1.bf16.msra.mxu1 %v3693_v46  ;;  %v934_v46 = vld [vmem:[%s6761_s1 + $0x3d0] sm:$0xff]  ;;  %v935_v47 = vld [vmem:[%s6761_s1 + $0x3d8] sm:$0xff] }
 0x14d   : > { %3934 = vmatpush1.bf16.msra.mxu0 %v3933_v48  ;;  %3695 = vmatprep.subr.bf16.mxu1 %v4629_v0  ;;  %v1094_v48 = vld [vmem:[%s6761_s1 + $0x8d0] sm:$0xff] }
 0x14e   : > { %1693 = vmatmul.mubr.f32.gmra.mrb[14].mxu1 %v442_v53  ;;  %3935 = vmatprep.subr.bf16.mxu0 %v4629_v0  ;;  %v3714_v53 = vpack.c.bf16 %v935_v47, %v934_v46  ;;  %v301_v46 = vld [vmem:[%s4733_s8 + $0x88] sm:$0xff]  ;;  %v1100_v47 = vld [vmem:[%s6761_s1 + $0x900] sm:$0xff] }
 0x14f   : > { %2618 = vmatmul.mubr.f32.gmra.mrb[14].mxu0 %v452_v54  ;;  %1697 = vmatprep.mubr.f32.mxu1 %v465_v55  ;;  %v607_v54 = vld [vmem:[%s4733_s8 + $0xa18] sm:$0xff]  ;;  %v3954_v55 = vpack.c.bf16 %v1095_v49, %v1094_v48  ;;  %v1101_v48 = vld [vmem:[%s6761_s1 + $0x908] sm:$0xff]  ;;  %v290_v49 = vld [vmem:[%s4733_s8 + $0x30] sm:$0xff] }
 0x150   : > { %2622 = vmatprep.mubr.f32.mxu0 %v475_v57  ;;  %3697 = vmatpush1.bf16.msra.mxu1 %v3696_v56  ;;  %v936_v56 = vld [vmem:[%s6761_s1 + $0x3e0] sm:$0xff]  ;;  %v937_v57 = vld [vmem:[%s6761_s1 + $0x3e8] sm:$0xff] }
 0x151   : > { %3937 = vmatpush1.bf16.msra.mxu0 %v3936_v58  ;;  %3698 = vmatprep.subr.bf16.mxu1 %v4629_v0  ;;  %v1096_v58 = vld [vmem:[%s6761_s1 + $0x8e0] sm:$0xff] }
 0x152   : > { %1698 = vmatmul.mubr.f32.gmra.mrb[16].mxu1 %v464_v63  ;;  %3938 = vmatprep.subr.bf16.mxu0 %v4629_v0  ;;  %v3717_v63 = vpack.c.bf16 %v937_v57, %v936_v56  ;;  %v943_v56 = vld [vmem:[%s6761_s1 + $0x418] sm:$0xff]  ;;  %v1102_v57 = vld [vmem:[%s6761_s1 + $0x910] sm:$0xff] }
 0x153   : > { %2623 = vmatmul.mubr.f32.gmra.mrb[16].mxu0 %v474_v1  ;;  %1702 = vmatprep.mubr.f32.mxu1 %v487_v2  ;;  %v629_v1 = vld [vmem:[%s4733_s8 + $0xac8] sm:$0xff]  ;;  %v3957_v2 = vpack.c.bf16 %v1097_v59, %v1096_v58  ;;  %v1103_v58 = vld [vmem:[%s6761_s1 + $0x918] sm:$0xff]  ;;  %v312_v59 = vld [vmem:[%s4733_s8 + $0xe0] sm:$0xff] }
 0x154   : > { %2627 = vmatprep.mubr.f32.mxu0 %v497_v4  ;;  %3700 = vmatpush1.bf16.msra.mxu1 %v3699_v3  ;;  %v938_v3 = vld [vmem:[%s6761_s1 + $0x3f0] sm:$0xff]  ;;  %v939_v4 = vld [vmem:[%s6761_s1 + $0x3f8] sm:$0xff] }
 0x155   : > { %3940 = vmatpush1.bf16.msra.mxu0 %v3939_v5  ;;  %3701 = vmatprep.subr.bf16.mxu1 %v4629_v0  ;;  %v1098_v5 = vld [vmem:[%s6761_s1 + $0x8f0] sm:$0xff] }
 0x156   : > { %1703 = vmatmul.mubr.f32.gmra.mrb[18].mxu1 %v486_v10  ;;  %3941 = vmatprep.subr.bf16.mxu0 %v4629_v0  ;;  %v3720_v10 = vpack.c.bf16 %v939_v4, %v938_v3  ;;  %v945_v3 = vld [vmem:[%s6761_s1 + $0x428] sm:$0xff]  ;;  %v1104_v4 = vld [vmem:[%s6761_s1 + $0x920] sm:$0xff] }
 0x157   : > { %2628 = vmatmul.mubr.f32.gmra.mrb[18].mxu0 %v496_v11  ;;  %1707 = vmatprep.mubr.f32.mxu1 %v509_v12  ;;  %v651_v11 = vld [vmem:[%s4733_s8 + $0xb78] sm:$0xff]  ;;  %v3960_v12 = vpack.c.bf16 %v1099_v6, %v1098_v5  ;;  %v1105_v5 = vld [vmem:[%s6761_s1 + $0x928] sm:$0xff]  ;;  %v334_v6 = vld [vmem:[%s4733_s8 + $0x190] sm:$0xff] }
 0x158   : > { %2632 = vmatprep.mubr.f32.mxu0 %v519_v14  ;;  %3703 = vmatpush1.bf16.msra.mxu1 %v3702_v13  ;;  %v640_v13 = vld [vmem:[%s4733_s8 + $0xb20] sm:$0xff]  ;;  %v650_v14 = vld [vmem:[%s4733_s8 + $0xb70] sm:$0xff] }
 0x159   : > { %3943 = vmatpush1.bf16.msra.mxu0 %v3942_v15  ;;  %3704 = vmatprep.subr.bf16.mxu1 %v4629_v0  ;;  %v663_v15 = vld [vmem:[%s4733_s8 + $0xbd8] sm:$0xff] }
 0x15a   : > { %1708 = vmatmul.mubr.f32.gmra.mrb[20].mxu1 %v508_v20  ;;  %3944 = vmatprep.subr.bf16.mxu0 %v4629_v0  ;;  %v695_v20 = vld [vmem:[%s4733_s8 + $0xcd8] sm:$0xff] }
 0x15b   : > { %2633 = vmatmul.mubr.f32.gmra.mrb[20].mxu0 %v518_v21  ;;  %1712 = vmatprep.mubr.f32.mxu1 %v531_v22  ;;  %v684_v21 = vld [vmem:[%s4733_s8 + $0xc80] sm:$0xff]  ;;  %v694_v22 = vld [vmem:[%s4733_s8 + $0xcd0] sm:$0xff] }
 0x15c   : > { %2637 = vmatprep.mubr.f32.mxu0 %v541_v24  ;;  %3706 = vmatpush1.bf16.msra.mxu1 %v3705_v23  ;;  %v707_v23 = vld [vmem:[%s4733_s8 + $0xd38] sm:$0xff]  ;;  %v717_v24 = vld [vmem:[%s4733_s8 + $0xd88] sm:$0xff] }
 0x15d   : > { %3946 = vmatpush1.bf16.msra.mxu0 %v3945_v25  ;;  %3707 = vmatprep.subr.bf16.mxu1 %v4629_v0  ;;  %v706_v25 = vld [vmem:[%s4733_s8 + $0xd30] sm:$0xff] }
 0x15e   : > { %1713 = vmatmul.mubr.f32.gmra.mrb[22].mxu1 %v530_v30  ;;  %3947 = vmatprep.subr.bf16.mxu0 %v4629_v0  ;;  %v738_v30 = vld [vmem:[%s4733_s8 + $0xe30] sm:$0xff] }
 0x15f   : > { %2638 = vmatmul.mubr.f32.gmra.mrb[22].mxu0 %v540_v31  ;;  %1717 = vmatprep.mubr.f32.mxu1 %v553_v32  ;;  %v751_v31 = vld [vmem:[%s4733_s8 + $0xe98] sm:$0xff]  ;;  %v761_v32 = vld [vmem:[%s4733_s8 + $0xee8] sm:$0xff] }
 0x160   : > { %2642 = vmatprep.mubr.f32.mxu0 %v563_v34  ;;  %3709 = vmatpush1.bf16.msra.mxu1 %v3708_v33  ;;  %v750_v33 = vld [vmem:[%s4733_s8 + $0xe90] sm:$0xff]  ;;  %v760_v34 = vld [vmem:[%s4733_s8 + $0xee0] sm:$0xff] }
 0x161   : > { %3949 = vmatpush1.bf16.msra.mxu0 %v3948_v35  ;;  %3710 = vmatprep.subr.bf16.mxu1 %v4629_v0  ;;  %v773_v35 = vld [vmem:[%s4733_s8 + $0xf48] sm:$0xff] }
 0x162   : > { %1718 = vmatmul.mubr.f32.gmra.mrb[24].mxu1 %v552_v40  ;;  %3950 = vmatprep.subr.bf16.mxu0 %v4629_v0  ;;  %v805_v40 = vld [vmem:[%s4733_s8 + $0x1048] sm:$0xff] }
 0x163   : > { %2643 = vmatmul.mubr.f32.gmra.mrb[24].mxu0 %v562_v41  ;;  %1722 = vmatprep.mubr.f32.mxu1 %v575_v42  ;;  %v794_v41 = vld [vmem:[%s4733_s8 + $0xff0] sm:$0xff]  ;;  %v804_v42 = vld [vmem:[%s4733_s8 + $0x1040] sm:$0xff] }
 0x164   : > { %2647 = vmatprep.mubr.f32.mxu0 %v585_v44  ;;  %3712 = vmatpush1.bf16.msra.mxu1 %v3711_v43  ;;  %v291_v43 = vld [vmem:[%s4733_s8 + $0x38] sm:$0xff]  ;;  %v940_v44 = vld [vmem:[%s6761_s1 + $0x400] sm:$0xff] }
 0x165   : > { %3952 = vmatpush1.bf16.msra.mxu0 %v3951_v45  ;;  %3713 = vmatprep.subr.bf16.mxu1 %v4629_v0  ;;  %v941_v45 = vld [vmem:[%s6761_s1 + $0x408] sm:$0xff] }
 0x166   : > { %1723 = vmatmul.mubr.f32.gmra.mrb[26].mxu1 %v574_v50  ;;  %3953 = vmatprep.subr.bf16.mxu0 %v4629_v0  ;;  %v3723_v50 = vpack.c.bf16 %v941_v45, %v940_v44  ;;  %v1112_v44 = vld [vmem:[%s6761_s1 + $0x960] sm:$0xff]  ;;  %v1113_v45 = vld [vmem:[%s6761_s1 + $0x968] sm:$0xff] }
 0x167   : > { %2648 = vmatmul.mubr.f32.gmra.mrb[26].mxu0 %v584_v51  ;;  %1727 = vmatprep.mubr.f32.mxu1 %v597_v52  ;;  %v300_v51 = vld [vmem:[%s4733_s8 + $0x80] sm:$0xff]  ;;  %v313_v52 = vld [vmem:[%s4733_s8 + $0xe8] sm:$0xff] }
 0x168   : > { %2652 = vmatprep.mubr.f32.mxu0 %v607_v54  ;;  %3715 = vmatpush1.bf16.msra.mxu1 %v3714_v53  ;;  %v323_v53 = vld [vmem:[%s4733_s8 + $0x138] sm:$0xff]  ;;  %v5943_v54 = vpack.c.bf16 %v1101_v48, %v1100_v47  ;;  %v432_v47 = vld [vmem:[%s4733_s8 + $0x4a0] sm:$0xff]  ;;  %v445_v48 = vld [vmem:[%s4733_s8 + $0x508] sm:$0xff] }
 0x169   : > { %3955 = vmatpush1.bf16.msra.mxu0 %v3954_v55  ;;  %3716 = vmatprep.subr.bf16.mxu1 %v4629_v0  ;;  %v942_v55 = vld [vmem:[%s6761_s1 + $0x410] sm:$0xff] }
 0x16a   : > { %1728 = vmatmul.mubr.f32.gmra.mrb[28].mxu1 %v596_v60  ;;  %3956 = vmatprep.subr.bf16.mxu0 %v4629_v0  ;;  %v322_v60 = vld [vmem:[%s4733_s8 + $0x130] sm:$0xff] }
 0x16b   : > { %2653 = vmatmul.mubr.f32.gmra.mrb[28].mxu0 %v606_v61  ;;  %1732 = vmatprep.mubr.f32.mxu1 %v619_v62  ;;  %v335_v61 = vld [vmem:[%s4733_s8 + $0x198] sm:$0xff]  ;;  %v3726_v62 = vpack.c.bf16 %v943_v56, %v942_v55  ;;  %v1114_v55 = vld [vmem:[%s6761_s1 + $0x970] sm:$0xff] }
 0x16c   : > { %2657 = vmatprep.mubr.f32.mxu0 %v629_v1  ;;  %3718 = vmatpush1.bf16.msra.mxu1 %v3717_v63  ;;  %v345_v63 = vld [vmem:[%s4733_s8 + $0x1e8] sm:$0xff]  ;;  %v5963_v1 = vpack.c.bf16 %v1103_v58, %v1102_v57  ;;  %v1115_v56 = vld [vmem:[%s6761_s1 + $0x978] sm:$0xff]  ;;  %v444_v57 = vld [vmem:[%s4733_s8 + $0x500] sm:$0xff] }
 0x16d   : > { %3958 = vmatpush1.bf16.msra.mxu0 %v3957_v2  ;;  %3719 = vmatprep.subr.bf16.mxu1 %v4629_v0  ;;  %v944_v2 = vld [vmem:[%s6761_s1 + $0x420] sm:$0xff]  ;;  %v454_v58 = vld [vmem:[%s4733_s8 + $0x550] sm:$0xff] }
 0x16e   : > { %1733 = vmatmul.mubr.f32.gmra.mrb[30].mxu1 %v618_v7  ;;  %3959 = vmatprep.subr.bf16.mxu0 %v4629_v0  ;;  %v344_v7 = vld [vmem:[%s4733_s8 + $0x1e0] sm:$0xff] }
 0x16f   : > { %2658 = vmatmul.mubr.f32.gmra.mrb[30].mxu0 %v628_v8  ;;  %1737 = vmatprep.mubr.f32.mxu1 %v641_v9  ;;  %v357_v8 = vld [vmem:[%s4733_s8 + $0x248] sm:$0xff]  ;;  %v3729_v9 = vpack.c.bf16 %v945_v3, %v944_v2  ;;  %v1116_v3 = vld [vmem:[%s6761_s1 + $0x980] sm:$0xff] }
 0x170   : > { %2662 = vmatprep.mubr.f32.mxu0 %v651_v11  ;;  %3721 = vmatpush1.bf16.msra.mxu1 %v3720_v10  ;;  %v367_v10 = vld [vmem:[%s4733_s8 + $0x298] sm:$0xff]  ;;  %v5984_v11 = vpack.c.bf16 %v1105_v5, %v1104_v4  ;;  %v957_v2 = vld [vmem:[%s6761_s1 + $0x488] sm:$0xff]  ;;  %v466_v5 = vld [vmem:[%s4733_s8 + $0x5b0] sm:$0xff] }
 0x171   : > { %3961 = vmatpush1.bf16.msra.mxu0 %v3960_v12  ;;  %3722 = vmatprep.subr.bf16.mxu1 %v4629_v0  ;;  %v946_v12 = vld [vmem:[%s6761_s1 + $0x430] sm:$0xff]  ;;  %v1117_v4 = vld [vmem:[%s6761_s1 + $0x988] sm:$0xff] }
 0x172   : > { %1738 = vmatmul.mubr.f32.gmra.mrb[32].mxu1 %v640_v13  ;;  %3962 = vmatprep.subr.bf16.mxu0 %v4629_v0  ;;  %v947_v13 = vld [vmem:[%s6761_s1 + $0x438] sm:$0xff] }
 0x173   : > { %2663 = vmatmul.mubr.f32.gmra.mrb[32].mxu0 %v650_v14  ;;  %1742 = vmatprep.mubr.f32.mxu1 %v663_v15  ;;  %v1106_v14 = vld [vmem:[%s6761_s1 + $0x930] sm:$0xff]  ;;  %v1107_v15 = vld [vmem:[%s6761_s1 + $0x938] sm:$0xff] }
 0x174   : > { %2667 = vmatprep.mubr.f32.mxu0 %v673_v16  ;;  %v356_v16 = vld [vmem:[%s4733_s8 + $0x240] sm:$0xff] }
 0x176   : > { %1743 = vmatmul.mubr.f32.gmra.mrb[34].mxu1 %v662_v17  ;;  %v366_v17 = vld [vmem:[%s4733_s8 + $0x290] sm:$0xff] }
 0x177   : > { %2668 = vmatmul.mubr.f32.gmra.mrb[34].mxu0 %v672_v18  ;;  %1747 = vmatprep.mubr.f32.mxu1 %v685_v19  ;;  %v379_v18 = vld [vmem:[%s4733_s8 + $0x2f8] sm:$0xff]  ;;  %v3732_v19 = vpack.c.bf16 %v947_v13, %v946_v12  ;;  %v958_v12 = vld [vmem:[%s6761_s1 + $0x490] sm:$0xff] }
 0x178   : > { %2672 = vmatprep.mubr.f32.mxu0 %v695_v20  ;;  %v389_v20 = vld [vmem:[%s4733_s8 + $0x348] sm:$0xff]  ;;  %v959_v13 = vld [vmem:[%s6761_s1 + $0x498] sm:$0xff] }
 0x17a   : > { %1748 = vmatmul.mubr.f32.gmra.mrb[36].mxu1 %v684_v21  ;;  %v6005_v21 = vpack.c.bf16 %v1107_v15, %v1106_v14  ;;  %v1118_v14 = vld [vmem:[%s6761_s1 + $0x990] sm:$0xff]  ;;  %v1119_v15 = vld [vmem:[%s6761_s1 + $0x998] sm:$0xff] }
 0x17b   : > { %2673 = vmatmul.mubr.f32.gmra.mrb[36].mxu0 %v694_v22  ;;  %1752 = vmatprep.mubr.f32.mxu1 %v707_v23  ;;  %v948_v22 = vld [vmem:[%s6761_s1 + $0x440] sm:$0xff]  ;;  %v949_v23 = vld [vmem:[%s6761_s1 + $0x448] sm:$0xff] }
 0x17c   : > { %2677 = vmatprep.mubr.f32.mxu0 %v717_v24  ;;  %v1108_v24 = vld [vmem:[%s6761_s1 + $0x940] sm:$0xff] }
 0x17e   : > { %1753 = vmatmul.mubr.f32.gmra.mrb[38].mxu1 %v706_v25  ;;  %v1109_v25 = vld [vmem:[%s6761_s1 + $0x948] sm:$0xff] }
 0x17f   : > { %2678 = vmatmul.mubr.f32.gmra.mrb[38].mxu0 %v716_v26  ;;  %1757 = vmatprep.mubr.f32.mxu1 %v729_v27  ;;  %v378_v26 = vld [vmem:[%s4733_s8 + $0x2f0] sm:$0xff]  ;;  %v388_v27 = vld [vmem:[%s4733_s8 + $0x340] sm:$0xff] }
 0x180   : > { %2682 = vmatprep.mubr.f32.mxu0 %v739_v28  ;;  %v401_v28 = vld [vmem:[%s4733_s8 + $0x3a8] sm:$0xff] }
 0x182   : > { %1758 = vmatmul.mubr.f32.gmra.mrb[40].mxu1 %v728_v29  ;;  %v3735_v29 = vpack.c.bf16 %v949_v23, %v948_v22  ;;  %v6131_v22 = vpack.c.bf16 %v1119_v15, %v1118_v14  ;;  %v960_v23 = vld [vmem:[%s6761_s1 + $0x4a0] sm:$0xff]  ;;  %v621_v14 = vld [vmem:[%s4733_s8 + $0xa88] sm:$0xff] }
 0x183   : > { %2683 = vmatmul.mubr.f32.gmra.mrb[40].mxu0 %v738_v30  ;;  %1762 = vmatprep.mubr.f32.mxu1 %v751_v31  ;;  %v411_v30 = vld [vmem:[%s4733_s8 + $0x3f8] sm:$0xff]  ;;  %v6026_v31 = vpack.c.bf16 %v1109_v25, %v1108_v24  ;;  %v961_v24 = vld [vmem:[%s6761_s1 + $0x4a8] sm:$0xff]  ;;  %v1120_v25 = vld [vmem:[%s6761_s1 + $0x9a0] sm:$0xff] }
 0x184   : > { %2687 = vmatprep.mubr.f32.mxu0 %v761_v32  ;;  %v950_v32 = vld [vmem:[%s6761_s1 + $0x450] sm:$0xff] }
 0x186   : > { %1763 = vmatmul.mubr.f32.gmra.mrb[42].mxu1 %v750_v33  ;;  %v951_v33 = vld [vmem:[%s6761_s1 + $0x458] sm:$0xff] }
 0x187   : > { %2688 = vmatmul.mubr.f32.gmra.mrb[42].mxu0 %v760_v34  ;;  %1767 = vmatprep.mubr.f32.mxu1 %v773_v35  ;;  %v1110_v34 = vld [vmem:[%s6761_s1 + $0x950] sm:$0xff]  ;;  %v1111_v35 = vld [vmem:[%s6761_s1 + $0x958] sm:$0xff] }
 0x188   : > { %2692 = vmatprep.mubr.f32.mxu0 %v783_v36  ;;  %v400_v36 = vld [vmem:[%s4733_s8 + $0x3a0] sm:$0xff] }
 0x18a   : > { %1768 = vmatmul.mubr.f32.gmra.mrb[44].mxu1 %v772_v37  ;;  %v410_v37 = vld [vmem:[%s4733_s8 + $0x3f0] sm:$0xff] }
 0x18b   : > { %2693 = vmatmul.mubr.f32.gmra.mrb[44].mxu0 %v782_v38  ;;  %1772 = vmatprep.mubr.f32.mxu1 %v795_v39  ;;  %v423_v38 = vld [vmem:[%s4733_s8 + $0x458] sm:$0xff]  ;;  %v3738_v39 = vpack.c.bf16 %v951_v33, %v950_v32 }
 0x18c   : > { %2697 = vmatprep.mubr.f32.mxu0 %v805_v40  ;;  %v433_v40 = vld [vmem:[%s4733_s8 + $0x4a8] sm:$0xff]  ;;  %v543_v32 = vld [vmem:[%s4733_s8 + $0x818] sm:$0xff] }
 0x18e   : > { %1773 = vmatmul.mubr.f32.gmra.mrb[46].mxu1 %v794_v41  ;;  %v6047_v41 = vpack.c.bf16 %v1111_v35, %v1110_v34  ;;  %v962_v34 = vld [vmem:[%s6761_s1 + $0x4b0] sm:$0xff]  ;;  %v963_v35 = vld [vmem:[%s6761_s1 + $0x4b8] sm:$0xff] }
 0x18f   : > { %2698 = vmatmul.mubr.f32.gmra.mrb[46].mxu0 %v804_v42  ;;  %1842 = vmatprep.mubr.f32.mxu1 %v291_v43  ;;  %v952_v42 = vld [vmem:[%s6761_s1 + $0x460] sm:$0xff]  ;;  %v953_v43 = vld [vmem:[%s6761_s1 + $0x468] sm:$0xff] }
 0x190   : > { %2767 = vmatprep.mubr.f32.mxu0 %v301_v46  ;;  %v422_v46 = vld [vmem:[%s4733_s8 + $0x450] sm:$0xff] }
 0x192   : > { %1843 = vmatmul.mubr.f32.vlgmr.msra.gmra.mrb[0].mxu1 %v290_v49  ;;  %v3741_v49 = vpack.c.bf16 %v953_v43, %v952_v42  ;;  %v3756_v42 = vpack.c.bf16 %v963_v35, %v962_v34  ;;  %v565_v43 = vld [vmem:[%s4733_s8 + $0x8c8] sm:$0xff]  ;;  %v675_v35 = vld [vmem:[%s4733_s8 + $0xc38] sm:$0xff] }
 0x193   : > { %2768 = vmatmul.mubr.f32.vlgmr.msra.gmra.mrb[0].mxu0 %v300_v51  ;;  %3724 = vmatpush1.bf16.msra.mxu1 %v3723_v50  ;;  %v455_v50 = vld [vmem:[%s4733_s8 + $0x558] sm:$0xff]  ;;  %v6068_v51 = vpack.c.bf16 %v1113_v45, %v1112_v44  ;;  %v964_v45 = vld [vmem:[%s6761_s1 + $0x4c0] sm:$0xff]  ;;  %v665_v34 = vld [vmem:[%s4733_s8 + $0xbe8] sm:$0xff] }
 0x194   : > { %1847 = vmatprep.mubr.f32.mxu1 %v313_v52  ;;  %2772 = vmatprep.mubr.f32.mxu0 %v323_v53  ;;  %v954_v52 = vld [vmem:[%s6761_s1 + $0x470] sm:$0xff]  ;;  %v955_v53 = vld [vmem:[%s6761_s1 + $0x478] sm:$0xff] }
 0x195   : > { %3964 = vmatpush1.bf16.msra.mxu0 %v5943_v54  ;;  %3725 = vmatprep.subr.bf16.mxu1 %v4629_v0 }
 0x196   : > { %1848 = vmatmul.mubr.f32.gmra.mrb[2].mxu1 %v312_v59  ;;  %3965 = vmatprep.subr.bf16.mxu0 %v4629_v0  ;;  %v467_v59 = vld [vmem:[%s4733_s8 + $0x5b8] sm:$0xff] }
 0x197   : > { %2773 = vmatmul.mubr.f32.gmra.mrb[2].mxu0 %v322_v60  ;;  %1852 = vmatprep.mubr.f32.mxu1 %v335_v61  ;;  %v3744_v60 = vpack.c.bf16 %v955_v53, %v954_v52  ;;  %v477_v61 = vld [vmem:[%s4733_s8 + $0x608] sm:$0xff] }
 0x198   : > { %3727 = vmatpush1.bf16.msra.mxu1 %v3726_v62  ;;  %2777 = vmatprep.mubr.f32.mxu0 %v345_v63  ;;  %v6089_v62 = vpack.c.bf16 %v1115_v56, %v1114_v55  ;;  %v956_v63 = vld [vmem:[%s6761_s1 + $0x480] sm:$0xff]  ;;  %v577_v52 = vld [vmem:[%s4733_s8 + $0x928] sm:$0xff]  ;;  %v587_v55 = vld [vmem:[%s4733_s8 + $0x978] sm:$0xff] }
 0x199   : > { %3967 = vmatpush1.bf16.msra.mxu0 %v5963_v1  ;;  %3728 = vmatprep.subr.bf16.mxu1 %v4629_v0 }
 0x19a   : > { %1853 = vmatmul.mubr.f32.gmra.mrb[4].mxu1 %v334_v6  ;;  %3968 = vmatprep.subr.bf16.mxu0 %v4629_v0  ;;  %v476_v6 = vld [vmem:[%s4733_s8 + $0x600] sm:$0xff] }
 0x19b   : > { %2778 = vmatmul.mubr.f32.gmra.mrb[4].mxu0 %v344_v7  ;;  %1857 = vmatprep.mubr.f32.mxu1 %v357_v8  ;;  %v489_v7 = vld [vmem:[%s4733_s8 + $0x668] sm:$0xff]  ;;  %v3747_v8 = vpack.c.bf16 %v957_v2, %v956_v63  ;;  %v586_v63 = vld [vmem:[%s4733_s8 + $0x970] sm:$0xff]  ;;  %v599_v2 = vld [vmem:[%s4733_s8 + $0x9d8] sm:$0xff] }
 0x19c   : > { %2782 = vmatprep.mubr.f32.mxu0 %v367_v10  ;;  %3730 = vmatpush1.bf16.msra.mxu1 %v3729_v9  ;;  %v499_v9 = vld [vmem:[%s4733_s8 + $0x6b8] sm:$0xff]  ;;  %v6110_v10 = vpack.c.bf16 %v1117_v4, %v1116_v3  ;;  %v609_v4 = vld [vmem:[%s4733_s8 + $0xa28] sm:$0xff] }
 0x19d   : > { %3970 = vmatpush1.bf16.msra.mxu0 %v5984_v11  ;;  %3731 = vmatprep.subr.bf16.mxu1 %v4629_v0 }
 0x19e   : > { %1858 = vmatmul.mubr.f32.gmra.mrb[6].mxu1 %v356_v16  ;;  %3971 = vmatprep.subr.bf16.mxu0 %v4629_v0  ;;  %v488_v16 = vld [vmem:[%s4733_s8 + $0x660] sm:$0xff] }
 0x19f   : > { %2783 = vmatmul.mubr.f32.gmra.mrb[6].mxu0 %v366_v17  ;;  %1862 = vmatprep.mubr.f32.mxu1 %v379_v18  ;;  %v498_v17 = vld [vmem:[%s4733_s8 + $0x6b0] sm:$0xff]  ;;  %v511_v18 = vld [vmem:[%s4733_s8 + $0x718] sm:$0xff] }
 0x1a0   : > { %2787 = vmatprep.mubr.f32.mxu0 %v389_v20  ;;  %3733 = vmatpush1.bf16.msra.mxu1 %v3732_v19  ;;  %v3750_v19 = vpack.c.bf16 %v959_v13, %v958_v12  ;;  %v521_v20 = vld [vmem:[%s4733_s8 + $0x768] sm:$0xff]  ;;  %v598_v12 = vld [vmem:[%s4733_s8 + $0x9d0] sm:$0xff]  ;;  %v608_v13 = vld [vmem:[%s4733_s8 + $0xa20] sm:$0xff] }
 0x1a1   : > { %3973 = vmatpush1.bf16.msra.mxu0 %v6005_v21  ;;  %3734 = vmatprep.subr.bf16.mxu1 %v4629_v0 }
 0x1a2   : > { %1863 = vmatmul.mubr.f32.gmra.mrb[8].mxu1 %v378_v26  ;;  %3974 = vmatprep.subr.bf16.mxu0 %v4629_v0  ;;  %v1121_v26 = vld [vmem:[%s6761_s1 + $0x9a8] sm:$0xff] }
 0x1a3   : > { %2788 = vmatmul.mubr.f32.gmra.mrb[8].mxu0 %v388_v27  ;;  %1867 = vmatprep.mubr.f32.mxu1 %v401_v28  ;;  %v510_v27 = vld [vmem:[%s4733_s8 + $0x710] sm:$0xff]  ;;  %v520_v28 = vld [vmem:[%s4733_s8 + $0x760] sm:$0xff]  ;;  %v6152_v33 = vpack.c.bf16 %v1121_v26, %v1120_v25  ;;  %v643_v26 = vld [vmem:[%s4733_s8 + $0xb38] sm:$0xff] }
 0x1a4   : > { %2792 = vmatprep.mubr.f32.mxu0 %v411_v30  ;;  %3736 = vmatpush1.bf16.msra.mxu1 %v3735_v29  ;;  %v533_v29 = vld [vmem:[%s4733_s8 + $0x7c8] sm:$0xff]  ;;  %v3753_v30 = vpack.c.bf16 %v961_v24, %v960_v23  ;;  %v1131_v23 = vld [vmem:[%s6761_s1 + $0x9f8] sm:$0xff]  ;;  %v620_v24 = vld [vmem:[%s4733_s8 + $0xa80] sm:$0xff] }
 0x1a5   : > { %3976 = vmatpush1.bf16.msra.mxu0 %v6026_v31  ;;  %3737 = vmatprep.subr.bf16.mxu1 %v4629_v0  ;;  %v630_v25 = vld [vmem:[%s4733_s8 + $0xad0] sm:$0xff] }
 0x1a6   : > { %1868 = vmatmul.mubr.f32.gmra.mrb[10].mxu1 %v400_v36  ;;  %3977 = vmatprep.subr.bf16.mxu0 %v4629_v0  ;;  %v1122_v36 = vld [vmem:[%s6761_s1 + $0x9b0] sm:$0xff] }
 0x1a7   : > { %2793 = vmatmul.mubr.f32.gmra.mrb[10].mxu0 %v410_v37  ;;  %1872 = vmatprep.mubr.f32.mxu1 %v423_v38  ;;  %v1123_v37 = vld [vmem:[%s6761_s1 + $0x9b8] sm:$0xff]  ;;  %v532_v38 = vld [vmem:[%s4733_s8 + $0x7c0] sm:$0xff] }
 0x1a8   : > { %2797 = vmatprep.mubr.f32.mxu0 %v433_v40  ;;  %3739 = vmatpush1.bf16.msra.mxu1 %v3738_v39  ;;  %v542_v39 = vld [vmem:[%s4733_s8 + $0x810] sm:$0xff]  ;;  %v555_v40 = vld [vmem:[%s4733_s8 + $0x878] sm:$0xff]  ;;  %v6173_v44 = vpack.c.bf16 %v1123_v37, %v1122_v36  ;;  %v664_v36 = vld [vmem:[%s4733_s8 + $0xbe0] sm:$0xff] }
 0x1a9   : > { %3979 = vmatpush1.bf16.msra.mxu0 %v6047_v41  ;;  %3740 = vmatprep.subr.bf16.mxu1 %v4629_v0  ;;  %v674_v37 = vld [vmem:[%s4733_s8 + $0xc30] sm:$0xff] }
 0x1aa   : > { %1873 = vmatmul.mubr.f32.gmra.mrb[12].mxu1 %v422_v46  ;;  %3980 = vmatprep.subr.bf16.mxu0 %v4629_v0  ;;  %v965_v46 = vld [vmem:[%s6761_s1 + $0x4c8] sm:$0xff] }
 0x1ab   : > { %2798 = vmatmul.mubr.f32.gmra.mrb[12].mxu0 %v432_v47  ;;  %1877 = vmatprep.mubr.f32.mxu1 %v445_v48  ;;  %v1124_v47 = vld [vmem:[%s6761_s1 + $0x9c0] sm:$0xff]  ;;  %v1125_v48 = vld [vmem:[%s6761_s1 + $0x9c8] sm:$0xff]  ;;  %v3759_v53 = vpack.c.bf16 %v965_v46, %v964_v45  ;;  %v719_v45 = vld [vmem:[%s4733_s8 + $0xd98] sm:$0xff] }
 0x1ac   : > { %2802 = vmatprep.mubr.f32.mxu0 %v455_v50  ;;  %3742 = vmatpush1.bf16.msra.mxu1 %v3741_v49  ;;  %v554_v49 = vld [vmem:[%s4733_s8 + $0x870] sm:$0xff]  ;;  %v564_v50 = vld [vmem:[%s4733_s8 + $0x8c0] sm:$0xff]  ;;  %v6194_v56 = vpack.c.bf16 %v1125_v48, %v1124_v47  ;;  %v731_v48 = vld [vmem:[%s4733_s8 + $0xdf8] sm:$0xff] }
 0x1ad   : > { %3982 = vmatpush1.bf16.msra.mxu0 %v6068_v51  ;;  %3743 = vmatprep.subr.bf16.mxu1 %v4629_v0  ;;  %v708_v46 = vld [vmem:[%s4733_s8 + $0xd40] sm:$0xff]  ;;  %v718_v47 = vld [vmem:[%s4733_s8 + $0xd90] sm:$0xff] }
 0x1ae   : > { %1878 = vmatmul.mubr.f32.gmra.mrb[14].mxu1 %v444_v57  ;;  %3983 = vmatprep.subr.bf16.mxu0 %v4629_v0  ;;  %v966_v57 = vld [vmem:[%s6761_s1 + $0x4d0] sm:$0xff] }
 0x1af   : > { %2803 = vmatmul.mubr.f32.gmra.mrb[14].mxu0 %v454_v58  ;;  %1882 = vmatprep.mubr.f32.mxu1 %v467_v59  ;;  %v967_v58 = vld [vmem:[%s6761_s1 + $0x4d8] sm:$0xff]  ;;  %v1126_v59 = vld [vmem:[%s6761_s1 + $0x9d0] sm:$0xff] }
 0x1b0   : > { %2807 = vmatprep.mubr.f32.mxu0 %v477_v61  ;;  %3745 = vmatpush1.bf16.msra.mxu1 %v3744_v60  ;;  %v1127_v60 = vld [vmem:[%s6761_s1 + $0x9d8] sm:$0xff]  ;;  %v576_v61 = vld [vmem:[%s4733_s8 + $0x920] sm:$0xff]  ;;  %v3762_v3 = vpack.c.bf16 %v967_v58, %v966_v57  ;;  %v762_v58 = vld [vmem:[%s4733_s8 + $0xef0] sm:$0xff] }
 0x1b1   : > { %3985 = vmatpush1.bf16.msra.mxu0 %v6089_v62  ;;  %3746 = vmatprep.subr.bf16.mxu1 %v4629_v0  ;;  %v752_v57 = vld [vmem:[%s4733_s8 + $0xea0] sm:$0xff] }
 0x1b2   : > { %1883 = vmatmul.mubr.f32.gmra.mrb[16].mxu1 %v466_v5  ;;  %3986 = vmatprep.subr.bf16.mxu0 %v4629_v0  ;;  %v6215_v5 = vpack.c.bf16 %v1127_v60, %v1126_v59  ;;  %v775_v59 = vld [vmem:[%s4733_s8 + $0xf58] sm:$0xff]  ;;  %v785_v60 = vld [vmem:[%s4733_s8 + $0xfa8] sm:$0xff] }
 0x1b3   : > { %2808 = vmatmul.mubr.f32.gmra.mrb[16].mxu0 %v476_v6  ;;  %1887 = vmatprep.mubr.f32.mxu1 %v489_v7  ;;  %v968_v6 = vld [vmem:[%s6761_s1 + $0x4e0] sm:$0xff]  ;;  %v969_v7 = vld [vmem:[%s6761_s1 + $0x4e8] sm:$0xff] }
 0x1b4   : > { %2812 = vmatprep.mubr.f32.mxu0 %v499_v9  ;;  %3748 = vmatpush1.bf16.msra.mxu1 %v3747_v8  ;;  %v1128_v8 = vld [vmem:[%s6761_s1 + $0x9e0] sm:$0xff]  ;;  %v1129_v9 = vld [vmem:[%s6761_s1 + $0x9e8] sm:$0xff]  ;;  %v3765_v15 = vpack.c.bf16 %v969_v7, %v968_v6  ;;  %v806_v6 = vld [vmem:[%s4733_s8 + $0x1050] sm:$0xff] }
 0x1b5   : > { %3988 = vmatpush1.bf16.msra.mxu0 %v6110_v10  ;;  %3749 = vmatprep.subr.bf16.mxu1 %v4629_v0  ;;  %v293_v7 = vld [vmem:[%s4733_s8 + $0x48] sm:$0xff] }
 0x1b6   : > { %1888 = vmatmul.mubr.f32.gmra.mrb[18].mxu1 %v488_v16  ;;  %3989 = vmatprep.subr.bf16.mxu0 %v4629_v0  ;;  %v631_v16 = vld [vmem:[%s4733_s8 + $0xad8] sm:$0xff] }
 0x1b7   : > { %2813 = vmatmul.mubr.f32.gmra.mrb[18].mxu0 %v498_v17  ;;  %1892 = vmatprep.mubr.f32.mxu1 %v511_v18  ;;  %v6236_v17 = vpack.c.bf16 %v1129_v9, %v1128_v8  ;;  %v970_v18 = vld [vmem:[%s6761_s1 + $0x4f0] sm:$0xff]  ;;  %v303_v8 = vld [vmem:[%s4733_s8 + $0x98] sm:$0xff]  ;;  %v1132_v9 = vld [vmem:[%s6761_s1 + $0xa00] sm:$0xff] }
 0x1b8   : > { %2817 = vmatprep.mubr.f32.mxu0 %v521_v20  ;;  %3751 = vmatpush1.bf16.msra.mxu1 %v3750_v19  ;;  %v971_v19 = vld [vmem:[%s6761_s1 + $0x4f8] sm:$0xff]  ;;  %v1130_v20 = vld [vmem:[%s6761_s1 + $0x9f0] sm:$0xff] }
 0x1b9   : > { %3991 = vmatpush1.bf16.msra.mxu0 %v6131_v22  ;;  %3752 = vmatprep.subr.bf16.mxu1 %v4629_v0 }
 0x1ba   : > { %1893 = vmatmul.mubr.f32.gmra.mrb[20].mxu1 %v510_v27  ;;  %3992 = vmatprep.subr.bf16.mxu0 %v4629_v0  ;;  %v3768_v27 = vpack.c.bf16 %v971_v19, %v970_v18  ;;  %v1134_v19 = vld [vmem:[%s6761_s1 + $0xa10] sm:$0xff] }
 0x1bb   : > { %2818 = vmatmul.mubr.f32.gmra.mrb[20].mxu0 %v520_v28  ;;  %1897 = vmatprep.mubr.f32.mxu1 %v533_v29  ;;  %v653_v28 = vld [vmem:[%s4733_s8 + $0xb88] sm:$0xff]  ;;  %v6257_v29 = vpack.c.bf16 %v1131_v23, %v1130_v20  ;;  %v1135_v20 = vld [vmem:[%s6761_s1 + $0xa18] sm:$0xff]  ;;  %v314_v23 = vld [vmem:[%s4733_s8 + $0xf0] sm:$0xff] }
 0x1bc   : > { %2822 = vmatprep.mubr.f32.mxu0 %v543_v32  ;;  %3754 = vmatpush1.bf16.msra.mxu1 %v3753_v30  ;;  %v642_v30 = vld [vmem:[%s4733_s8 + $0xb30] sm:$0xff]  ;;  %v652_v32 = vld [vmem:[%s4733_s8 + $0xb80] sm:$0xff] }
 0x1bd   : > { %3994 = vmatpush1.bf16.msra.mxu0 %v6152_v33  ;;  %3755 = vmatprep.subr.bf16.mxu1 %v4629_v0 }
 0x1be   : > { %1898 = vmatmul.mubr.f32.gmra.mrb[22].mxu1 %v532_v38  ;;  %3995 = vmatprep.subr.bf16.mxu0 %v4629_v0  ;;  %v687_v38 = vld [vmem:[%s4733_s8 + $0xc98] sm:$0xff] }
 0x1bf   : > { %2823 = vmatmul.mubr.f32.gmra.mrb[22].mxu0 %v542_v39  ;;  %1902 = vmatprep.mubr.f32.mxu1 %v555_v40  ;;  %v697_v39 = vld [vmem:[%s4733_s8 + $0xce8] sm:$0xff]  ;;  %v686_v40 = vld [vmem:[%s4733_s8 + $0xc90] sm:$0xff] }
 0x1c0   : > { %2827 = vmatprep.mubr.f32.mxu0 %v565_v43  ;;  %3757 = vmatpush1.bf16.msra.mxu1 %v3756_v42  ;;  %v696_v42 = vld [vmem:[%s4733_s8 + $0xce0] sm:$0xff]  ;;  %v709_v43 = vld [vmem:[%s4733_s8 + $0xd48] sm:$0xff] }
 0x1c1   : > { %3997 = vmatpush1.bf16.msra.mxu0 %v6173_v44  ;;  %3758 = vmatprep.subr.bf16.mxu1 %v4629_v0 }
 0x1c2   : > { %1903 = vmatmul.mubr.f32.gmra.mrb[24].mxu1 %v554_v49  ;;  %3998 = vmatprep.subr.bf16.mxu0 %v4629_v0  ;;  %v741_v49 = vld [vmem:[%s4733_s8 + $0xe48] sm:$0xff] }
 0x1c3   : > { %2828 = vmatmul.mubr.f32.gmra.mrb[24].mxu0 %v564_v50  ;;  %1907 = vmatprep.mubr.f32.mxu1 %v577_v52  ;;  %v730_v50 = vld [vmem:[%s4733_s8 + $0xdf0] sm:$0xff]  ;;  %v740_v52 = vld [vmem:[%s4733_s8 + $0xe40] sm:$0xff] }
 0x1c4   : > { %2832 = vmatprep.mubr.f32.mxu0 %v587_v55  ;;  %3760 = vmatpush1.bf16.msra.mxu1 %v3759_v53  ;;  %v753_v53 = vld [vmem:[%s4733_s8 + $0xea8] sm:$0xff]  ;;  %v763_v55 = vld [vmem:[%s4733_s8 + $0xef8] sm:$0xff] }
 0x1c5   : > { %4000 = vmatpush1.bf16.msra.mxu0 %v6194_v56  ;;  %3761 = vmatprep.subr.bf16.mxu1 %v4629_v0 }
 0x1c6   : > { %1908 = vmatmul.mubr.f32.gmra.mrb[26].mxu1 %v576_v61  ;;  %4001 = vmatprep.subr.bf16.mxu0 %v4629_v0  ;;  %v774_v61 = vld [vmem:[%s4733_s8 + $0xf50] sm:$0xff] }
 0x1c7   : > { %2833 = vmatmul.mubr.f32.gmra.mrb[26].mxu0 %v586_v63  ;;  %1912 = vmatprep.mubr.f32.mxu1 %v599_v2  ;;  %v784_v63 = vld [vmem:[%s4733_s8 + $0xfa0] sm:$0xff]  ;;  %v797_v2 = vld [vmem:[%s4733_s8 + $0x1008] sm:$0xff] }
 0x1c8   : > { %2837 = vmatprep.mubr.f32.mxu0 %v609_v4  ;;  %3763 = vmatpush1.bf16.msra.mxu1 %v3762_v3  ;;  %v807_v3 = vld [vmem:[%s4733_s8 + $0x1058] sm:$0xff]  ;;  %v796_v4 = vld [vmem:[%s4733_s8 + $0x1000] sm:$0xff] }
 0x1c9   : > { %4003 = vmatpush1.bf16.msra.mxu0 %v6215_v5  ;;  %3764 = vmatprep.subr.bf16.mxu1 %v4629_v0 }
 0x1ca   : > { %1913 = vmatmul.mubr.f32.gmra.mrb[28].mxu1 %v598_v12  ;;  %4004 = vmatprep.subr.bf16.mxu0 %v4629_v0  ;;  %v1133_v12 = vld [vmem:[%s6761_s1 + $0xa08] sm:$0xff] }
 0x1cb   : > { %2838 = vmatmul.mubr.f32.gmra.mrb[28].mxu0 %v608_v13  ;;  %1917 = vmatprep.mubr.f32.mxu1 %v621_v14  ;;  %v292_v13 = vld [vmem:[%s4733_s8 + $0x40] sm:$0xff]  ;;  %v302_v14 = vld [vmem:[%s4733_s8 + $0x90] sm:$0xff]  ;;  %v4011_v18 = vpack.c.bf16 %v1133_v12, %v1132_v9  ;;  %v469_v9 = vld [vmem:[%s4733_s8 + $0x5c8] sm:$0xff] }
 0x1cc   : > { %2842 = vmatprep.mubr.f32.mxu0 %v631_v16  ;;  %3766 = vmatpush1.bf16.msra.mxu1 %v3765_v15  ;;  %v315_v15 = vld [vmem:[%s4733_s8 + $0xf8] sm:$0xff]  ;;  %v325_v16 = vld [vmem:[%s4733_s8 + $0x148] sm:$0xff] }
 0x1cd   : > { %4006 = vmatpush1.bf16.msra.mxu0 %v6236_v17  ;;  %3767 = vmatprep.subr.bf16.mxu1 %v4629_v0  ;;  %v479_v12 = vld [vmem:[%s4733_s8 + $0x618] sm:$0xff] }
 0x1ce   : > { %1918 = vmatmul.mubr.f32.gmra.mrb[30].mxu1 %v620_v24  ;;  %4007 = vmatprep.subr.bf16.mxu0 %v4629_v0  ;;  %v324_v24 = vld [vmem:[%s4733_s8 + $0x140] sm:$0xff] }
 0x1cf   : > { %2843 = vmatmul.mubr.f32.gmra.mrb[30].mxu0 %v630_v25  ;;  %1922 = vmatprep.mubr.f32.mxu1 %v643_v26  ;;  %v337_v25 = vld [vmem:[%s4733_s8 + $0x1a8] sm:$0xff]  ;;  %v347_v26 = vld [vmem:[%s4733_s8 + $0x1f8] sm:$0xff] }
 0x1d0   : > { %2847 = vmatprep.mubr.f32.mxu0 %v653_v28  ;;  %3769 = vmatpush1.bf16.msra.mxu1 %v3768_v27  ;;  %v4014_v27 = vpack.c.bf16 %v1135_v20, %v1134_v19  ;;  %v1137_v28 = vld [vmem:[%s6761_s1 + $0xa28] sm:$0xff] }
 0x1d1   : > { %4009 = vmatpush1.bf16.msra.mxu0 %v6257_v29  ;;  %4037 = vmatprep.subr.bf16.mxu1 %v4629_v0  ;;  %v501_v19 = vld [vmem:[%s4733_s8 + $0x6c8] sm:$0xff] }
 0x1d2   : > { %1923 = vmatmul.mubr.f32.gmra.mrb[32].mxu1 %v642_v30  ;;  %4010 = vmatprep.subr.bf16.mxu0 %v4629_v0  ;;  %v336_v30 = vld [vmem:[%s4733_s8 + $0x1a0] sm:$0xff] }
 0x1d3   : > { %2848 = vmatmul.mubr.f32.gmra.mrb[32].mxu0 %v652_v32  ;;  %1927 = vmatprep.mubr.f32.mxu1 %v665_v34  ;;  %v346_v32 = vld [vmem:[%s4733_s8 + $0x1f0] sm:$0xff]  ;;  %v359_v34 = vld [vmem:[%s4733_s8 + $0x258] sm:$0xff] }
 0x1d4   : > { %2852 = vmatprep.mubr.f32.mxu0 %v675_v35  ;;  %v369_v35 = vld [vmem:[%s4733_s8 + $0x2a8] sm:$0xff] }
 0x1d6   : > { %1928 = vmatmul.mubr.f32.gmra.mrb[34].mxu1 %v664_v36 }
 0x1d7   : > { %2853 = vmatmul.mubr.f32.gmra.mrb[34].mxu0 %v674_v37  ;;  %1932 = vmatprep.mubr.f32.mxu1 %v687_v38  ;;  %v1138_v37 = vld [vmem:[%s6761_s1 + $0xa30] sm:$0xff] }
 0x1d8   : > { %2857 = vmatprep.mubr.f32.mxu0 %v697_v39  ;;  %v358_v38 = vld [vmem:[%s4733_s8 + $0x250] sm:$0xff]  ;;  %v368_v39 = vld [vmem:[%s4733_s8 + $0x2a0] sm:$0xff] }
 0x1da   : > { %1933 = vmatmul.mubr.f32.gmra.mrb[36].mxu1 %v686_v40  ;;  %v381_v40 = vld [vmem:[%s4733_s8 + $0x308] sm:$0xff] }
 0x1db   : > { %2858 = vmatmul.mubr.f32.gmra.mrb[36].mxu0 %v696_v42  ;;  %1937 = vmatprep.mubr.f32.mxu1 %v709_v43  ;;  %v391_v42 = vld [vmem:[%s4733_s8 + $0x358] sm:$0xff] }
 0x1dc   : > { %2862 = vmatprep.mubr.f32.mxu0 %v719_v45  ;;  %v1140_v45 = vld [vmem:[%s6761_s1 + $0xa40] sm:$0xff] }
 0x1de   : > { %1938 = vmatmul.mubr.f32.gmra.mrb[38].mxu1 %v708_v46  ;;  %v1141_v46 = vld [vmem:[%s6761_s1 + $0xa48] sm:$0xff] }
 0x1df   : > { %2863 = vmatmul.mubr.f32.gmra.mrb[38].mxu0 %v718_v47  ;;  %1942 = vmatprep.mubr.f32.mxu1 %v731_v48  ;;  %v390_v47 = vld [vmem:[%s4733_s8 + $0x350] sm:$0xff]  ;;  %v403_v48 = vld [vmem:[%s4733_s8 + $0x3b8] sm:$0xff] }
 0x1e0   : > { %2867 = vmatprep.mubr.f32.mxu0 %v741_v49  ;;  %v413_v49 = vld [vmem:[%s4733_s8 + $0x408] sm:$0xff] }
 0x1e2   : > { %1943 = vmatmul.mubr.f32.gmra.mrb[40].mxu1 %v730_v50  ;;  %v4023_v50 = vpack.c.bf16 %v1141_v46, %v1140_v45  ;;  %v370_v45 = vld [vmem:[%s4733_s8 + $0x2b0] sm:$0xff]  ;;  %v645_v46 = vld [vmem:[%s4733_s8 + $0xb48] sm:$0xff] }
 0x1e3   : > { %2868 = vmatmul.mubr.f32.gmra.mrb[40].mxu0 %v740_v52  ;;  %1947 = vmatprep.mubr.f32.mxu1 %v753_v53  ;;  %v1142_v52 = vld [vmem:[%s6761_s1 + $0xa50] sm:$0xff]  ;;  %v1143_v53 = vld [vmem:[%s6761_s1 + $0xa58] sm:$0xff] }
 0x1e4   : > { %2872 = vmatprep.mubr.f32.mxu0 %v763_v55  ;;  %v412_v55 = vld [vmem:[%s4733_s8 + $0x400] sm:$0xff] }
 0x1e6   : > { %1948 = vmatmul.mubr.f32.gmra.mrb[42].mxu1 %v752_v57  ;;  %v425_v57 = vld [vmem:[%s4733_s8 + $0x468] sm:$0xff] }
 0x1e7   : > { %2873 = vmatmul.mubr.f32.gmra.mrb[42].mxu0 %v762_v58  ;;  %1952 = vmatprep.mubr.f32.mxu1 %v775_v59  ;;  %v435_v58 = vld [vmem:[%s4733_s8 + $0x4b8] sm:$0xff]  ;;  %v4026_v59 = vpack.c.bf16 %v1143_v53, %v1142_v52  ;;  %v437_v52 = vld [vmem:[%s4733_s8 + $0x4c8] sm:$0xff]  ;;  %v436_v53 = vld [vmem:[%s4733_s8 + $0x4c0] sm:$0xff] }
 0x1e8   : > { %2877 = vmatprep.mubr.f32.mxu0 %v785_v60  ;;  %v1144_v60 = vld [vmem:[%s6761_s1 + $0xa60] sm:$0xff] }
 0x1ea   : > { %1953 = vmatmul.mubr.f32.gmra.mrb[44].mxu1 %v774_v61  ;;  %v1145_v61 = vld [vmem:[%s6761_s1 + $0xa68] sm:$0xff] }
 0x1eb   : > { %2878 = vmatmul.mubr.f32.gmra.mrb[44].mxu0 %v784_v63  ;;  %1957 = vmatprep.mubr.f32.mxu1 %v797_v2  ;;  %v434_v63 = vld [vmem:[%s4733_s8 + $0x4b0] sm:$0xff]  ;;  %v447_v2 = vld [vmem:[%s4733_s8 + $0x518] sm:$0xff] }
 0x1ec   : > { %2882 = vmatprep.mubr.f32.mxu0 %v807_v3  ;;  %v457_v3 = vld [vmem:[%s4733_s8 + $0x568] sm:$0xff] }
 0x1ee   : > { %1958 = vmatmul.mubr.f32.gmra.mrb[46].mxu1 %v796_v4  ;;  %v4029_v4 = vpack.c.bf16 %v1145_v61, %v1144_v60  ;;  %v481_v60 = vld [vmem:[%s4733_s8 + $0x628] sm:$0xff]  ;;  %v732_v61 = vld [vmem:[%s4733_s8 + $0xe00] sm:$0xff] }
 0x1ef   : > { %2883 = vmatmul.mubr.f32.gmra.mrb[46].mxu0 %v806_v6  ;;  %2027 = vmatprep.mubr.f32.mxu1 %v293_v7  ;;  %v1146_v6 = vld [vmem:[%s6761_s1 + $0xa70] sm:$0xff]  ;;  %v1147_v7 = vld [vmem:[%s6761_s1 + $0xa78] sm:$0xff] }
 0x1f0   : > { %2952 = vmatprep.mubr.f32.mxu0 %v303_v8  ;;  %v456_v8 = vld [vmem:[%s4733_s8 + $0x560] sm:$0xff] }
 0x1f2   : > { %2028 = vmatmul.mubr.f32.vlgmr.msra.gmra.mrb[0].mxu1 %v292_v13  ;;  %v4032_v13 = vpack.c.bf16 %v1147_v7, %v1146_v6  ;;  %v777_v6 = vld [vmem:[%s4733_s8 + $0xf68] sm:$0xff] }
 0x1f3   : > { %2953 = vmatmul.mubr.f32.vlgmr.msra.gmra.mrb[0].mxu0 %v302_v14  ;;  %4053 = vmatpush1.bf16.msra.mxu1 %v5943_v54  ;;  %v1136_v54 = vld [vmem:[%s6761_s1 + $0xa20] sm:$0xff]  ;;  %v525_v7 = vld [vmem:[%s4733_s8 + $0x788] sm:$0xff] }
 0x1f4   : > { %2032 = vmatprep.mubr.f32.mxu1 %v315_v15  ;;  %2957 = vmatprep.mubr.f32.mxu0 %v325_v16  ;;  %v4017_v36 = vpack.c.bf16 %v1137_v28, %v1136_v54  ;;  %v1148_v14 = vld [vmem:[%s6761_s1 + $0xa80] sm:$0xff]  ;;  %v1149_v15 = vld [vmem:[%s6761_s1 + $0xa88] sm:$0xff]  ;;  %v478_v16 = vld [vmem:[%s4733_s8 + $0x610] sm:$0xff] }
 0x1f5   : > { %4012 = vmatpush1.bf16.msra.mxu0 %v4011_v18  ;;  %4038 = vmatprep.subr.bf16.mxu1 %v4629_v0  ;;  %v491_v18 = vld [vmem:[%s4733_s8 + $0x678] sm:$0xff]  ;;  %v4035_v20 = vpack.c.bf16 %v1149_v15, %v1148_v14  ;;  %v545_v28 = vld [vmem:[%s4733_s8 + $0x828] sm:$0xff]  ;;  %v546_v14 = vld [vmem:[%s4733_s8 + $0x830] sm:$0xff] }
 0x1f6   : > { %2033 = vmatmul.mubr.f32.gmra.mrb[2].mxu1 %v314_v23  ;;  %4013 = vmatprep.subr.bf16.mxu0 %v4629_v0  ;;  %v490_v23 = vld [vmem:[%s4733_s8 + $0x670] sm:$0xff]  ;;  %v535_v54 = vld [vmem:[%s4733_s8 + $0x7d8] sm:$0xff] }
 0x1f7   : > { %2958 = vmatmul.mubr.f32.gmra.mrb[2].mxu0 %v324_v24  ;;  %2037 = vmatprep.mubr.f32.mxu1 %v337_v25  ;;  %v500_v24 = vld [vmem:[%s4733_s8 + $0x6c0] sm:$0xff]  ;;  %v513_v25 = vld [vmem:[%s4733_s8 + $0x728] sm:$0xff]  ;;  %v567_v15 = vld [vmem:[%s4733_s8 + $0x8d8] sm:$0xff] }
 0x1f8   : > { %4054 = vmatpush1.bf16.msra.mxu1 %v5963_v1  ;;  %2962 = vmatprep.mubr.f32.mxu0 %v347_v26  ;;  %v1139_v1 = vld [vmem:[%s6761_s1 + $0xa38] sm:$0xff]  ;;  %v512_v26 = vld [vmem:[%s4733_s8 + $0x720] sm:$0xff] }
 0x1f9   : > { %4015 = vmatpush1.bf16.msra.mxu0 %v4014_v27  ;;  %4039 = vmatprep.subr.bf16.mxu1 %v4629_v0  ;;  %v4020_v43 = vpack.c.bf16 %v1139_v1, %v1138_v37  ;;  %v522_v27 = vld [vmem:[%s4733_s8 + $0x770] sm:$0xff] }
 0x1fa   : > { %2038 = vmatmul.mubr.f32.gmra.mrb[4].mxu1 %v336_v30  ;;  %4016 = vmatprep.subr.bf16.mxu0 %v4629_v0  ;;  %v544_v30 = vld [vmem:[%s4733_s8 + $0x820] sm:$0xff]  ;;  %v578_v37 = vld [vmem:[%s4733_s8 + $0x930] sm:$0xff] }
 0x1fb   : > { %2963 = vmatmul.mubr.f32.gmra.mrb[4].mxu0 %v346_v32  ;;  %2042 = vmatprep.mubr.f32.mxu1 %v359_v34  ;;  %v557_v32 = vld [vmem:[%s4733_s8 + $0x888] sm:$0xff]  ;;  %v326_v1 = vld [vmem:[%s4733_s8 + $0x150] sm:$0xff] }
 0x1fc   : > { %2967 = vmatprep.mubr.f32.mxu0 %v369_v35  ;;  %4055 = vmatpush1.bf16.msra.mxu1 %v5984_v11  ;;  %v380_v11 = vld [vmem:[%s4733_s8 + $0x300] sm:$0xff]  ;;  %v305_v34 = vld [vmem:[%s4733_s8 + $0xa8] sm:$0xff] }
 0x1fd   : > { %4018 = vmatpush1.bf16.msra.mxu0 %v4017_v36  ;;  %4040 = vmatprep.subr.bf16.mxu1 %v4629_v0  ;;  %v304_v35 = vld [vmem:[%s4733_s8 + $0xa0] sm:$0xff]  ;;  %v579_v36 = vld [vmem:[%s4733_s8 + $0x938] sm:$0xff] }
 0x1fe   : > { %2043 = vmatmul.mubr.f32.gmra.mrb[6].mxu1 %v358_v38  ;;  %4019 = vmatprep.subr.bf16.mxu0 %v4629_v0  ;;  %v601_v38 = vld [vmem:[%s4733_s8 + $0x9e8] sm:$0xff] }
 0x1ff   : > { %2968 = vmatmul.mubr.f32.gmra.mrb[6].mxu0 %v368_v39  ;;  %2047 = vmatprep.mubr.f32.mxu1 %v381_v40  ;;  %v349_v39 = vld [vmem:[%s4733_s8 + $0x208] sm:$0xff]  ;;  %v348_v40 = vld [vmem:[%s4733_s8 + $0x200] sm:$0xff] }
 0x200   : > { %2972 = vmatprep.mubr.f32.mxu0 %v391_v42  ;;  %4056 = vmatpush1.bf16.msra.mxu1 %v6005_v21  ;;  %v402_v21 = vld [vmem:[%s4733_s8 + $0x3b0] sm:$0xff]  ;;  %v623_v42 = vld [vmem:[%s4733_s8 + $0xa98] sm:$0xff] }
 0x201   : > { %4021 = vmatpush1.bf16.msra.mxu0 %v4020_v43  ;;  %4041 = vmatprep.subr.bf16.mxu1 %v4629_v0  ;;  %v371_v43 = vld [vmem:[%s4733_s8 + $0x2b8] sm:$0xff] }
 0x202   : > { %2048 = vmatmul.mubr.f32.gmra.mrb[8].mxu1 %v380_v11  ;;  %4022 = vmatprep.subr.bf16.mxu0 %v4629_v0  ;;  %v393_v11 = vld [vmem:[%s4733_s8 + $0x368] sm:$0xff] }
 0x203   : > { %2973 = vmatmul.mubr.f32.gmra.mrb[8].mxu0 %v390_v47  ;;  %2052 = vmatprep.mubr.f32.mxu1 %v403_v48  ;;  %v392_v47 = vld [vmem:[%s4733_s8 + $0x360] sm:$0xff]  ;;  %v667_v48 = vld [vmem:[%s4733_s8 + $0xbf8] sm:$0xff] }
 0x204   : > { %2977 = vmatprep.mubr.f32.mxu0 %v413_v49  ;;  %4057 = vmatpush1.bf16.msra.mxu1 %v6026_v31  ;;  %v424_v31 = vld [vmem:[%s4733_s8 + $0x460] sm:$0xff]  ;;  %v414_v49 = vld [vmem:[%s4733_s8 + $0x410] sm:$0xff] }
 0x205   : > { %4024 = vmatpush1.bf16.msra.mxu0 %v4023_v50  ;;  %4042 = vmatprep.subr.bf16.mxu1 %v4629_v0  ;;  %v689_v50 = vld [vmem:[%s4733_s8 + $0xca8] sm:$0xff] }
 0x206   : > { %2053 = vmatmul.mubr.f32.gmra.mrb[10].mxu1 %v402_v21  ;;  %4025 = vmatprep.subr.bf16.mxu0 %v4629_v0  ;;  %v711_v21 = vld [vmem:[%s4733_s8 + $0xd58] sm:$0xff] }
 0x207   : > { %2978 = vmatmul.mubr.f32.gmra.mrb[10].mxu0 %v412_v55  ;;  %2057 = vmatprep.mubr.f32.mxu1 %v425_v57  ;;  %v459_v55 = vld [vmem:[%s4733_s8 + $0x578] sm:$0xff]  ;;  %v710_v57 = vld [vmem:[%s4733_s8 + $0xd50] sm:$0xff] }
 0x208   : > { %2982 = vmatprep.mubr.f32.mxu0 %v435_v58  ;;  %4058 = vmatpush1.bf16.msra.mxu1 %v6047_v41  ;;  %v446_v41 = vld [vmem:[%s4733_s8 + $0x510] sm:$0xff] }
 0x209   : > { %4027 = vmatpush1.bf16.msra.mxu0 %v4026_v59  ;;  %4043 = vmatprep.subr.bf16.mxu1 %v4629_v0  ;;  %v458_v58 = vld [vmem:[%s4733_s8 + $0x570] sm:$0xff]  ;;  %v733_v59 = vld [vmem:[%s4733_s8 + $0xe08] sm:$0xff] }
 0x20a   : > { %2058 = vmatmul.mubr.f32.gmra.mrb[12].mxu1 %v424_v31  ;;  %4028 = vmatprep.subr.bf16.mxu0 %v4629_v0  ;;  %v480_v31 = vld [vmem:[%s4733_s8 + $0x620] sm:$0xff] }
 0x20b   : > { %2983 = vmatmul.mubr.f32.gmra.mrb[12].mxu0 %v434_v63  ;;  %2062 = vmatprep.mubr.f32.mxu1 %v447_v2  ;;  %v755_v63 = vld [vmem:[%s4733_s8 + $0xeb8] sm:$0xff] }
 0x20c   : > { %2987 = vmatprep.mubr.f32.mxu0 %v457_v3  ;;  %4059 = vmatpush1.bf16.msra.mxu1 %v6068_v51  ;;  %v468_v51 = vld [vmem:[%s4733_s8 + $0x5c0] sm:$0xff]  ;;  %v503_v2 = vld [vmem:[%s4733_s8 + $0x6d8] sm:$0xff]  ;;  %v754_v3 = vld [vmem:[%s4733_s8 + $0xeb0] sm:$0xff] }
 0x20d   : > { %4030 = vmatpush1.bf16.msra.mxu0 %v4029_v4  ;;  %4044 = vmatprep.subr.bf16.mxu1 %v4629_v0  ;;  %v502_v4 = vld [vmem:[%s4733_s8 + $0x6d0] sm:$0xff] }
 0x20e   : > { %2063 = vmatmul.mubr.f32.gmra.mrb[14].mxu1 %v446_v41  ;;  %4031 = vmatprep.subr.bf16.mxu0 %v4629_v0  ;;  %v776_v41 = vld [vmem:[%s4733_s8 + $0xf60] sm:$0xff] }
 0x20f   : > { %2988 = vmatmul.mubr.f32.gmra.mrb[14].mxu0 %v456_v8  ;;  %2067 = vmatprep.mubr.f32.mxu1 %v469_v9  ;;  %v524_v8 = vld [vmem:[%s4733_s8 + $0x780] sm:$0xff]  ;;  %v799_v9 = vld [vmem:[%s4733_s8 + $0x1018] sm:$0xff] }
 0x210   : > { %2992 = vmatprep.mubr.f32.mxu0 %v479_v12  ;;  %4060 = vmatpush1.bf16.msra.mxu1 %v6089_v62  ;;  %v523_v62 = vld [vmem:[%s4733_s8 + $0x778] sm:$0xff] }
 0x211   : > { %4033 = vmatpush1.bf16.msra.mxu0 %v4032_v13  ;;  %4045 = vmatprep.subr.bf16.mxu1 %v4629_v0  ;;  %v547_v12 = vld [vmem:[%s4733_s8 + $0x838] sm:$0xff]  ;;  %v798_v13 = vld [vmem:[%s4733_s8 + $0x1010] sm:$0xff] }
 0x212   : > { %2068 = vmatmul.mubr.f32.gmra.mrb[16].mxu1 %v468_v51  ;;  %4034 = vmatprep.subr.bf16.mxu0 %v4629_v0  ;;  %v569_v51 = vld [vmem:[%s4733_s8 + $0x8e8] sm:$0xff] }
 0x213   : > { %2993 = vmatmul.mubr.f32.gmra.mrb[16].mxu0 %v478_v16  ;;  %2072 = vmatprep.mubr.f32.mxu1 %v491_v18  ;;  %v566_v16 = vld [vmem:[%s4733_s8 + $0x8d0] sm:$0xff]  ;;  %v568_v18 = vld [vmem:[%s4733_s8 + $0x8e0] sm:$0xff] }
 0x214   : > { %2997 = vmatprep.mubr.f32.mxu0 %v501_v19  ;;  %4061 = vmatpush1.bf16.msra.mxu1 %v6110_v10  ;;  %v534_v10 = vld [vmem:[%s4733_s8 + $0x7d0] sm:$0xff]  ;;  %v589_v19 = vld [vmem:[%s4733_s8 + $0x988] sm:$0xff] }
 0x215   : > { %4036 = vmatpush1.bf16.msra.mxu0 %v4035_v20  ;;  %4046 = vmatprep.subr.bf16.mxu1 %v4629_v0  ;;  %v591_v20 = vld [vmem:[%s4733_s8 + $0x998] sm:$0xff] }
 0x216   : > { %2073 = vmatmul.mubr.f32.gmra.mrb[18].mxu1 %v490_v23  ;;  %v588_v23 = vld [vmem:[%s4733_s8 + $0x980] sm:$0xff] }
 0x217   : > { %2998 = vmatmul.mubr.f32.gmra.mrb[18].mxu0 %v500_v24  ;;  %2077 = vmatprep.mubr.f32.mxu1 %v513_v25  ;;  %v590_v24 = vld [vmem:[%s4733_s8 + $0x990] sm:$0xff]  ;;  %v611_v25 = vld [vmem:[%s4733_s8 + $0xa38] sm:$0xff] }
 0x218   : > { %3002 = vmatprep.mubr.f32.mxu0 %v523_v62  ;;  %4062 = vmatpush1.bf16.msra.mxu1 %v6131_v22  ;;  %v556_v22 = vld [vmem:[%s4733_s8 + $0x880] sm:$0xff]  ;;  %v613_v62 = vld [vmem:[%s4733_s8 + $0xa48] sm:$0xff] }
 0x219   : > { %4047 = vmatprep.subr.bf16.mxu1 %v4629_v0 }
 0x21a   : > { %2078 = vmatmul.mubr.f32.gmra.mrb[20].mxu1 %v512_v26  ;;  %v610_v26 = vld [vmem:[%s4733_s8 + $0xa30] sm:$0xff] }
 0x21b   : > { %3003 = vmatmul.mubr.f32.gmra.mrb[20].mxu0 %v522_v27  ;;  %2082 = vmatprep.mubr.f32.mxu1 %v535_v54  ;;  %v612_v27 = vld [vmem:[%s4733_s8 + $0xa40] sm:$0xff]  ;;  %v633_v54 = vld [vmem:[%s4733_s8 + $0xae8] sm:$0xff] }
 0x21c   : > { %3007 = vmatprep.mubr.f32.mxu0 %v545_v28  ;;  %4063 = vmatpush1.bf16.msra.mxu1 %v6152_v33  ;;  %v327_v33 = vld [vmem:[%s4733_s8 + $0x158] sm:$0xff] }
 0x21d   : > { %4048 = vmatprep.subr.bf16.mxu1 %v4629_v0  ;;  %v635_v28 = vld [vmem:[%s4733_s8 + $0xaf8] sm:$0xff] }
 0x21e   : > { %2083 = vmatmul.mubr.f32.gmra.mrb[22].mxu1 %v534_v10  ;;  %v632_v10 = vld [vmem:[%s4733_s8 + $0xae0] sm:$0xff] }
 0x21f   : > { %3008 = vmatmul.mubr.f32.gmra.mrb[22].mxu0 %v544_v30  ;;  %2087 = vmatprep.mubr.f32.mxu1 %v557_v32  ;;  %v634_v30 = vld [vmem:[%s4733_s8 + $0xaf0] sm:$0xff]  ;;  %v655_v32 = vld [vmem:[%s4733_s8 + $0xb98] sm:$0xff] }
 0x220   : > { %3500 = vmatprep.mubr.msk.f32.mxu0 %vm1150_vm0, %v305_v34  ;;  %4064 = vmatpush1.bf16.msra.mxu1 %v6173_v44  ;;  %v600_v44 = vld [vmem:[%s4733_s8 + $0x9e0] sm:$0xff]  ;;  %v657_v34 = vld [vmem:[%s4733_s8 + $0xba8] sm:$0xff] }
 0x221   : > { %4049 = vmatprep.subr.bf16.mxu1 %v4629_v0 }
 0x222   : > { %2088 = vmatmul.mubr.f32.gmra.mrb[24].mxu1 %v556_v22  ;;  %v654_v22 = vld [vmem:[%s4733_s8 + $0xb90] sm:$0xff] }
 0x223   : > { %3138 = vmatmul.mubr.f32.vlgmr.msra.gmra.mrb[0].mxu0 %v304_v35  ;;  %2092 = vmatprep.mubr.f32.mxu1 %v579_v36  ;;  %v656_v35 = vld [vmem:[%s4733_s8 + $0xba0] sm:$0xff]  ;;  %v677_v36 = vld [vmem:[%s4733_s8 + $0xc48] sm:$0xff] }
 0x224   : > { %3501 = vmatprep.mubr.msk.f32.mxu0 %vm1150_vm0, %v327_v33  ;;  %4065 = vmatpush1.bf16.msra.mxu1 %v6194_v56  ;;  %v622_v56 = vld [vmem:[%s4733_s8 + $0xa90] sm:$0xff]  ;;  %v679_v33 = vld [vmem:[%s4733_s8 + $0xc58] sm:$0xff] }
 0x225   : > { %4050 = vmatprep.subr.bf16.mxu1 %v4629_v0 }
 0x226   : > { %2093 = vmatmul.mubr.f32.gmra.mrb[26].mxu1 %v578_v37  ;;  %v676_v37 = vld [vmem:[%s4733_s8 + $0xc40] sm:$0xff] }
 0x227   : > { %3143 = vmatmul.mubr.f32.gmra.mrb[2].mxu0 %v326_v1  ;;  %2097 = vmatprep.mubr.f32.mxu1 %v601_v38  ;;  %v678_v1 = vld [vmem:[%s4733_s8 + $0xc50] sm:$0xff]  ;;  %v699_v38 = vld [vmem:[%s4733_s8 + $0xcf8] sm:$0xff] }
 0x228   : > { %3502 = vmatprep.mubr.msk.f32.mxu0 %vm1150_vm0, %v349_v39  ;;  %4066 = vmatpush1.bf16.msra.mxu1 %v6215_v5  ;;  %v644_v5 = vld [vmem:[%s4733_s8 + $0xb40] sm:$0xff]  ;;  %v701_v39 = vld [vmem:[%s4733_s8 + $0xd08] sm:$0xff] }
 0x229   : > { %4051 = vmatprep.subr.bf16.mxu1 %v4629_v0 }
 0x22a   : > { %2098 = vmatmul.mubr.f32.gmra.mrb[28].mxu1 %v600_v44  ;;  %v698_v44 = vld [vmem:[%s4733_s8 + $0xcf0] sm:$0xff] }
 0x22b   : > { %3148 = vmatmul.mubr.f32.gmra.mrb[4].mxu0 %v348_v40  ;;  %2102 = vmatprep.mubr.f32.mxu1 %v623_v42  ;;  %v700_v40 = vld [vmem:[%s4733_s8 + $0xd00] sm:$0xff]  ;;  %v721_v42 = vld [vmem:[%s4733_s8 + $0xda8] sm:$0xff] }
 0x22c   : > { %3503 = vmatprep.mubr.msk.f32.mxu0 %vm1150_vm0, %v371_v43  ;;  %4067 = vmatpush1.bf16.msra.mxu1 %v6236_v17  ;;  %v415_v17 = vld [vmem:[%s4733_s8 + $0x418] sm:$0xff] }
 0x22d   : > { %4052 = vmatprep.subr.bf16.mxu1 %v4629_v0  ;;  %v666_v0 = vld [vmem:[%s4733_s8 + $0xbf0] sm:$0xff]  ;;  %v723_v43 = vld [vmem:[%s4733_s8 + $0xdb8] sm:$0xff] }
 0x22e   : > { %2103 = vmatmul.mubr.f32.gmra.mrb[30].mxu1 %v622_v56  ;;  %v720_v56 = vld [vmem:[%s4733_s8 + $0xda0] sm:$0xff] }
 0x22f   : > { %3153 = vmatmul.mubr.f32.gmra.mrb[6].mxu0 %v370_v45  ;;  %2107 = vmatprep.mubr.f32.mxu1 %v645_v46  ;;  %v722_v45 = vld [vmem:[%s4733_s8 + $0xdb0] sm:$0xff]  ;;  %v743_v46 = vld [vmem:[%s4733_s8 + $0xe58] sm:$0xff] }
 0x230   : > { %3504 = vmatprep.mubr.msk.f32.mxu0 %vm1150_vm0, %v393_v11  ;;  %4068 = vmatpush1.bf16.msra.mxu1 %v6257_v29  ;;  %v688_v29 = vld [vmem:[%s4733_s8 + $0xca0] sm:$0xff]  ;;  %v745_v11 = vld [vmem:[%s4733_s8 + $0xe68] sm:$0xff] }
 0x232   : > { %2108 = vmatmul.mubr.f32.gmra.mrb[32].mxu1 %v644_v5  ;;  %v742_v5 = vld [vmem:[%s4733_s8 + $0xe50] sm:$0xff] }
 0x233   : > { %3158 = vmatmul.mubr.f32.gmra.mrb[8].mxu0 %v392_v47  ;;  %2112 = vmatprep.mubr.f32.mxu1 %v667_v48  ;;  %v744_v47 = vld [vmem:[%s4733_s8 + $0xe60] sm:$0xff]  ;;  %v765_v48 = vld [vmem:[%s4733_s8 + $0xf08] sm:$0xff] }
 0x234   : > { %3505 = vmatprep.mubr.msk.f32.mxu0 %vm1150_vm0, %v415_v17  ;;  %v767_v17 = vld [vmem:[%s4733_s8 + $0xf18] sm:$0xff] }
 0x236   : > { %2113 = vmatmul.mubr.f32.gmra.mrb[34].mxu1 %v666_v0  ;;  %v764_v0 = vld [vmem:[%s4733_s8 + $0xf00] sm:$0xff] }
 0x237   : > { %3163 = vmatmul.mubr.f32.gmra.mrb[10].mxu0 %v414_v49  ;;  %2117 = vmatprep.mubr.f32.mxu1 %v689_v50  ;;  %v766_v49 = vld [vmem:[%s4733_s8 + $0xf10] sm:$0xff]  ;;  %v787_v50 = vld [vmem:[%s4733_s8 + $0xfb8] sm:$0xff] }
 0x238   : > { %3506 = vmatprep.mubr.msk.f32.mxu0 %vm1150_vm0, %v437_v52  ;;  %v789_v52 = vld [vmem:[%s4733_s8 + $0xfc8] sm:$0xff] }
 0x23a   : > { %2118 = vmatmul.mubr.f32.gmra.mrb[36].mxu1 %v688_v29  ;;  %v786_v29 = vld [vmem:[%s4733_s8 + $0xfb0] sm:$0xff] }
 0x23b   : > { %3168 = vmatmul.mubr.f32.gmra.mrb[12].mxu0 %v436_v53  ;;  %2122 = vmatprep.mubr.f32.mxu1 %v711_v21  ;;  %v788_v53 = vld [vmem:[%s4733_s8 + $0xfc0] sm:$0xff]  ;;  %v809_v21 = vld [vmem:[%s4733_s8 + $0x1068] sm:$0xff] }
 0x23c   : > { %3507 = vmatprep.mubr.msk.f32.mxu0 %vm1150_vm0, %v459_v55  ;;  %v811_v55 = vld [vmem:[%s4733_s8 + $0x1078] sm:$0xff] }
 0x23e   : > { %2123 = vmatmul.mubr.f32.gmra.mrb[38].mxu1 %v710_v57  ;;  %v808_v57 = vld [vmem:[%s4733_s8 + $0x1060] sm:$0xff] }
 0x23f   : > { %3173 = vmatmul.mubr.f32.gmra.mrb[14].mxu0 %v458_v58  ;;  %2127 = vmatprep.mubr.f32.mxu1 %v733_v59  ;;  %v810_v58 = vld [vmem:[%s4733_s8 + $0x1070] sm:$0xff]  ;;  %s274_s8 = smul.u32 6, %s4613_s20 }
 0x240   : > { %3508 = vmatprep.mubr.msk.f32.mxu0 %vm1150_vm0, %v481_v60 }
 0x241   : > { %p275_p12 = scmp.lt.s32.totalorder %s274_s8, 23 }
 0x242   : > { %2128 = vmatmul.mubr.f32.gmra.mrb[40].mxu1 %v732_v61 }
 0x243   : > { %3178 = vmatmul.mubr.f32.gmra.mrb[16].mxu0 %v480_v31  ;;  %2132 = vmatprep.mubr.f32.mxu1 %v755_v63  ;;  %s6775_s8 = smov (!%p275_p12, %s274_s8), 23 }
 0x244   : > { %3509 = vmatprep.mubr.msk.f32.mxu0 %vm1150_vm0, %v503_v2  ;;  %s3499_s17 = sshll.u32 %s6775_s8, 3 }
 0x245   : > { %s6594_s26 = scalar_lea.vmem %s6762_s2, %s3499_s17 }
 0x246   : > { %2133 = vmatmul.mubr.f32.gmra.mrb[42].mxu1 %v754_v3 }
 0x247   : > { %3183 = vmatmul.mubr.f32.gmra.mrb[18].mxu0 %v502_v4  ;;  %2137 = vmatprep.mubr.f32.mxu1 %v777_v6 }
 0x248   : > { %3510 = vmatprep.mubr.msk.f32.mxu0 %vm1150_vm0, %v525_v7 }
 0x24a   : > { %2138 = vmatmul.mubr.f32.gmra.mrb[44].mxu1 %v776_v41 }
 0x24b   : > { %3188 = vmatmul.mubr.f32.gmra.mrb[20].mxu0 %v524_v8  ;;  %2142 = vmatprep.mubr.f32.mxu1 %v799_v9 }
 0x24c   : > { %3511 = vmatprep.mubr.msk.f32.mxu0 %vm1150_vm0, %v547_v12 }
 0x24e   : > { %2143 = vmatmul.mubr.f32.gmra.mrb[46].mxu1 %v798_v13 }
 0x24f   : > { %3193 = vmatmul.mubr.f32.gmra.mrb[22].mxu0 %v546_v14  ;;  %3012 = vmatprep.mubr.f32.mxu1 %v567_v15 }
 0x250   : > { %3512 = vmatprep.mubr.msk.f32.mxu0 %vm1150_vm0, %v569_v51 }
 0x252   : > { %3013 = vmatmul.mubr.f32.vlgmr.msra.gmra.mrb[48].mxu1 %v566_v16 }
 0x253   : > { %3198 = vmatmul.mubr.f32.gmra.mrb[48].mxu0 %v568_v18  ;;  %3017 = vmatprep.mubr.f32.mxu1 %v589_v19 }
 0x254   : > { %3513 = vmatprep.mubr.msk.f32.mxu0 %vm1150_vm0, %v591_v20 }
 0x256   : > { %3018 = vmatmul.mubr.f32.gmra.mrb[50].mxu1 %v588_v23 }
 0x257   : > { %3203 = vmatmul.mubr.f32.gmra.mrb[50].mxu0 %v590_v24  ;;  %3022 = vmatprep.mubr.f32.mxu1 %v611_v25 }
 0x258   : > { %3514 = vmatprep.mubr.msk.f32.mxu0 %vm1150_vm0, %v613_v62 }
 0x25a   : > { %3023 = vmatmul.mubr.f32.gmra.mrb[52].mxu1 %v610_v26 }
 0x25b   : > { %3208 = vmatmul.mubr.f32.gmra.mrb[52].mxu0 %v612_v27  ;;  %3027 = vmatprep.mubr.f32.mxu1 %v633_v54 }
 0x25c   : > { %3515 = vmatprep.mubr.msk.f32.mxu0 %vm1150_vm0, %v635_v28 }
 0x25e   : > { %3028 = vmatmul.mubr.f32.gmra.mrb[54].mxu1 %v632_v10 }
 0x25f   : > { %3213 = vmatmul.mubr.f32.gmra.mrb[54].mxu0 %v634_v30  ;;  %3032 = vmatprep.mubr.f32.mxu1 %v655_v32 }
 0x260   : > { %3516 = vmatprep.mubr.msk.f32.mxu0 %vm1150_vm0, %v657_v34 }
 0x262   : > { %3033 = vmatmul.mubr.f32.gmra.mrb[56].mxu1 %v654_v22 }
 0x263   : > { %3218 = vmatmul.mubr.f32.gmra.mrb[56].mxu0 %v656_v35  ;;  %3037 = vmatprep.mubr.f32.mxu1 %v677_v36 }
 0x264   : > { %3517 = vmatprep.mubr.msk.f32.mxu0 %vm1150_vm0, %v679_v33 }
 0x266   : > { %3038 = vmatmul.mubr.f32.gmra.mrb[58].mxu1 %v676_v37 }
 0x267   : > { %3223 = vmatmul.mubr.f32.gmra.mrb[58].mxu0 %v678_v1  ;;  %3042 = vmatprep.mubr.f32.mxu1 %v699_v38 }
 0x268   : > { %3518 = vmatprep.mubr.msk.f32.mxu0 %vm1150_vm0, %v701_v39 }
 0x26a   : > { %3043 = vmatmul.mubr.f32.gmra.mrb[60].mxu1 %v698_v44 }
 0x26b   : > { %3228 = vmatmul.mubr.f32.gmra.mrb[60].mxu0 %v700_v40  ;;  %3047 = vmatprep.mubr.f32.mxu1 %v721_v42 }
 0x26c   : > { %3519 = vmatprep.mubr.msk.f32.mxu0 %vm1150_vm0, %v723_v43 }
 0x26e   : > { %3048 = vmatmul.mubr.f32.gmra.mrb[62].mxu1 %v720_v56 }
 0x26f   : > { %3233 = vmatmul.mubr.f32.gmra.mrb[62].mxu0 %v722_v45  ;;  %3052 = vmatprep.mubr.f32.mxu1 %v743_v46 }
 0x270   : > { %3520 = vmatprep.mubr.msk.f32.mxu0 %vm1150_vm0, %v745_v11 }
 0x272   : > { %3053 = vmatmul.mubr.f32.gmra.mrb[64].mxu1 %v742_v5 }
 0x273   : > { %3238 = vmatmul.mubr.f32.gmra.mrb[64].mxu0 %v744_v47  ;;  %3057 = vmatprep.mubr.f32.mxu1 %v765_v48 }
 0x274   : > { %3521 = vmatprep.mubr.msk.f32.mxu0 %vm1150_vm0, %v767_v17 }
 0x276   : > { %3058 = vmatmul.mubr.f32.gmra.mrb[66].mxu1 %v764_v0  ;;  %v6599_v0 = vld [vmem:[%s6594_s26] sm:$0xff] }
 0x277   : > { %3243 = vmatmul.mubr.f32.gmra.mrb[66].mxu0 %v766_v49  ;;  %3062 = vmatprep.mubr.f32.mxu1 %v787_v50 }
 0x278   : > { %3522 = vmatprep.mubr.msk.f32.mxu0 %vm1150_vm0, %v789_v52 }
 0x27a   : > { %3063 = vmatmul.mubr.f32.gmra.mrb[68].mxu1 %v786_v29  ;;  %v6604_v29 = vld [vmem:[%s6594_s26 + $0x8] sm:$0xff] }
 0x27b   : > { %3248 = vmatmul.mubr.f32.gmra.mrb[68].mxu0 %v788_v53  ;;  %3067 = vmatprep.mubr.f32.mxu1 %v809_v21 }
 0x27c   : > { %3523 = vmatprep.mubr.msk.f32.mxu0 %vm1150_vm0, %v811_v55 }
 0x27e   : > { %3068 = vmatmul.mubr.f32.gmra.mrb[70].mxu1 %v808_v57 }
 0x27f   : > { %3253 = vmatmul.mubr.f32.gmra.mrb[70].mxu0 %v810_v58 }
 0x296   : > { %v2829_v59 = vpop.f32.mrb[24].mxu0 }
 0x297   : > { %v2831_v60 = vpop.f32.mrb[25].mxu0 }
 0x29a   : > { %v2834_v61 = vpop.f32.mrb[26].mxu0 }
 0x29b   : > { %v2836_v31 = vpop.f32.mrb[27].mxu0 }
 0x29e   : > { %v6554_v63 = vpop.f32.mrb[28].mxu0 }
 0x29f   : > { %v2841_v2 = vpop.f32.mrb[29].mxu0 }
 0x2a0   : > { %v6612_v2 = vld [vmem:[%s6594_s26 + $0x10] sm:$0xff] }
 0x2a2   : > { %v6556_v3 = vpop.f32.mrb[30].mxu0 }
 0x2a3   : > { %v2846_v4 = vpop.f32.mrb[31].mxu0 }
 0x2a6   : > { %v6558_v6 = vpop.f32.mrb[32].mxu0 }
 0x2a7   : > { %v2851_v7 = vpop.f32.mrb[33].mxu0 }
 0x2aa   : > { %v6560_v41 = vpop.f32.mrb[34].mxu0 }
 0x2ab   : > { %v2856_v8 = vpop.f32.mrb[35].mxu0 }
 0x2ae   : > { %v6562_v9 = vpop.f32.mrb[36].mxu0 }
 0x2af   : > { %v2861_v12 = vpop.f32.mrb[37].mxu0 }
 0x2b2   : > { %v6564_v13 = vpop.f32.mrb[38].mxu0 }
 0x2b3   : > { %v2866_v14 = vpop.f32.mrb[39].mxu0 }
 0x2b6   : > { %v6566_v15 = vpop.f32.mrb[40].mxu0 }
 0x2b7   : > { %v2871_v51 = vpop.f32.mrb[41].mxu0 }
 0x2ba   : > { %v6568_v16 = vpop.f32.mrb[42].mxu0 }
 0x2bb   : > { %v2876_v18 = vpop.f32.mrb[43].mxu0 }
 0x2be   : > { %v6570_v19 = vpop.f32.mrb[44].mxu0 }
 0x2bf   : > { %v2881_v20 = vpop.f32.mrb[45].mxu0 }
 0x2c2   : > { %v6572_v23 = vpop.f32.mrb[46].mxu0 }
 0x2c3   : > { %v2886_v24 = vpop.f32.mrb[47].mxu0 }
 0x2c4   : > { %v6621_v24 = vld [vmem:[%s6594_s26 + $0x18] sm:$0xff] }
 0x2c5   : > { %v2029_v25 = vpop.f32.mrb[0].mxu1 }
 0x2c6   : > { %v2031_v62 = vpop.f32.mrb[1].mxu1 }
 0x2c9   : > { %v2034_v26 = vpop.f32.mrb[2].mxu1 }
 0x2ca   : > { %v2036_v27 = vpop.f32.mrb[3].mxu1 }
 0x2cd   : > { %v2039_v54 = vpop.f32.mrb[4].mxu1 }
 0x2ce   : > { %v2041_v28 = vpop.f32.mrb[5].mxu1 }
 0x2d1   : > { %v2044_v10 = vpop.f32.mrb[6].mxu1 }
 0x2d2   : > { %v2046_v30 = vpop.f32.mrb[7].mxu1 }
 0x2d5   : > { %v6574_v32 = vpop.f32.mrb[8].mxu1 }
 0x2d6   : > { %v2051_v34 = vpop.f32.mrb[9].mxu1 }
 0x2d9   : > { %v6576_v22 = vpop.f32.mrb[10].mxu1 }
 0x2da   : > { %v2056_v35 = vpop.f32.mrb[11].mxu1 }
 0x2dd   : > { %v6578_v36 = vpop.f32.mrb[12].mxu1 }
 0x2de   : > { %v2061_v33 = vpop.f32.mrb[13].mxu1 }
 0x2df   : > { %v6629_v33 = vld [vmem:[%s6594_s26 + $0x20] sm:$0xff] }
 0x2e1   : > { %v6580_v37 = vpop.f32.mrb[14].mxu1 }
 0x2e2   : > { %v2066_v1 = vpop.f32.mrb[15].mxu1 }
 0x2e5   : > { %v6582_v38 = vpop.f32.mrb[16].mxu1 }
 0x2e6   : > { %v2071_v39 = vpop.f32.mrb[17].mxu1 }
 0x2e9   : > { %v6585_v44 = vpop.f32.mrb[18].mxu1 }
 0x2ea   : > { %v2076_v40 = vpop.f32.mrb[19].mxu1 }
 0x2ed   : > { %v6587_v42 = vpop.f32.mrb[20].mxu1 }
 0x2ee   : > { %v2081_v43 = vpop.f32.mrb[21].mxu1 }
 0x2f1   : > { %v6589_v56 = vpop.f32.mrb[22].mxu1 }
 0x2f2   : > { %v2086_v45 = vpop.f32.mrb[23].mxu1 }
 0x2f5   : > { %v2089_v46 = vpop.f32.mrb[24].mxu1 }
 0x2f6   : > { %v6596_v11 = vadd.f32 %v2829_v59, %v2089_v46  ;;  %v3139_v5 = vpop.f32.mrb[0].mxu0  ;;  %v2091_v47 = vpop.f32.mrb[25].mxu1 }
 0x2f7   : > { %v4069_v48 = vadd.f32 %v3139_v5, %v2029_v25  ;;  %v3141_v17 = vpop.f32.mrb[1].mxu0  ;;  %v6638_v47 = vld [vmem:[%s6594_s26 + $0x28] sm:$0xff] }
 0x2f9   : > { %v2094_v49 = vpop.f32.mrb[26].mxu1  ;;  %v3264_v21 = vmul.f32 %v4069_v48, %v6599_v0 }
 0x2fa   : > { %v6601_v50 = vadd.f32 %v2834_v61, %v2094_v49  ;;  %v3144_v52 = vpop.f32.mrb[2].mxu0  ;;  %v2096_v53 = vpop.f32.mrb[27].mxu1 }
 0x2fb   : > { %v4070_v55 = vadd.f32 %v3144_v52, %v2034_v26  ;;  %v3146_v57 = vpop.f32.mrb[3].mxu0  ;;  %v3289_v4 = vsel %vm3288_vm1, %v3264_v21, 0.0 }
 0x2fd   : > { %v3265_v58 = vmul.f32 %v4070_v55, %v6604_v29  ;;  %v2099_v59 = vpop.f32.mrb[28].mxu1 }
 0x2fe   : > { %v6609_v60 = vadd.f32 %v6554_v63, %v2099_v59  ;;  %v3149_v31 = vpop.f32.mrb[4].mxu0  ;;  %v2101_v61 = vpop.f32.mrb[29].mxu1 }
 0x2ff   : > { %v3290_v7 = vsel %vm3288_vm1, %v3265_v58, 0.0  ;;  %v4071_v8 = vadd.f32 %v3149_v31, %v2039_v54  ;;  %v3151_v12 = vpop.f32.mrb[5].mxu0 }
 0x300   : > { %v3291_v14 = vadd.f32 %v3290_v7, %v3289_v4 }
 0x301   : > { %v3266_v51 = vmul.f32 %v4071_v8, %v6612_v2  ;;  %v2104_v18 = vpop.f32.mrb[30].mxu1 }
 0x302   : > { %v6618_v20 = vadd.f32 %v6556_v3, %v2104_v18  ;;  %v3154_v63 = vpop.f32.mrb[6].mxu0  ;;  %v2106_v25 = vpop.f32.mrb[31].mxu1 }
 0x303   : > { %v3292_v62 = vsel %vm3288_vm1, %v3266_v51, 0.0  ;;  %v4072_v26 = vadd.f32 %v3154_v63, %v2044_v10  ;;  %v3156_v27 = vpop.f32.mrb[7].mxu0 }
 0x304   : > { %v3293_v28 = vadd.f32 %v3292_v62, %v3291_v14 }
 0x305   : > { %v3267_v54 = vmul.f32 %v4072_v26, %v6621_v24  ;;  %v2109_v30 = vpop.f32.mrb[32].mxu1 }
 0x306   : > { %v6626_v34 = vadd.f32 %v6558_v6, %v2109_v30  ;;  %v3159_v35 = vpop.f32.mrb[8].mxu0  ;;  %v2111_v3 = vpop.f32.mrb[33].mxu1 }
 0x307   : > { %v3294_v1 = vsel %vm3288_vm1, %v3267_v54, 0.0  ;;  %v4073_v39 = vadd.f32 %v3159_v35, %v6574_v32  ;;  %v3161_v40 = vpop.f32.mrb[9].mxu0 }
 0x308   : > { %v3295_v43 = vadd.f32 %v3294_v1, %v3293_v28 }
 0x309   : > { %v3268_v10 = vmul.f32 %v4073_v39, %v6629_v33  ;;  %v2114_v45 = vpop.f32.mrb[34].mxu1 }
 0x30a   : > { %v6635_v46 = vadd.f32 %v6560_v41, %v2114_v45  ;;  %v3164_v5 = vpop.f32.mrb[10].mxu0  ;;  %v2116_v6 = vpop.f32.mrb[35].mxu1 }
 0x30b   : > { %v3296_v48 = vsel %vm3288_vm1, %v3268_v10, 0.0  ;;  %v4074_v17 = vadd.f32 %v3164_v5, %v6576_v22  ;;  %v3166_v49 = vpop.f32.mrb[11].mxu0 }
 0x30c   : > { %v3297_v52 = vadd.f32 %v3296_v48, %v3295_v43 }
 0x30d   : > { %v3269_v32 = vmul.f32 %v4074_v17, %v6638_v47  ;;  %v2119_v53 = vpop.f32.mrb[36].mxu1 }
 0x30e   : > { %v6644_v21 = vadd.f32 %v6562_v9, %v2119_v53  ;;  %v3169_v55 = vpop.f32.mrb[12].mxu0  ;;  %v2121_v57 = vpop.f32.mrb[37].mxu1 }
 0x30f   : > { %v3298_v41 = vsel %vm3288_vm1, %v3269_v32, 0.0  ;;  %v4075_v58 = vadd.f32 %v3169_v55, %v6578_v36  ;;  %v3171_v59 = vpop.f32.mrb[13].mxu0 }
 0x310   : > { %v3299_v31 = vadd.f32 %v3298_v41, %v3297_v52 }
 0x311   : > { %v2124_v61 = vpop.f32.mrb[38].mxu1  ;;  %v3270_v12 = vmul.f32 %v4075_v58, %v6599_v0 }
 0x312   : > { %v3300_v4 = vrot.slane %v3299_v31, 4  ;;  %v6649_v22 = vadd.f32 %v6564_v13, %v2124_v61  ;;  %v3174_v7 = vpop.f32.mrb[14].mxu0  ;;  %v2126_v8 = vpop.f32.mrb[39].mxu1 }
 0x313   : > { %v4076_v9 = vadd.f32 %v3174_v7, %v6580_v37  ;;  %v3176_v14 = vpop.f32.mrb[15].mxu0  ;;  %v3306_v13 = vsel %vm3288_vm1, %v3270_v12, 0.0 }
 0x314   : > { %v3301_v51 = vadd.f32 %v3300_v4, %v3299_v31 }
 0x315   : > { %v3271_v18 = vmul.f32 %v4076_v9, %v6604_v29  ;;  %v2129_v63 = vpop.f32.mrb[40].mxu1 }
 0x316   : > { %v3302_v25 = vrot.slane %v3301_v51, 2  ;;  %v6655_v36 = vadd.f32 %v6566_v15, %v2129_v63  ;;  %v3179_v62 = vpop.f32.mrb[16].mxu0  ;;  %v2131_v26 = vpop.f32.mrb[41].mxu1 }
 0x317   : > { %v3307_v27 = vsel %vm3288_vm1, %v3271_v18, 0.0  ;;  %v4077_v28 = vadd.f32 %v3179_v62, %v6582_v38  ;;  %v3181_v54 = vpop.f32.mrb[17].mxu0 }
 0x318   : > { %v3303_v30 = vadd.f32 %v3302_v25, %v3301_v51  ;;  %v3308_v37 = vadd.f32 %v3307_v27, %v3306_v13 }
 0x319   : > { %v3272_v35 = vmul.f32 %v4077_v28, %v6612_v2  ;;  %v2134_v3 = vpop.f32.mrb[42].mxu1 }
 0x31a   : > { %v3304_v1 = vrot.slane %v3303_v30, 1  ;;  %v6662_v39 = vadd.f32 %v6568_v16, %v2134_v3  ;;  %v3184_v15 = vpop.f32.mrb[18].mxu0  ;;  %v2136_v40 = vpop.f32.mrb[43].mxu1 }
 0x31b   : > { %v3309_v43 = vsel %vm3288_vm1, %v3272_v35, 0.0  ;;  %v4078_v10 = vadd.f32 %v3184_v15, %v6585_v44  ;;  %v3186_v45 = vpop.f32.mrb[19].mxu0 }
 0x31c   : > { %v6666_v5 = vadd.f32 %v3304_v1, %v3303_v30  ;;  %v3310_v38 = vadd.f32 %v3309_v43, %v3308_v37 }
 0x31d   : > { %v3273_v6 = vmul.f32 %v4078_v10, %v6621_v24  ;;  %v2139_v48 = vpop.f32.mrb[44].mxu1 }
 0x31e   : > { %v6670_v17 = vadd.f32 %v6570_v19, %v2139_v48  ;;  %v3189_v49 = vpop.f32.mrb[20].mxu0  ;;  %v2141_v52 = vpop.f32.mrb[45].mxu1 }
 0x31f   : > { %v3311_v16 = vsel %vm3288_vm1, %v3273_v6, 0.0  ;;  %v4079_v32 = vadd.f32 %v3189_v49, %v6587_v42  ;;  %v3191_v53 = vpop.f32.mrb[21].mxu0 }
 0x320   : > { %v3312_v55 = vadd.f32 %v3311_v16, %v3310_v38 }
 0x321   : > { %v3274_v44 = vmul.f32 %v4079_v32, %v6629_v33  ;;  %v2144_v57 = vpop.f32.mrb[46].mxu1 }
 0x322   : > { %v6676_v41 = vadd.f32 %v6572_v23, %v2144_v57  ;;  %v3194_v58 = vpop.f32.mrb[22].mxu0  ;;  %v2146_v59 = vpop.f32.mrb[47].mxu1 }
 0x323   : > { %v3313_v31 = vsel %vm3288_vm1, %v3274_v44, 0.0  ;;  %v4080_v19 = vadd.f32 %v3194_v58, %v6589_v56  ;;  %v3196_v61 = vpop.f32.mrb[23].mxu0 }
 0x324   : > { %v3314_v4 = vadd.f32 %v3313_v31, %v3312_v55 }
 0x325   : > { %v3275_v7 = vmul.f32 %v4080_v19, %v6638_v47  ;;  %v3014_v8 = vpop.f32.mrb[48].mxu1 }
 0x326   : > { %v4082_v42 = vadd.f32 %v6596_v11, %v3014_v8  ;;  %v3016_v12 = vpop.f32.mrb[49].mxu1  ;;  %v3199_v9 = vpop.f32.mrb[48].mxu0 }
 0x327   : > { %v3315_v14 = vsel %vm3288_vm1, %v3275_v7, 0.0  ;;  %v3201_v51 = vpop.f32.mrb[49].mxu0 }
 0x328   : > { %v3316_v23 = vadd.f32 %v3315_v14, %v3314_v4  ;;  %v4083_v18 = vadd.f32 %v4082_v42, %v3199_v9 }
 0x329   : > { %v3019_v63 = vpop.f32.mrb[50].mxu1 }
 0x32a   : > { %v3317_v25 = vrot.slane %v3316_v23, 4  ;;  %v4085_v62 = vadd.f32 %v6601_v50, %v3019_v63  ;;  %v3021_v26 = vpop.f32.mrb[51].mxu1  ;;  %v3204_v56 = vpop.f32.mrb[50].mxu0  ;;  %v3276_v28 = vmul.f32 %v4083_v18, %v6599_v0 }
 0x32b   : > { %v3206_v13 = vpop.f32.mrb[51].mxu0 }
 0x32c   : > { %v3318_v27 = vadd.f32 %v3317_v25, %v3316_v23  ;;  %v4086_v54 = vadd.f32 %v4085_v62, %v3204_v56  ;;  %v3323_v43 = vsel %vm3288_vm1, %v3276_v28, 0.0 }
 0x32d   : > { %v3024_v30 = vpop.f32.mrb[52].mxu1 }
 0x32e   : > { %v3319_v11 = vrot.slane %v3318_v27, 2  ;;  %v3277_v37 = vmul.f32 %v4086_v54, %v6604_v29  ;;  %v4088_v35 = vadd.f32 %v6609_v60, %v3024_v30  ;;  %v3026_v3 = vpop.f32.mrb[53].mxu1  ;;  %v3209_v1 = vpop.f32.mrb[52].mxu0 }
 0x32f   : > { %v3211_v15 = vpop.f32.mrb[53].mxu0 }
 0x330   : > { %v3320_v40 = vadd.f32 %v3319_v11, %v3318_v27  ;;  %v3324_v50 = vsel %vm3288_vm1, %v3277_v37, 0.0  ;;  %v4089_v10 = vadd.f32 %v4088_v35, %v3209_v1 }
 0x331   : > { %v3325_v45 = vadd.f32 %v3324_v50, %v3323_v43  ;;  %v3029_v38 = vpop.f32.mrb[54].mxu1 }
 0x332   : > { %v3321_v6 = vrot.slane %v3320_v40, 1  ;;  %v3278_v48 = vmul.f32 %v4089_v10, %v6612_v2  ;;  %v4091_v49 = vadd.f32 %v6618_v20, %v3029_v38  ;;  %v3031_v52 = vpop.f32.mrb[55].mxu1  ;;  %v3214_v16 = vpop.f32.mrb[54].mxu0 }
 0x333   : > { %v3216_v32 = vpop.f32.mrb[55].mxu0 }
 0x334   : > { %v6691_v60 = vadd.f32 %v3321_v6, %v3320_v40  ;;  %v3326_v53 = vsel %vm3288_vm1, %v3278_v48, 0.0  ;;  %v4092_v55 = vadd.f32 %v4091_v49, %v3214_v16 }
 0x335   : > { %v3327_v44 = vadd.f32 %v3326_v53, %v3325_v45  ;;  %v3034_v57 = vpop.f32.mrb[56].mxu1 }
 0x336   : > { %v3279_v58 = vmul.f32 %v4092_v55, %v6621_v24  ;;  %v4094_v59 = vadd.f32 %v6626_v34, %v3034_v57  ;;  %v3036_v31 = vpop.f32.mrb[57].mxu1  ;;  %v3219_v19 = vpop.f32.mrb[56].mxu0 }
 0x337   : > { %v3221_v61 = vpop.f32.mrb[57].mxu0 }
 0x338   : > { %v3328_v4 = vsel %vm3288_vm1, %v3279_v58, 0.0  ;;  %v4095_v20 = vadd.f32 %v4094_v59, %v3219_v19 }
 0x339   : > { %v3329_v7 = vadd.f32 %v3328_v4, %v3327_v44  ;;  %v3039_v8 = vpop.f32.mrb[58].mxu1 }
 0x33a   : > { %v3280_v42 = vmul.f32 %v4095_v20, %v6629_v33  ;;  %v4097_v12 = vadd.f32 %v6635_v46, %v3039_v8  ;;  %v3041_v9 = vpop.f32.mrb[59].mxu1  ;;  %v3224_v14 = vpop.f32.mrb[58].mxu0 }
 0x33b   : > { %v3226_v51 = vpop.f32.mrb[59].mxu0 }
 0x33c   : > { %v3330_v23 = vsel %vm3288_vm1, %v3280_v42, 0.0  ;;  %v4098_v18 = vadd.f32 %v4097_v12, %v3224_v14 }
 0x33d   : > { %v3331_v63 = vadd.f32 %v3330_v23, %v3329_v7  ;;  %v3044_v34 = vpop.f32.mrb[60].mxu1 }
 0x33e   : > { %v3281_v25 = vmul.f32 %v4098_v18, %v6638_v47  ;;  %v4100_v62 = vadd.f32 %v6644_v21, %v3044_v34  ;;  %v3046_v26 = vpop.f32.mrb[61].mxu1  ;;  %v3229_v56 = vpop.f32.mrb[60].mxu0 }
 0x33f   : > { %v3231_v13 = vpop.f32.mrb[61].mxu0 }
 0x340   : > { %v3332_v27 = vsel %vm3288_vm1, %v3281_v25, 0.0  ;;  %v4101_v28 = vadd.f32 %v4100_v62, %v3229_v56 }
 0x341   : > { %v3333_v54 = vadd.f32 %v3332_v27, %v3331_v63  ;;  %v3049_v46 = vpop.f32.mrb[62].mxu1 }
 0x342   : > { %v4103_v30 = vadd.f32 %v6649_v22, %v3049_v46  ;;  %v3051_v11 = vpop.f32.mrb[63].mxu1  ;;  %v3234_v37 = vpop.f32.mrb[62].mxu0  ;;  %v3282_v1 = vmul.f32 %v4101_v28, %v6599_v0 }
 0x343   : > { %v3334_v35 = vrot.slane %v3333_v54, 4  ;;  %v3236_v3 = vpop.f32.mrb[63].mxu0 }
 0x344   : > { %v4104_v15 = vadd.f32 %v4103_v30, %v3234_v37  ;;  %v3340_v48 = vsel %vm3288_vm1, %v3282_v1, 0.0 }
 0x345   : > { %v3335_v40 = vadd.f32 %v3334_v35, %v3333_v54  ;;  %v3054_v43 = vpop.f32.mrb[64].mxu1 }
 0x346   : > { %v3283_v21 = vmul.f32 %v4104_v15, %v6604_v29  ;;  %v4106_v50 = vadd.f32 %v6655_v36, %v3054_v43  ;;  %v3056_v10 = vpop.f32.mrb[65].mxu1  ;;  %v3239_v45 = vpop.f32.mrb[64].mxu0 }
 0x347   : > { %v3336_v38 = vrot.slane %v3335_v40, 2  ;;  %v3241_v6 = vpop.f32.mrb[65].mxu0 }
 0x348   : > { %v3341_v22 = vsel %vm3288_vm1, %v3283_v21, 0.0  ;;  %v4107_v49 = vadd.f32 %v4106_v50, %v3239_v45 }
 0x349   : > { %v3337_v52 = vadd.f32 %v3336_v38, %v3335_v40  ;;  %v3342_v16 = vadd.f32 %v3341_v22, %v3340_v48  ;;  %v3059_v32 = vpop.f32.mrb[66].mxu1 }
 0x34a   : > { %v3284_v0 = vmul.f32 %v4107_v49, %v6612_v2  ;;  %v4109_v53 = vadd.f32 %v6662_v39, %v3059_v32  ;;  %v3061_v55 = vpop.f32.mrb[67].mxu1  ;;  %v3244_v29 = vpop.f32.mrb[66].mxu0 }
 0x34b   : > { %v3338_v44 = vrot.slane %v3337_v52, 1  ;;  %v3246_v36 = vpop.f32.mrb[67].mxu0 }
 0x34c   : > { %v3343_v57 = vsel %vm3288_vm1, %v3284_v0, 0.0  ;;  %v4110_v58 = vadd.f32 %v4109_v53, %v3244_v29 }
 0x34d   : > { %v3339_v59 = vadd.f32 %v3338_v44, %v3337_v52  ;;  %v3344_v31 = vadd.f32 %v3343_v57, %v3342_v16  ;;  %v3064_v19 = vpop.f32.mrb[68].mxu1 }
 0x34e   : > { %v3285_v61 = vmul.f32 %v4110_v58, %v6621_v24  ;;  %v4112_v4 = vadd.f32 %v6670_v17, %v3064_v19  ;;  %v3066_v20 = vpop.f32.mrb[69].mxu1  ;;  %v3249_v7 = vpop.f32.mrb[68].mxu0 }
 0x34f   : > { %v3251_v8 = vpop.f32.mrb[69].mxu0 }
 0x350   : > { %v3345_v2 = vsel %vm3288_vm1, %v3285_v61, 0.0  ;;  %v4113_v39 = vadd.f32 %v4112_v4, %v3249_v7 }
 0x351   : > { %v3346_v42 = vadd.f32 %v3345_v2, %v3344_v31  ;;  %v3069_v12 = vpop.f32.mrb[70].mxu1 }
 0x352   : > { %v3286_v9 = vmul.f32 %v4113_v39, %v6629_v33  ;;  %v4115_v14 = vadd.f32 %v6676_v41, %v3069_v12  ;;  %v3071_v51 = vpop.f32.mrb[71].mxu1  ;;  %v3254_v23 = vpop.f32.mrb[70].mxu0  ;;  %v3366_v41 = vsel (!%p3524_p13), %vm3365_vm2, %v6691_v60, %v6666_v5 }
 0x353   : > { %v3256_v18 = vpop.f32.mrb[71].mxu0 }
 0x354   : > { %v3347_v63 = vsel %vm3288_vm1, %v3286_v9, 0.0  ;;  %v4116_v24 = vadd.f32 %v4115_v14, %v3254_v23 }
 0x355   : > { %v3348_v34 = vadd.f32 %v3347_v63, %v3346_v42 }
 0x356   : > { %v3287_v17 = vmul.f32 %v4116_v24, %v6638_v47  ;;  %v3368_v47 = vsel (!%p3524_p13), %vm3367_vm3, %v3339_v59, %v3366_v41 }
 0x358   : > { %v3349_v25 = vsel %vm3288_vm1, %v3287_v17, 0.0 }
 0x359   : > { %v3350_v62 = vadd.f32 %v3349_v25, %v3348_v34 }
 0x35b   : > { %v3351_v26 = vrot.slane %v3350_v62, 4 }
 0x35d   : > { %v3352_v56 = vadd.f32 %v3351_v26, %v3350_v62 }
 0x35f   : > { %v3353_v13 = vrot.slane %v3352_v56, 2  ;;  %3360 = sbr.rel (%p3524_p13) target bundleno = 873 (0x369), region = 44 }
 0x361   : > { %v3354_v27 = vadd.f32 %v3353_v13, %v3352_v56 }
 0x363   : > { %v3355_v28 = vrot.slane %v3354_v27, 1 }
 0x365   : > { %v3356_v33 = vadd.f32 %v3355_v28, %v3354_v27 }
 0x367   : > { %v3370_v54 = vsel %vm3369_vm4, %v3356_v33, %v3368_v47 }
 0x368   : > { %3373 = vst.msk [vmem:[%s6764_s4] sm:$0xf] %vm3372_vm5, %v3370_v54 }
 0x369 PF: > { %p3525_p0 = scmp.eq.s32.totalorder %s4613_s20, 0 }
 0x36a   : > { %vm3383_vm6 = vcmask (!%p3525_p0), 1041409   ;;  %vm3385_vm7 = vcmask (!%p3525_p0), 1042434   ;;  %vm3387_vm8 = vcmask (!%p3525_p0), 1043459   ;;  %vm3391_vm9 = vcmask (!%p3525_p0), 3072  }
 0x36b   : > { %3377 = sbr.rel (%p3525_p0) target bundleno = 883 (0x373), region = 48  ;;  %v3384_v30 = vsel (!%p3525_p0), %vm3383_vm6, %v6691_v60, %v6666_v5 }
 0x36c   : > { %v3386_v11 = vsel (!%p3525_p0), %vm3385_vm7, %v3339_v59, %v3384_v30 }
 0x36d   : > { %v3388_v37 = vsel (!%p3525_p0), %vm3387_vm8, %v3356_v33, %v3386_v11 }
 0x36f   : > { %v3378_v46 = vld [vmem:[%s6764_s4] sm:$0xf] (!%p3525_p0) }
 0x370   : > { %v3390_v35 = vadd.f32 (!%p3525_p0), %v3388_v37, %v3378_v46 }
 0x372   : > { %3392 = vst.msk [vmem:[%s6764_s4] sm:$0xf] %vm3391_vm9, %v3390_v35 }
 0x373 PF: > { %p3526_p1 = scmp.ne.s32.totalorder %s4613_s20, 3 }
 0x374   : > { %s3398_s9 = sld [smem:[#allocation2]] (!%p3526_p1)  ;;  %vm3405_vm10 = vcmask (!%p3526_p1), 3072  }
 0x375   : > { %3396 = sbr.rel (%p3526_p1) target bundleno = 911 (0x38f), region = 52 }
 0x379   : > { %v3397_v3 = vld [vmem:[%s6764_s4] sm:$0xf] (!%p3526_p1) }
 0x37a   : > { %v3399_v1 = vstv (!%p3526_p1), %s3398_s9 }
 0x37b   : > { %v3400_v15 = vadd.f32 (!%p3526_p1), %v3399_v1, %v3397_v3 }
 0x37d   : > { %v3401_v5 = vand.u32 2147483647, %v3400_v15 }
 0x37f   : > { %v3402_v60 = vadd.f32 1.0, %v3401_v5 }
 0x381   : > { %4569 = vrcp.f32 %v3402_v60 }
 0x38b   : > { %v4570_v40 = vpop.eup %4569 }
 0x38c   : > { %v3404_v43 = vmul.f32 %v4570_v40, %v3401_v5 }
 0x38e   : > { %3406 = vst.msk [vmem:[%s6764_s4] sm:$0xf] %vm3405_vm10, %v3404_v43 }
 0x38f PF: > { %s18_s22 = sadd.s32 1, %s4621_s22   ;;  %s6767_s17 = smov %s4605_s18 }
 0x390   : > { %p15_p2 = scmp.ge.s32.totalorder %s18_s22, 6   ;;  %s6768_s18 = smov %s4609_s19 }
 0x391   : > { %s6769_s19 = smov %s4706_s28  ;;  %s6770_s20 = smov %s4617_s21 }
 0x392   : > { %s6771_s21 = smov %s6773_s23  ;;  %17 = sbr.rel (!%p15_p2) target bundleno = 6 (0x6), region = 96 }
 0x399   :  { %3426 = vsyncpa [#allocation4], 1 }
 0x39a   :  { %3428 = vsyncpa [#allocation4 + $0x1], 1 }

</bundles_post_ra>
